<compile_context>
chip_gen: v7x
topology: tpu7x:2x2x1
jax: 0.10.0
libtpu: 0.0.40
codegen_flags: <defaults>
</compile_context>

<pallas_src>
import math
from functools import partial

import numpy as np
import jax
import jax.numpy as jnp
from jax import lax
from jax.experimental import pallas as pl

EPS = 1e-5


def _lane_mod(v, m):
    # power-of-two fast path (bitwise ops are guaranteed to lower on the VPU)
    if m & (m - 1) == 0:
        return jnp.bitwise_and(v, m - 1)
    return v % m


def _lane_div(v, m):
    if m & (m - 1) == 0:
        return jnp.right_shift(v, int(m).bit_length() - 1)
    return v // m


def _shift_lanes(x, off):
    """patch[:, l] = x[:, l + off] with circular wrap (wrapped lanes get masked)."""
    if off == 0:
        return x
    # jnp.roll(x, -off): out[l] = x[(l + off) % n]; lowers to two lane slices + concat
    # (same XLU lane-rotate class as pltpu.roll, with unambiguous semantics).
    return jnp.roll(x, -off, axis=1)


# ----------------------------------------------------------------------------
# Fused Block kernel
# ----------------------------------------------------------------------------
def block_kernel(x_ref, g1_ref, be1_ref, g2_ref, be2_ref,
                 w1_ref, w2_ref, wsc_ref, bout_ref, up_ref,
                 o_ref, *, num_img, h2, w2):
    cin, nhw_in = x_ref.shape           # channel-major input (Cin, N*H*W)
    hc = w1_ref.shape[1]                # hidden channels (conv1 out)
    cout = w2_ref.shape[1]              # block output channels
    hw_in = nhw_in // num_img
    hw_up = h2 * w2
    nhw = num_img * hw_up               # fused (n, i, j) lane axis after upsample

    # ---- BN1 (training-mode batch stats, one pass) + conditional affine + ReLU ----
    xf = x_ref[...]                                           # (Cin, N*H*W) f32
    mu1 = jnp.mean(xf, axis=1, keepdims=True)
    q1 = jnp.mean(xf * xf, axis=1, keepdims=True)
    inv1 = lax.rsqrt(q1 - mu1 * mu1 + EPS)
    xn1 = ((xf - mu1) * inv1).reshape(cin, num_img, hw_in)
    h1 = jnp.maximum(g1_ref[...][:, :, None] * xn1 + be1_ref[...][:, :, None], 0.0)
    h1_r = h1.reshape(cin * num_img, hw_in)                   # rows (c, n)

    # ---- shortcut 1x1 conv BEFORE the upsample (commutes; 4x fewer lanes) ----
    s = jnp.dot(wsc_ref[...], xf, preferred_element_type=jnp.float32)   # (Cout, N*H*W)
    s_r = s.reshape(cout * num_img, hw_in)                    # rows (c, n)

    # ---- single merged bilinear 2x upsample matmul (residual rows + shortcut rows) ----
    pre = jnp.concatenate([h1_r, s_r], axis=0)                # (Cin*N + Cout*N, H*W)
    up = up_ref[...].astype(jnp.float32)                      # bf16 -> f32, exact
    u = jnp.dot(pre, up, preferred_element_type=jnp.float32)  # (rows, H2*W2)
    u_res = u[0:cin * num_img, :].reshape(cin, nhw)           # (Cin, N*H2*W2)
    u_sc = u[cin * num_img:, :].reshape(cout, nhw)            # (Cout, N*H2*W2)

    # ---- boundary masks for the shift-based 3x3 taps (shared by both convs) ----
    lane = lax.broadcasted_iota(jnp.int32, (1, nhw), 1)
    jj = _lane_mod(lane, w2)                                  # column within row
    rr = _lane_mod(lane, hw_up)                               # offset within image
    col_lo = jj >= 1                                          # valid for dx = -1
    col_hi = jj <= (w2 - 2)                                   # valid for dx = +1
    row_lo = rr >= w2                                         # valid for dy = -1
    row_hi = rr < (hw_up - w2)                                # valid for dy = +1

    def conv3x3(act, w_taps_ref):
        """3x3 same-pad conv on a fused (C, N*H2*W2) lane-dense slab: shifts + masks."""
        acc = None
        for k in range(9):
            dy = k // 3 - 1
            dx = k % 3 - 1
            t = _shift_lanes(act, dy * w2 + dx)
            m = None
            if dy == -1:
                m = row_lo
            elif dy == 1:
                m = row_hi
            if dx == -1:
                m = col_lo if m is None else jnp.logical_and(m, col_lo)
            elif dx == 1:
                m = col_hi if m is None else jnp.logical_and(m, col_hi)
            if m is not None:
                t = jnp.where(m, t, 0.0)
            p = jnp.dot(w_taps_ref[k], t, preferred_element_type=jnp.float32)
            acc = p if acc is None else acc + p               # init from first tap
        return acc

    # ---- conv1 (bias dropped: per-channel constant cancels vs BN2 mean-subtract) ----
    c1 = conv3x3(u_res, w1_ref)                               # (Hc, N*H2*W2)

    # ---- BN2 (one-pass batch stats) + per-sample conditional affine + ReLU ----
    mu2 = jnp.mean(c1, axis=1, keepdims=True)
    q2 = jnp.mean(c1 * c1, axis=1, keepdims=True)
    inv2 = lax.rsqrt(q2 - mu2 * mu2 + EPS)
    c1n = (c1 - mu2) * inv2                                   # (Hc, nhw)
    nid = _lane_div(lane, hw_up)                              # (1, nhw) sample index
    g2c = g2_ref[...]                                         # (Hc, N)
    be2c = be2_ref[...]
    g2e = jnp.where(nid == 0, g2c[:, 0:1], 0.0)               # per-sample broadcast
    be2e = jnp.where(nid == 0, be2c[:, 0:1], 0.0)             # without unfusing lanes
    for n in range(1, num_img):
        g2e = g2e + jnp.where(nid == n, g2c[:, n:n + 1], 0.0)
        be2e = be2e + jnp.where(nid == n, be2c[:, n:n + 1], 0.0)
    a2 = jnp.maximum(g2e * c1n + be2e, 0.0)                   # (Hc, nhw)

    # ---- conv2 + shortcut add + fused biases (b2 + b_sc) ----
    c2 = conv3x3(a2, w2_ref)                                  # (Cout, nhw)
    out = c2 + u_sc + bout_ref[...]

    # ---- lane-dense store: rows (n, cout), full 1024-lane unmasked vst ----
    for n in range(num_img):
        o_ref[n * cout:(n + 1) * cout, :] = (
            out[:, n * hw_up:(n + 1) * hw_up].astype(o_ref.dtype))


# ----------------------------------------------------------------------------
# Wrapper: per-call path is only embedding lookups + x layout + pallas_call
# ----------------------------------------------------------------------------
@jax.jit
def block_forward(x, y, kp):
    """Block.forward(x, y) with upsample=True, num_classes>0. x: (N, Cin, H, W) NCHW."""
    n, cin, h, w = x.shape
    cout = kp["w2k"].shape[1]
    h2, w2 = 2 * h, 2 * w

    g1 = kp["emb_g1"][y].T                                    # (Cin, N)
    be1 = kp["emb_be1"][y].T
    g2 = kp["emb_g2"][y].T                                    # (Hc, N)
    be2 = kp["emb_be2"][y].T
    x_cn = jnp.transpose(x, (1, 0, 2, 3)).reshape(cin, n * h * w)   # channel-major

    kern = partial(block_kernel, num_img=n, h2=h2, w2=w2)
    out2d = pl.pallas_call(
        kern,
        out_shape=jax.ShapeDtypeStruct((n * cout, h2 * w2), jnp.float32),
    )(x_cn, g1, be1, g2, be2, kp["w1k"], kp["w2k"], kp["wsc"], kp["bout"], kp["up"])

    return out2d.reshape(n, cout, h2, w2)                     # free contiguous reshape


# ----------------------------------------------------------------------------
# One-time parameter preparation (hoisted out of the per-call forward path)
# ----------------------------------------------------------------------------
def bilinear_matrix(out_size, in_size):
    """Row-stochastic 1D matrix for F.interpolate(..., mode='bilinear') (align_corners=False)."""
    U = np.zeros((out_size, in_size), np.float32)
    scale = in_size / out_size
    for i in range(out_size):
        s = max((i + 0.5) * scale - 0.5, 0.0)
        i0 = min(int(math.floor(s)), in_size - 1)
        i1 = min(i0 + 1, in_size - 1)
        l1 = s - i0
        U[i, i0] += 1.0 - l1
        U[i, i1] += l1
    return U


def prepare_kernel_params(params, h, w):
    hc, cin = params["w1"].shape[0], params["w1"].shape[1]
    cout = params["w2"].shape[0]
    w1k = jnp.transpose(params["w1"], (2, 3, 0, 1)).reshape(9, hc, cin)   # (tap, O, I)
    w2k = jnp.transpose(params["w2"], (2, 3, 0, 1)).reshape(9, cout, hc)
    wsc = params["w_sc"].reshape(cout, cin)
    # conv1 bias intentionally not shipped (cancelled exactly by training-mode BN2);
    # conv2 bias and shortcut bias are folded into a single per-channel vector.
    bout = (params["b2"] + params["b_sc"]).reshape(cout, 1)
    uh = bilinear_matrix(2 * h, h)
    uw = bilinear_matrix(2 * w, w)
    # 2x-bilinear kron entries {0, 1/16, 3/16, 1/4, 9/16, 3/4, 1} are exact in bf16.
    up = jnp.asarray(np.kron(uh, uw).T, dtype=jnp.bfloat16)              # (H*W, 4*H*W)
    return {
        "w1k": w1k, "w2k": w2k, "wsc": wsc, "bout": bout, "up": up,
        "emb_g1": params["emb_g1"], "emb_be1": params["emb_be1"],
        "emb_g2": params["emb_g2"], "emb_be2": params["emb_be2"],
    }


def init_params(key, in_ch, h_ch, out_ch, num_classes, ksize):
    ks = jax.random.split(key, 6)

    def conv_w(k, cout, cin, kh, kw):
        bound = 1.0 / math.sqrt(cin * kh * kw)
        return jax.random.uniform(k, (cout, cin, kh, kw), jnp.float32, -bound, bound)

    def conv_b(k, cout, cin, kh, kw):
        bound = 1.0 / math.sqrt(cin * kh * kw)
        return jax.random.uniform(k, (cout,), jnp.float32, -bound, bound)

    return {
        "w1": conv_w(ks[0], h_ch, in_ch, ksize, ksize),
        "b1": conv_b(ks[1], h_ch, in_ch, ksize, ksize),
        "w2": conv_w(ks[2], out_ch, h_ch, ksize, ksize),
        "b2": conv_b(ks[3], out_ch, h_ch, ksize, ksize),
        "w_sc": conv_w(ks[4], out_ch, in_ch, 1, 1),
        "b_sc": conv_b(ks[5], out_ch, in_ch, 1, 1),
        # CategoricalConditionalBatchNorm2d._initialize(): ones / zeros embeddings
        "emb_g1": jnp.ones((num_classes, in_ch), jnp.float32),
        "emb_be1": jnp.zeros((num_classes, in_ch), jnp.float32),
        "emb_g2": jnp.ones((num_classes, h_ch), jnp.float32),
        "emb_be2": jnp.zeros((num_classes, h_ch), jnp.float32),
    }


# ----------------------------------------------------------------------------
# Pure-JAX reference (NCHW) for the numerical sanity check
# ----------------------------------------------------------------------------
def reference_forward(x, y, params, uh, uw):
    def bn(x, g, b):
        m = jnp.mean(x, axis=(0, 2, 3), keepdims=True)
        v = jnp.mean(jnp.square(x - m), axis=(0, 2, 3), keepdims=True)
        xn = (x - m) / jnp.sqrt(v + EPS)
        return g[:, :, None, None] * xn + b[:, :, None, None]

    def up(x):
        return jnp.einsum("ih,jw,nchw->ncij", uh, uw, x)

    def conv(x, w, b, pad):
        return jax.lax.conv_general_dilated(
            x, w, (1, 1), [(pad, pad), (pad, pad)],
            dimension_numbers=("NCHW", "OIHW", "NCHW")) + b[None, :, None, None]

    g1, be1 = params["emb_g1"][y], params["emb_be1"][y]
    g2, be2 = params["emb_g2"][y], params["emb_be2"][y]
    h = jnp.maximum(bn(x, g1, be1), 0.0)
    h = up(h)
    h = conv(h, params["w1"], params["b1"], 1)       # reference keeps b1: validates the
    h = jnp.maximum(bn(h, g2, be2), 0.0)             # exact cancellation inside BN2
    r = conv(h, params["w2"], params["b2"], 1)
    sc = conv(up(x), params["w_sc"], params["b_sc"], 0)
    return sc + r


if __name__ == "__main__":
    N, in_ch, out_ch, H, W = 2, 4, 8, 16, 16
    h_ch = out_ch
    num_classes = 3

    key = jax.random.PRNGKey(0)
    kx, ky, kparam = jax.random.split(key, 3)
    x = jax.random.normal(kx, (N, in_ch, H, W), jnp.float32)    # NCHW like PyTorch
    y = jax.random.randint(ky, (N,), 0, num_classes)            # class indices
    params = init_params(kparam, in_ch, h_ch, out_ch, num_classes, ksize=3)

    kp = prepare_kernel_params(params, H, W)                    # one-time layout work

    out = jax.block_until_ready(block_forward(x, y, kp))
    assert out.shape == (N, out_ch, 2 * H, 2 * W), out.shape

    UH = jnp.asarray(bilinear_matrix(2 * H, H))
    UW = jnp.asarray(bilinear_matrix(2 * W, W))
    ref = jax.block_until_ready(reference_forward(x, y, params, UH, UW))
    max_diff = float(jnp.max(jnp.abs(out - ref)))
    assert bool(jnp.allclose(out, ref, atol=1e-3, rtol=1e-3)), f"max diff {max_diff}"

    print("KERNEL_OK")
</pallas_src>

<mosaic_0001>
module attributes {stable_mosaic.version = 11 : i64} {
  func.func @block_kernel(%arg0: memref<4x512xf32, #tpu.memory_space<vmem>>, %arg1: memref<4x2xf32, #tpu.memory_space<vmem>>, %arg2: memref<4x2xf32, #tpu.memory_space<vmem>>, %arg3: memref<8x2xf32, #tpu.memory_space<vmem>>, %arg4: memref<8x2xf32, #tpu.memory_space<vmem>>, %arg5: memref<9x8x4xf32, #tpu.memory_space<vmem>>, %arg6: memref<9x8x8xf32, #tpu.memory_space<vmem>>, %arg7: memref<8x4xf32, #tpu.memory_space<vmem>>, %arg8: memref<8x1xf32, #tpu.memory_space<vmem>>, %arg9: memref<256x1024xbf16, #tpu.memory_space<vmem>>, %arg10: memref<16x1024xf32, #tpu.memory_space<vmem>>) attributes {dimension_semantics = [], scalar_prefetch = 0 : i64, scratch_operands = 0 : i64, tpu.core_type = #tpu.core_type<tc>} {
    %c0 = arith.constant 0 : index
    %c0_0 = arith.constant 0 : index
    %0 = vector.load %arg0[%c0, %c0_0] : memref<4x512xf32, #tpu.memory_space<vmem>>, vector<4x512xf32>
    %cst = arith.constant dense<0.000000e+00> : vector<4xf32>
    %1 = vector.multi_reduction <add>, %0, %cst [1] : vector<4x512xf32> to vector<4xf32>
    %2 = vector.shape_cast %1 : vector<4xf32> to vector<4x1xf32>
    %cst_1 = arith.constant 5.120000e+02 : f32
    %3 = vector.broadcast %cst_1 : f32 to vector<4x1xf32>
    %4 = arith.divf %2, %3 : vector<4x1xf32>
    %5 = arith.mulf %0, %0 : vector<4x512xf32>
    %cst_2 = arith.constant dense<0.000000e+00> : vector<4xf32>
    %6 = vector.multi_reduction <add>, %5, %cst_2 [1] : vector<4x512xf32> to vector<4xf32>
    %7 = vector.shape_cast %6 : vector<4xf32> to vector<4x1xf32>
    %cst_3 = arith.constant 5.120000e+02 : f32
    %8 = vector.broadcast %cst_3 : f32 to vector<4x1xf32>
    %9 = arith.divf %7, %8 : vector<4x1xf32>
    %10 = arith.mulf %4, %4 : vector<4x1xf32>
    %11 = arith.subf %9, %10 : vector<4x1xf32>
    %cst_4 = arith.constant 9.99999974E-6 : f32
    %12 = vector.broadcast %cst_4 : f32 to vector<4x1xf32>
    %13 = arith.addf %11, %12 : vector<4x1xf32>
    %14 = math.rsqrt %13 : vector<4x1xf32>
    %15 = vector.broadcast %4 : vector<4x1xf32> to vector<4x512xf32>
    %16 = arith.subf %0, %15 : vector<4x512xf32>
    %17 = vector.broadcast %14 : vector<4x1xf32> to vector<4x512xf32>
    %18 = arith.mulf %16, %17 : vector<4x512xf32>
    %19 = vector.shape_cast %18 : vector<4x512xf32> to vector<4x2x256xf32>
    %c0_5 = arith.constant 0 : index
    %c0_6 = arith.constant 0 : index
    %20 = vector.load %arg1[%c0_5, %c0_6] : memref<4x2xf32, #tpu.memory_space<vmem>>, vector<4x2xf32>
    %21 = vector.shape_cast %20 : vector<4x2xf32> to vector<4x2x1xf32>
    %22 = vector.broadcast %21 : vector<4x2x1xf32> to vector<4x2x256xf32>
    %23 = arith.mulf %22, %19 : vector<4x2x256xf32>
    %c0_7 = arith.constant 0 : index
    %c0_8 = arith.constant 0 : index
    %24 = vector.load %arg2[%c0_7, %c0_8] : memref<4x2xf32, #tpu.memory_space<vmem>>, vector<4x2xf32>
    %25 = vector.shape_cast %24 : vector<4x2xf32> to vector<4x2x1xf32>
    %26 = vector.broadcast %25 : vector<4x2x1xf32> to vector<4x2x256xf32>
    %27 = arith.addf %23, %26 : vector<4x2x256xf32>
    %cst_9 = arith.constant 0.000000e+00 : f32
    %28 = vector.broadcast %cst_9 : f32 to vector<4x2x256xf32>
    %29 = arith.maximumf %27, %28 : vector<4x2x256xf32>
    %30 = vector.shape_cast %29 : vector<4x2x256xf32> to vector<8x256xf32>
    %c0_10 = arith.constant 0 : index
    %c0_11 = arith.constant 0 : index
    %31 = vector.load %arg7[%c0_10, %c0_11] : memref<8x4xf32, #tpu.memory_space<vmem>>, vector<8x4xf32>
    %cst_12 = arith.constant dense<0.000000e+00> : vector<8x512xf32>
    %32 = tpu.matmul %31, %0, %cst_12 {dimension_numbers = #tpu.dot_dimension_numbers<[1], [0], [0], [1], [0, 0, 1, 1], [], []>} : vector<8x4xf32>, vector<4x512xf32>, vector<8x512xf32> -> vector<8x512xf32>
    %33 = vector.shape_cast %32 : vector<8x512xf32> to vector<16x256xf32>
    %34 = tpu.concatenate %30, %33 in 0 : vector<8x256xf32>, vector<16x256xf32> -> vector<24x256xf32>
    %c0_13 = arith.constant 0 : index
    %c0_14 = arith.constant 0 : index
    %35 = vector.load %arg9[%c0_13, %c0_14] : memref<256x1024xbf16, #tpu.memory_space<vmem>>, vector<256x1024xbf16>
    %36 = arith.extf %35 : vector<256x1024xbf16> to vector<256x1024xf32>
    %cst_15 = arith.constant dense<0.000000e+00> : vector<24x1024xf32>
    %37 = tpu.matmul %34, %36, %cst_15 {dimension_numbers = #tpu.dot_dimension_numbers<[1], [0], [0], [1], [0, 0, 1, 1], [], []>} : vector<24x256xf32>, vector<256x1024xf32>, vector<24x1024xf32> -> vector<24x1024xf32>
    %38 = vector.extract_strided_slice %37 {offsets = [0, 0], sizes = [8, 1024], strides = [1, 1]} : vector<24x1024xf32> to vector<8x1024xf32>
    %39 = vector.shape_cast %38 : vector<8x1024xf32> to vector<4x2048xf32>
    %40 = vector.extract_strided_slice %37 {offsets = [8, 0], sizes = [16, 1024], strides = [1, 1]} : vector<24x1024xf32> to vector<16x1024xf32>
    %41 = vector.shape_cast %40 : vector<16x1024xf32> to vector<8x2048xf32>
    %42 = tpu.iota {dimensions = array<i32: 1>} : vector<1x2048xi32>
    %c31_i32 = arith.constant 31 : i32
    %43 = vector.broadcast %c31_i32 : i32 to vector<1x2048xi32>
    %44 = arith.andi %42, %43 : vector<1x2048xi32>
    %c1023_i32 = arith.constant 1023 : i32
    %45 = vector.broadcast %c1023_i32 : i32 to vector<1x2048xi32>
    %46 = arith.andi %42, %45 : vector<1x2048xi32>
    %c1_i32 = arith.constant 1 : i32
    %47 = vector.broadcast %c1_i32 : i32 to vector<1x2048xi32>
    %48 = arith.cmpi sge, %44, %47 : vector<1x2048xi32>
    %c30_i32 = arith.constant 30 : i32
    %49 = vector.broadcast %c30_i32 : i32 to vector<1x2048xi32>
    %50 = arith.cmpi sle, %44, %49 : vector<1x2048xi32>
    %c32_i32 = arith.constant 32 : i32
    %51 = vector.broadcast %c32_i32 : i32 to vector<1x2048xi32>
    %52 = arith.cmpi sge, %46, %51 : vector<1x2048xi32>
    %c992_i32 = arith.constant 992 : i32
    %53 = vector.broadcast %c992_i32 : i32 to vector<1x2048xi32>
    %54 = arith.cmpi slt, %46, %53 : vector<1x2048xi32>
    %55 = vector.extract_strided_slice %39 {offsets = [0, 2015], sizes = [4, 33], strides = [1, 1]} : vector<4x2048xf32> to vector<4x33xf32>
    %56 = vector.extract_strided_slice %39 {offsets = [0, 0], sizes = [4, 2015], strides = [1, 1]} : vector<4x2048xf32> to vector<4x2015xf32>
    %57 = tpu.concatenate %55, %56 in 1 : vector<4x33xf32>, vector<4x2015xf32> -> vector<4x2048xf32>
    %58 = arith.andi %52, %48 : vector<1x2048xi1>
    %cst_16 = arith.constant 0.000000e+00 : f32
    %59 = vector.shape_cast %58 : vector<1x2048xi1> to vector<1x2048xi1>
    %60 = vector.broadcast %59 : vector<1x2048xi1> to vector<4x2048xi1>
    %61 = vector.broadcast %cst_16 : f32 to vector<4x2048xf32>
    %62 = arith.select %60, %57, %61 : vector<4x2048xi1>, vector<4x2048xf32>
    %c0_17 = arith.constant 0 : index
    %c0_18 = arith.constant 0 : index
    %c0_19 = arith.constant 0 : index
    %63 = vector.load %arg5[%c0_17, %c0_18, %c0_19] : memref<9x8x4xf32, #tpu.memory_space<vmem>>, vector<1x8x4xf32>
    %64 = vector.shape_cast %63 : vector<1x8x4xf32> to vector<8x4xf32>
    %cst_20 = arith.constant dense<0.000000e+00> : vector<8x2048xf32>
    %65 = tpu.matmul %64, %62, %cst_20 {dimension_numbers = #tpu.dot_dimension_numbers<[1], [0], [0], [1], [0, 0, 1, 1], [], []>} : vector<8x4xf32>, vector<4x2048xf32>, vector<8x2048xf32> -> vector<8x2048xf32>
    %66 = vector.extract_strided_slice %39 {offsets = [0, 2016], sizes = [4, 32], strides = [1, 1]} : vector<4x2048xf32> to vector<4x32xf32>
    %67 = vector.extract_strided_slice %39 {offsets = [0, 0], sizes = [4, 2016], strides = [1, 1]} : vector<4x2048xf32> to vector<4x2016xf32>
    %68 = tpu.concatenate %66, %67 in 1 : vector<4x32xf32>, vector<4x2016xf32> -> vector<4x2048xf32>
    %cst_21 = arith.constant 0.000000e+00 : f32
    %69 = vector.shape_cast %52 : vector<1x2048xi1> to vector<1x2048xi1>
    %70 = vector.broadcast %69 : vector<1x2048xi1> to vector<4x2048xi1>
    %71 = vector.broadcast %cst_21 : f32 to vector<4x2048xf32>
    %72 = arith.select %70, %68, %71 : vector<4x2048xi1>, vector<4x2048xf32>
    %c1 = arith.constant 1 : index
    %c0_22 = arith.constant 0 : index
    %c0_23 = arith.constant 0 : index
    %73 = vector.load %arg5[%c1, %c0_22, %c0_23] : memref<9x8x4xf32, #tpu.memory_space<vmem>>, vector<1x8x4xf32>
    %74 = vector.shape_cast %73 : vector<1x8x4xf32> to vector<8x4xf32>
    %cst_24 = arith.constant dense<0.000000e+00> : vector<8x2048xf32>
    %75 = tpu.matmul %74, %72, %cst_24 {dimension_numbers = #tpu.dot_dimension_numbers<[1], [0], [0], [1], [0, 0, 1, 1], [], []>} : vector<8x4xf32>, vector<4x2048xf32>, vector<8x2048xf32> -> vector<8x2048xf32>
    %76 = arith.addf %65, %75 : vector<8x2048xf32>
    %77 = vector.extract_strided_slice %39 {offsets = [0, 2017], sizes = [4, 31], strides = [1, 1]} : vector<4x2048xf32> to vector<4x31xf32>
    %78 = vector.extract_strided_slice %39 {offsets = [0, 0], sizes = [4, 2017], strides = [1, 1]} : vector<4x2048xf32> to vector<4x2017xf32>
    %79 = tpu.concatenate %77, %78 in 1 : vector<4x31xf32>, vector<4x2017xf32> -> vector<4x2048xf32>
    %80 = arith.andi %52, %50 : vector<1x2048xi1>
    %cst_25 = arith.constant 0.000000e+00 : f32
    %81 = vector.shape_cast %80 : vector<1x2048xi1> to vector<1x2048xi1>
    %82 = vector.broadcast %81 : vector<1x2048xi1> to vector<4x2048xi1>
    %83 = vector.broadcast %cst_25 : f32 to vector<4x2048xf32>
    %84 = arith.select %82, %79, %83 : vector<4x2048xi1>, vector<4x2048xf32>
    %c2 = arith.constant 2 : index
    %c0_26 = arith.constant 0 : index
    %c0_27 = arith.constant 0 : index
    %85 = vector.load %arg5[%c2, %c0_26, %c0_27] : memref<9x8x4xf32, #tpu.memory_space<vmem>>, vector<1x8x4xf32>
    %86 = vector.shape_cast %85 : vector<1x8x4xf32> to vector<8x4xf32>
    %cst_28 = arith.constant dense<0.000000e+00> : vector<8x2048xf32>
    %87 = tpu.matmul %86, %84, %cst_28 {dimension_numbers = #tpu.dot_dimension_numbers<[1], [0], [0], [1], [0, 0, 1, 1], [], []>} : vector<8x4xf32>, vector<4x2048xf32>, vector<8x2048xf32> -> vector<8x2048xf32>
    %88 = arith.addf %76, %87 : vector<8x2048xf32>
    %89 = vector.extract_strided_slice %39 {offsets = [0, 2047], sizes = [4, 1], strides = [1, 1]} : vector<4x2048xf32> to vector<4x1xf32>
    %90 = vector.extract_strided_slice %39 {offsets = [0, 0], sizes = [4, 2047], strides = [1, 1]} : vector<4x2048xf32> to vector<4x2047xf32>
    %91 = tpu.concatenate %89, %90 in 1 : vector<4x1xf32>, vector<4x2047xf32> -> vector<4x2048xf32>
    %cst_29 = arith.constant 0.000000e+00 : f32
    %92 = vector.shape_cast %48 : vector<1x2048xi1> to vector<1x2048xi1>
    %93 = vector.broadcast %92 : vector<1x2048xi1> to vector<4x2048xi1>
    %94 = vector.broadcast %cst_29 : f32 to vector<4x2048xf32>
    %95 = arith.select %93, %91, %94 : vector<4x2048xi1>, vector<4x2048xf32>
    %c3 = arith.constant 3 : index
    %c0_30 = arith.constant 0 : index
    %c0_31 = arith.constant 0 : index
    %96 = vector.load %arg5[%c3, %c0_30, %c0_31] : memref<9x8x4xf32, #tpu.memory_space<vmem>>, vector<1x8x4xf32>
    %97 = vector.shape_cast %96 : vector<1x8x4xf32> to vector<8x4xf32>
    %cst_32 = arith.constant dense<0.000000e+00> : vector<8x2048xf32>
    %98 = tpu.matmul %97, %95, %cst_32 {dimension_numbers = #tpu.dot_dimension_numbers<[1], [0], [0], [1], [0, 0, 1, 1], [], []>} : vector<8x4xf32>, vector<4x2048xf32>, vector<8x2048xf32> -> vector<8x2048xf32>
    %99 = arith.addf %88, %98 : vector<8x2048xf32>
    %c4 = arith.constant 4 : index
    %c0_33 = arith.constant 0 : index
    %c0_34 = arith.constant 0 : index
    %100 = vector.load %arg5[%c4, %c0_33, %c0_34] : memref<9x8x4xf32, #tpu.memory_space<vmem>>, vector<1x8x4xf32>
    %101 = vector.shape_cast %100 : vector<1x8x4xf32> to vector<8x4xf32>
    %cst_35 = arith.constant dense<0.000000e+00> : vector<8x2048xf32>
    %102 = tpu.matmul %101, %39, %cst_35 {dimension_numbers = #tpu.dot_dimension_numbers<[1], [0], [0], [1], [0, 0, 1, 1], [], []>} : vector<8x4xf32>, vector<4x2048xf32>, vector<8x2048xf32> -> vector<8x2048xf32>
    %103 = arith.addf %99, %102 : vector<8x2048xf32>
    %104 = vector.extract_strided_slice %39 {offsets = [0, 1], sizes = [4, 2047], strides = [1, 1]} : vector<4x2048xf32> to vector<4x2047xf32>
    %105 = vector.extract_strided_slice %39 {offsets = [0, 0], sizes = [4, 1], strides = [1, 1]} : vector<4x2048xf32> to vector<4x1xf32>
    %106 = tpu.concatenate %104, %105 in 1 : vector<4x2047xf32>, vector<4x1xf32> -> vector<4x2048xf32>
    %cst_36 = arith.constant 0.000000e+00 : f32
    %107 = vector.shape_cast %50 : vector<1x2048xi1> to vector<1x2048xi1>
    %108 = vector.broadcast %107 : vector<1x2048xi1> to vector<4x2048xi1>
    %109 = vector.broadcast %cst_36 : f32 to vector<4x2048xf32>
    %110 = arith.select %108, %106, %109 : vector<4x2048xi1>, vector<4x2048xf32>
    %c5 = arith.constant 5 : index
    %c0_37 = arith.constant 0 : index
    %c0_38 = arith.constant 0 : index
    %111 = vector.load %arg5[%c5, %c0_37, %c0_38] : memref<9x8x4xf32, #tpu.memory_space<vmem>>, vector<1x8x4xf32>
    %112 = vector.shape_cast %111 : vector<1x8x4xf32> to vector<8x4xf32>
    %cst_39 = arith.constant dense<0.000000e+00> : vector<8x2048xf32>
    %113 = tpu.matmul %112, %110, %cst_39 {dimension_numbers = #tpu.dot_dimension_numbers<[1], [0], [0], [1], [0, 0, 1, 1], [], []>} : vector<8x4xf32>, vector<4x2048xf32>, vector<8x2048xf32> -> vector<8x2048xf32>
    %114 = arith.addf %103, %113 : vector<8x2048xf32>
    %115 = vector.extract_strided_slice %39 {offsets = [0, 31], sizes = [4, 2017], strides = [1, 1]} : vector<4x2048xf32> to vector<4x2017xf32>
    %116 = vector.extract_strided_slice %39 {offsets = [0, 0], sizes = [4, 31], strides = [1, 1]} : vector<4x2048xf32> to vector<4x31xf32>
    %117 = tpu.concatenate %115, %116 in 1 : vector<4x2017xf32>, vector<4x31xf32> -> vector<4x2048xf32>
    %118 = arith.andi %54, %48 : vector<1x2048xi1>
    %cst_40 = arith.constant 0.000000e+00 : f32
    %119 = vector.shape_cast %118 : vector<1x2048xi1> to vector<1x2048xi1>
    %120 = vector.broadcast %119 : vector<1x2048xi1> to vector<4x2048xi1>
    %121 = vector.broadcast %cst_40 : f32 to vector<4x2048xf32>
    %122 = arith.select %120, %117, %121 : vector<4x2048xi1>, vector<4x2048xf32>
    %c6 = arith.constant 6 : index
    %c0_41 = arith.constant 0 : index
    %c0_42 = arith.constant 0 : index
    %123 = vector.load %arg5[%c6, %c0_41, %c0_42] : memref<9x8x4xf32, #tpu.memory_space<vmem>>, vector<1x8x4xf32>
    %124 = vector.shape_cast %123 : vector<1x8x4xf32> to vector<8x4xf32>
    %cst_43 = arith.constant dense<0.000000e+00> : vector<8x2048xf32>
    %125 = tpu.matmul %124, %122, %cst_43 {dimension_numbers = #tpu.dot_dimension_numbers<[1], [0], [0], [1], [0, 0, 1, 1], [], []>} : vector<8x4xf32>, vector<4x2048xf32>, vector<8x2048xf32> -> vector<8x2048xf32>
    %126 = arith.addf %114, %125 : vector<8x2048xf32>
    %127 = vector.extract_strided_slice %39 {offsets = [0, 32], sizes = [4, 2016], strides = [1, 1]} : vector<4x2048xf32> to vector<4x2016xf32>
    %128 = vector.extract_strided_slice %39 {offsets = [0, 0], sizes = [4, 32], strides = [1, 1]} : vector<4x2048xf32> to vector<4x32xf32>
    %129 = tpu.concatenate %127, %128 in 1 : vector<4x2016xf32>, vector<4x32xf32> -> vector<4x2048xf32>
    %cst_44 = arith.constant 0.000000e+00 : f32
    %130 = vector.shape_cast %54 : vector<1x2048xi1> to vector<1x2048xi1>
    %131 = vector.broadcast %130 : vector<1x2048xi1> to vector<4x2048xi1>
    %132 = vector.broadcast %cst_44 : f32 to vector<4x2048xf32>
    %133 = arith.select %131, %129, %132 : vector<4x2048xi1>, vector<4x2048xf32>
    %c7 = arith.constant 7 : index
    %c0_45 = arith.constant 0 : index
    %c0_46 = arith.constant 0 : index
    %134 = vector.load %arg5[%c7, %c0_45, %c0_46] : memref<9x8x4xf32, #tpu.memory_space<vmem>>, vector<1x8x4xf32>
    %135 = vector.shape_cast %134 : vector<1x8x4xf32> to vector<8x4xf32>
    %cst_47 = arith.constant dense<0.000000e+00> : vector<8x2048xf32>
    %136 = tpu.matmul %135, %133, %cst_47 {dimension_numbers = #tpu.dot_dimension_numbers<[1], [0], [0], [1], [0, 0, 1, 1], [], []>} : vector<8x4xf32>, vector<4x2048xf32>, vector<8x2048xf32> -> vector<8x2048xf32>
    %137 = arith.addf %126, %136 : vector<8x2048xf32>
    %138 = vector.extract_strided_slice %39 {offsets = [0, 33], sizes = [4, 2015], strides = [1, 1]} : vector<4x2048xf32> to vector<4x2015xf32>
    %139 = vector.extract_strided_slice %39 {offsets = [0, 0], sizes = [4, 33], strides = [1, 1]} : vector<4x2048xf32> to vector<4x33xf32>
    %140 = tpu.concatenate %138, %139 in 1 : vector<4x2015xf32>, vector<4x33xf32> -> vector<4x2048xf32>
    %141 = arith.andi %54, %50 : vector<1x2048xi1>
    %cst_48 = arith.constant 0.000000e+00 : f32
    %142 = vector.shape_cast %141 : vector<1x2048xi1> to vector<1x2048xi1>
    %143 = vector.broadcast %142 : vector<1x2048xi1> to vector<4x2048xi1>
    %144 = vector.broadcast %cst_48 : f32 to vector<4x2048xf32>
    %145 = arith.select %143, %140, %144 : vector<4x2048xi1>, vector<4x2048xf32>
    %c8 = arith.constant 8 : index
    %c0_49 = arith.constant 0 : index
    %c0_50 = arith.constant 0 : index
    %146 = vector.load %arg5[%c8, %c0_49, %c0_50] : memref<9x8x4xf32, #tpu.memory_space<vmem>>, vector<1x8x4xf32>
    %147 = vector.shape_cast %146 : vector<1x8x4xf32> to vector<8x4xf32>
    %cst_51 = arith.constant dense<0.000000e+00> : vector<8x2048xf32>
    %148 = tpu.matmul %147, %145, %cst_51 {dimension_numbers = #tpu.dot_dimension_numbers<[1], [0], [0], [1], [0, 0, 1, 1], [], []>} : vector<8x4xf32>, vector<4x2048xf32>, vector<8x2048xf32> -> vector<8x2048xf32>
    %149 = arith.addf %137, %148 : vector<8x2048xf32>
    %cst_52 = arith.constant dense<0.000000e+00> : vector<8xf32>
    %150 = vector.multi_reduction <add>, %149, %cst_52 [1] : vector<8x2048xf32> to vector<8xf32>
    %151 = vector.shape_cast %150 : vector<8xf32> to vector<8x1xf32>
    %cst_53 = arith.constant 2.048000e+03 : f32
    %152 = vector.broadcast %cst_53 : f32 to vector<8x1xf32>
    %153 = arith.divf %151, %152 : vector<8x1xf32>
    %154 = arith.mulf %149, %149 : vector<8x2048xf32>
    %cst_54 = arith.constant dense<0.000000e+00> : vector<8xf32>
    %155 = vector.multi_reduction <add>, %154, %cst_54 [1] : vector<8x2048xf32> to vector<8xf32>
    %156 = vector.shape_cast %155 : vector<8xf32> to vector<8x1xf32>
    %cst_55 = arith.constant 2.048000e+03 : f32
    %157 = vector.broadcast %cst_55 : f32 to vector<8x1xf32>
    %158 = arith.divf %156, %157 : vector<8x1xf32>
    %159 = arith.mulf %153, %153 : vector<8x1xf32>
    %160 = arith.subf %158, %159 : vector<8x1xf32>
    %cst_56 = arith.constant 9.99999974E-6 : f32
    %161 = vector.broadcast %cst_56 : f32 to vector<8x1xf32>
    %162 = arith.addf %160, %161 : vector<8x1xf32>
    %163 = math.rsqrt %162 : vector<8x1xf32>
    %164 = vector.broadcast %153 : vector<8x1xf32> to vector<8x2048xf32>
    %165 = arith.subf %149, %164 : vector<8x2048xf32>
    %166 = vector.broadcast %163 : vector<8x1xf32> to vector<8x2048xf32>
    %167 = arith.mulf %165, %166 : vector<8x2048xf32>
    %c10_i32 = arith.constant 10 : i32
    %168 = vector.broadcast %c10_i32 : i32 to vector<1x2048xi32>
    %169 = arith.shrsi %42, %168 : vector<1x2048xi32>
    %c0_57 = arith.constant 0 : index
    %c0_58 = arith.constant 0 : index
    %170 = vector.load %arg3[%c0_57, %c0_58] : memref<8x2xf32, #tpu.memory_space<vmem>>, vector<8x2xf32>
    %c0_59 = arith.constant 0 : index
    %c0_60 = arith.constant 0 : index
    %171 = vector.load %arg4[%c0_59, %c0_60] : memref<8x2xf32, #tpu.memory_space<vmem>>, vector<8x2xf32>
    %c0_i32 = arith.constant 0 : i32
    %172 = vector.broadcast %c0_i32 : i32 to vector<1x2048xi32>
    %173 = arith.cmpi eq, %169, %172 : vector<1x2048xi32>
    %174 = vector.extract_strided_slice %170 {offsets = [0, 0], sizes = [8, 1], strides = [1, 1]} : vector<8x2xf32> to vector<8x1xf32>
    %cst_61 = arith.constant 0.000000e+00 : f32
    %175 = vector.shape_cast %173 : vector<1x2048xi1> to vector<1x2048xi1>
    %176 = vector.broadcast %175 : vector<1x2048xi1> to vector<8x2048xi1>
    %177 = vector.shape_cast %174 : vector<8x1xf32> to vector<8x1xf32>
    %178 = vector.broadcast %177 : vector<8x1xf32> to vector<8x2048xf32>
    %179 = vector.broadcast %cst_61 : f32 to vector<8x2048xf32>
    %180 = arith.select %176, %178, %179 : vector<8x2048xi1>, vector<8x2048xf32>
    %c0_i32_62 = arith.constant 0 : i32
    %181 = vector.broadcast %c0_i32_62 : i32 to vector<1x2048xi32>
    %182 = arith.cmpi eq, %169, %181 : vector<1x2048xi32>
    %183 = vector.extract_strided_slice %171 {offsets = [0, 0], sizes = [8, 1], strides = [1, 1]} : vector<8x2xf32> to vector<8x1xf32>
    %cst_63 = arith.constant 0.000000e+00 : f32
    %184 = vector.shape_cast %182 : vector<1x2048xi1> to vector<1x2048xi1>
    %185 = vector.broadcast %184 : vector<1x2048xi1> to vector<8x2048xi1>
    %186 = vector.shape_cast %183 : vector<8x1xf32> to vector<8x1xf32>
    %187 = vector.broadcast %186 : vector<8x1xf32> to vector<8x2048xf32>
    %188 = vector.broadcast %cst_63 : f32 to vector<8x2048xf32>
    %189 = arith.select %185, %187, %188 : vector<8x2048xi1>, vector<8x2048xf32>
    %c1_i32_64 = arith.constant 1 : i32
    %190 = vector.broadcast %c1_i32_64 : i32 to vector<1x2048xi32>
    %191 = arith.cmpi eq, %169, %190 : vector<1x2048xi32>
    %192 = vector.extract_strided_slice %170 {offsets = [0, 1], sizes = [8, 1], strides = [1, 1]} : vector<8x2xf32> to vector<8x1xf32>
    %cst_65 = arith.constant 0.000000e+00 : f32
    %193 = vector.shape_cast %191 : vector<1x2048xi1> to vector<1x2048xi1>
    %194 = vector.broadcast %193 : vector<1x2048xi1> to vector<8x2048xi1>
    %195 = vector.shape_cast %192 : vector<8x1xf32> to vector<8x1xf32>
    %196 = vector.broadcast %195 : vector<8x1xf32> to vector<8x2048xf32>
    %197 = vector.broadcast %cst_65 : f32 to vector<8x2048xf32>
    %198 = arith.select %194, %196, %197 : vector<8x2048xi1>, vector<8x2048xf32>
    %199 = arith.addf %180, %198 : vector<8x2048xf32>
    %c1_i32_66 = arith.constant 1 : i32
    %200 = vector.broadcast %c1_i32_66 : i32 to vector<1x2048xi32>
    %201 = arith.cmpi eq, %169, %200 : vector<1x2048xi32>
    %202 = vector.extract_strided_slice %171 {offsets = [0, 1], sizes = [8, 1], strides = [1, 1]} : vector<8x2xf32> to vector<8x1xf32>
    %cst_67 = arith.constant 0.000000e+00 : f32
    %203 = vector.shape_cast %201 : vector<1x2048xi1> to vector<1x2048xi1>
    %204 = vector.broadcast %203 : vector<1x2048xi1> to vector<8x2048xi1>
    %205 = vector.shape_cast %202 : vector<8x1xf32> to vector<8x1xf32>
    %206 = vector.broadcast %205 : vector<8x1xf32> to vector<8x2048xf32>
    %207 = vector.broadcast %cst_67 : f32 to vector<8x2048xf32>
    %208 = arith.select %204, %206, %207 : vector<8x2048xi1>, vector<8x2048xf32>
    %209 = arith.addf %189, %208 : vector<8x2048xf32>
    %210 = arith.mulf %199, %167 : vector<8x2048xf32>
    %211 = arith.addf %210, %209 : vector<8x2048xf32>
    %cst_68 = arith.constant 0.000000e+00 : f32
    %212 = vector.broadcast %cst_68 : f32 to vector<8x2048xf32>
    %213 = arith.maximumf %211, %212 : vector<8x2048xf32>
    %214 = vector.extract_strided_slice %213 {offsets = [0, 2015], sizes = [8, 33], strides = [1, 1]} : vector<8x2048xf32> to vector<8x33xf32>
    %215 = vector.extract_strided_slice %213 {offsets = [0, 0], sizes = [8, 2015], strides = [1, 1]} : vector<8x2048xf32> to vector<8x2015xf32>
    %216 = tpu.concatenate %214, %215 in 1 : vector<8x33xf32>, vector<8x2015xf32> -> vector<8x2048xf32>
    %217 = arith.andi %52, %48 : vector<1x2048xi1>
    %cst_69 = arith.constant 0.000000e+00 : f32
    %218 = vector.shape_cast %217 : vector<1x2048xi1> to vector<1x2048xi1>
    %219 = vector.broadcast %218 : vector<1x2048xi1> to vector<8x2048xi1>
    %220 = vector.broadcast %cst_69 : f32 to vector<8x2048xf32>
    %221 = arith.select %219, %216, %220 : vector<8x2048xi1>, vector<8x2048xf32>
    %c0_70 = arith.constant 0 : index
    %c0_71 = arith.constant 0 : index
    %c0_72 = arith.constant 0 : index
    %222 = vector.load %arg6[%c0_70, %c0_71, %c0_72] : memref<9x8x8xf32, #tpu.memory_space<vmem>>, vector<1x8x8xf32>
    %223 = vector.shape_cast %222 : vector<1x8x8xf32> to vector<8x8xf32>
    %cst_73 = arith.constant dense<0.000000e+00> : vector<8x2048xf32>
    %224 = tpu.matmul %223, %221, %cst_73 {dimension_numbers = #tpu.dot_dimension_numbers<[1], [0], [0], [1], [0, 0, 1, 1], [], []>} : vector<8x8xf32>, vector<8x2048xf32>, vector<8x2048xf32> -> vector<8x2048xf32>
    %225 = vector.extract_strided_slice %213 {offsets = [0, 2016], sizes = [8, 32], strides = [1, 1]} : vector<8x2048xf32> to vector<8x32xf32>
    %226 = vector.extract_strided_slice %213 {offsets = [0, 0], sizes = [8, 2016], strides = [1, 1]} : vector<8x2048xf32> to vector<8x2016xf32>
    %227 = tpu.concatenate %225, %226 in 1 : vector<8x32xf32>, vector<8x2016xf32> -> vector<8x2048xf32>
    %cst_74 = arith.constant 0.000000e+00 : f32
    %228 = vector.shape_cast %52 : vector<1x2048xi1> to vector<1x2048xi1>
    %229 = vector.broadcast %228 : vector<1x2048xi1> to vector<8x2048xi1>
    %230 = vector.broadcast %cst_74 : f32 to vector<8x2048xf32>
    %231 = arith.select %229, %227, %230 : vector<8x2048xi1>, vector<8x2048xf32>
    %c1_75 = arith.constant 1 : index
    %c0_76 = arith.constant 0 : index
    %c0_77 = arith.constant 0 : index
    %232 = vector.load %arg6[%c1_75, %c0_76, %c0_77] : memref<9x8x8xf32, #tpu.memory_space<vmem>>, vector<1x8x8xf32>
    %233 = vector.shape_cast %232 : vector<1x8x8xf32> to vector<8x8xf32>
    %cst_78 = arith.constant dense<0.000000e+00> : vector<8x2048xf32>
    %234 = tpu.matmul %233, %231, %cst_78 {dimension_numbers = #tpu.dot_dimension_numbers<[1], [0], [0], [1], [0, 0, 1, 1], [], []>} : vector<8x8xf32>, vector<8x2048xf32>, vector<8x2048xf32> -> vector<8x2048xf32>
    %235 = arith.addf %224, %234 : vector<8x2048xf32>
    %236 = vector.extract_strided_slice %213 {offsets = [0, 2017], sizes = [8, 31], strides = [1, 1]} : vector<8x2048xf32> to vector<8x31xf32>
    %237 = vector.extract_strided_slice %213 {offsets = [0, 0], sizes = [8, 2017], strides = [1, 1]} : vector<8x2048xf32> to vector<8x2017xf32>
    %238 = tpu.concatenate %236, %237 in 1 : vector<8x31xf32>, vector<8x2017xf32> -> vector<8x2048xf32>
    %239 = arith.andi %52, %50 : vector<1x2048xi1>
    %cst_79 = arith.constant 0.000000e+00 : f32
    %240 = vector.shape_cast %239 : vector<1x2048xi1> to vector<1x2048xi1>
    %241 = vector.broadcast %240 : vector<1x2048xi1> to vector<8x2048xi1>
    %242 = vector.broadcast %cst_79 : f32 to vector<8x2048xf32>
    %243 = arith.select %241, %238, %242 : vector<8x2048xi1>, vector<8x2048xf32>
    %c2_80 = arith.constant 2 : index
    %c0_81 = arith.constant 0 : index
    %c0_82 = arith.constant 0 : index
    %244 = vector.load %arg6[%c2_80, %c0_81, %c0_82] : memref<9x8x8xf32, #tpu.memory_space<vmem>>, vector<1x8x8xf32>
    %245 = vector.shape_cast %244 : vector<1x8x8xf32> to vector<8x8xf32>
    %cst_83 = arith.constant dense<0.000000e+00> : vector<8x2048xf32>
    %246 = tpu.matmul %245, %243, %cst_83 {dimension_numbers = #tpu.dot_dimension_numbers<[1], [0], [0], [1], [0, 0, 1, 1], [], []>} : vector<8x8xf32>, vector<8x2048xf32>, vector<8x2048xf32> -> vector<8x2048xf32>
    %247 = arith.addf %235, %246 : vector<8x2048xf32>
    %248 = vector.extract_strided_slice %213 {offsets = [0, 2047], sizes = [8, 1], strides = [1, 1]} : vector<8x2048xf32> to vector<8x1xf32>
    %249 = vector.extract_strided_slice %213 {offsets = [0, 0], sizes = [8, 2047], strides = [1, 1]} : vector<8x2048xf32> to vector<8x2047xf32>
    %250 = tpu.concatenate %248, %249 in 1 : vector<8x1xf32>, vector<8x2047xf32> -> vector<8x2048xf32>
    %cst_84 = arith.constant 0.000000e+00 : f32
    %251 = vector.shape_cast %48 : vector<1x2048xi1> to vector<1x2048xi1>
    %252 = vector.broadcast %251 : vector<1x2048xi1> to vector<8x2048xi1>
    %253 = vector.broadcast %cst_84 : f32 to vector<8x2048xf32>
    %254 = arith.select %252, %250, %253 : vector<8x2048xi1>, vector<8x2048xf32>
    %c3_85 = arith.constant 3 : index
    %c0_86 = arith.constant 0 : index
    %c0_87 = arith.constant 0 : index
    %255 = vector.load %arg6[%c3_85, %c0_86, %c0_87] : memref<9x8x8xf32, #tpu.memory_space<vmem>>, vector<1x8x8xf32>
    %256 = vector.shape_cast %255 : vector<1x8x8xf32> to vector<8x8xf32>
    %cst_88 = arith.constant dense<0.000000e+00> : vector<8x2048xf32>
    %257 = tpu.matmul %256, %254, %cst_88 {dimension_numbers = #tpu.dot_dimension_numbers<[1], [0], [0], [1], [0, 0, 1, 1], [], []>} : vector<8x8xf32>, vector<8x2048xf32>, vector<8x2048xf32> -> vector<8x2048xf32>
    %258 = arith.addf %247, %257 : vector<8x2048xf32>
    %c4_89 = arith.constant 4 : index
    %c0_90 = arith.constant 0 : index
    %c0_91 = arith.constant 0 : index
    %259 = vector.load %arg6[%c4_89, %c0_90, %c0_91] : memref<9x8x8xf32, #tpu.memory_space<vmem>>, vector<1x8x8xf32>
    %260 = vector.shape_cast %259 : vector<1x8x8xf32> to vector<8x8xf32>
    %cst_92 = arith.constant dense<0.000000e+00> : vector<8x2048xf32>
    %261 = tpu.matmul %260, %213, %cst_92 {dimension_numbers = #tpu.dot_dimension_numbers<[1], [0], [0], [1], [0, 0, 1, 1], [], []>} : vector<8x8xf32>, vector<8x2048xf32>, vector<8x2048xf32> -> vector<8x2048xf32>
    %262 = arith.addf %258, %261 : vector<8x2048xf32>
    %263 = vector.extract_strided_slice %213 {offsets = [0, 1], sizes = [8, 2047], strides = [1, 1]} : vector<8x2048xf32> to vector<8x2047xf32>
    %264 = vector.extract_strided_slice %213 {offsets = [0, 0], sizes = [8, 1], strides = [1, 1]} : vector<8x2048xf32> to vector<8x1xf32>
    %265 = tpu.concatenate %263, %264 in 1 : vector<8x2047xf32>, vector<8x1xf32> -> vector<8x2048xf32>
    %cst_93 = arith.constant 0.000000e+00 : f32
    %266 = vector.shape_cast %50 : vector<1x2048xi1> to vector<1x2048xi1>
    %267 = vector.broadcast %266 : vector<1x2048xi1> to vector<8x2048xi1>
    %268 = vector.broadcast %cst_93 : f32 to vector<8x2048xf32>
    %269 = arith.select %267, %265, %268 : vector<8x2048xi1>, vector<8x2048xf32>
    %c5_94 = arith.constant 5 : index
    %c0_95 = arith.constant 0 : index
    %c0_96 = arith.constant 0 : index
    %270 = vector.load %arg6[%c5_94, %c0_95, %c0_96] : memref<9x8x8xf32, #tpu.memory_space<vmem>>, vector<1x8x8xf32>
    %271 = vector.shape_cast %270 : vector<1x8x8xf32> to vector<8x8xf32>
    %cst_97 = arith.constant dense<0.000000e+00> : vector<8x2048xf32>
    %272 = tpu.matmul %271, %269, %cst_97 {dimension_numbers = #tpu.dot_dimension_numbers<[1], [0], [0], [1], [0, 0, 1, 1], [], []>} : vector<8x8xf32>, vector<8x2048xf32>, vector<8x2048xf32> -> vector<8x2048xf32>
    %273 = arith.addf %262, %272 : vector<8x2048xf32>
    %274 = vector.extract_strided_slice %213 {offsets = [0, 31], sizes = [8, 2017], strides = [1, 1]} : vector<8x2048xf32> to vector<8x2017xf32>
    %275 = vector.extract_strided_slice %213 {offsets = [0, 0], sizes = [8, 31], strides = [1, 1]} : vector<8x2048xf32> to vector<8x31xf32>
    %276 = tpu.concatenate %274, %275 in 1 : vector<8x2017xf32>, vector<8x31xf32> -> vector<8x2048xf32>
    %277 = arith.andi %54, %48 : vector<1x2048xi1>
    %cst_98 = arith.constant 0.000000e+00 : f32
    %278 = vector.shape_cast %277 : vector<1x2048xi1> to vector<1x2048xi1>
    %279 = vector.broadcast %278 : vector<1x2048xi1> to vector<8x2048xi1>
    %280 = vector.broadcast %cst_98 : f32 to vector<8x2048xf32>
    %281 = arith.select %279, %276, %280 : vector<8x2048xi1>, vector<8x2048xf32>
    %c6_99 = arith.constant 6 : index
    %c0_100 = arith.constant 0 : index
    %c0_101 = arith.constant 0 : index
    %282 = vector.load %arg6[%c6_99, %c0_100, %c0_101] : memref<9x8x8xf32, #tpu.memory_space<vmem>>, vector<1x8x8xf32>
    %283 = vector.shape_cast %282 : vector<1x8x8xf32> to vector<8x8xf32>
    %cst_102 = arith.constant dense<0.000000e+00> : vector<8x2048xf32>
    %284 = tpu.matmul %283, %281, %cst_102 {dimension_numbers = #tpu.dot_dimension_numbers<[1], [0], [0], [1], [0, 0, 1, 1], [], []>} : vector<8x8xf32>, vector<8x2048xf32>, vector<8x2048xf32> -> vector<8x2048xf32>
    %285 = arith.addf %273, %284 : vector<8x2048xf32>
    %286 = vector.extract_strided_slice %213 {offsets = [0, 32], sizes = [8, 2016], strides = [1, 1]} : vector<8x2048xf32> to vector<8x2016xf32>
    %287 = vector.extract_strided_slice %213 {offsets = [0, 0], sizes = [8, 32], strides = [1, 1]} : vector<8x2048xf32> to vector<8x32xf32>
    %288 = tpu.concatenate %286, %287 in 1 : vector<8x2016xf32>, vector<8x32xf32> -> vector<8x2048xf32>
    %cst_103 = arith.constant 0.000000e+00 : f32
    %289 = vector.shape_cast %54 : vector<1x2048xi1> to vector<1x2048xi1>
    %290 = vector.broadcast %289 : vector<1x2048xi1> to vector<8x2048xi1>
    %291 = vector.broadcast %cst_103 : f32 to vector<8x2048xf32>
    %292 = arith.select %290, %288, %291 : vector<8x2048xi1>, vector<8x2048xf32>
    %c7_104 = arith.constant 7 : index
    %c0_105 = arith.constant 0 : index
    %c0_106 = arith.constant 0 : index
    %293 = vector.load %arg6[%c7_104, %c0_105, %c0_106] : memref<9x8x8xf32, #tpu.memory_space<vmem>>, vector<1x8x8xf32>
    %294 = vector.shape_cast %293 : vector<1x8x8xf32> to vector<8x8xf32>
    %cst_107 = arith.constant dense<0.000000e+00> : vector<8x2048xf32>
    %295 = tpu.matmul %294, %292, %cst_107 {dimension_numbers = #tpu.dot_dimension_numbers<[1], [0], [0], [1], [0, 0, 1, 1], [], []>} : vector<8x8xf32>, vector<8x2048xf32>, vector<8x2048xf32> -> vector<8x2048xf32>
    %296 = arith.addf %285, %295 : vector<8x2048xf32>
    %297 = vector.extract_strided_slice %213 {offsets = [0, 33], sizes = [8, 2015], strides = [1, 1]} : vector<8x2048xf32> to vector<8x2015xf32>
    %298 = vector.extract_strided_slice %213 {offsets = [0, 0], sizes = [8, 33], strides = [1, 1]} : vector<8x2048xf32> to vector<8x33xf32>
    %299 = tpu.concatenate %297, %298 in 1 : vector<8x2015xf32>, vector<8x33xf32> -> vector<8x2048xf32>
    %300 = arith.andi %54, %50 : vector<1x2048xi1>
    %cst_108 = arith.constant 0.000000e+00 : f32
    %301 = vector.shape_cast %300 : vector<1x2048xi1> to vector<1x2048xi1>
    %302 = vector.broadcast %301 : vector<1x2048xi1> to vector<8x2048xi1>
    %303 = vector.broadcast %cst_108 : f32 to vector<8x2048xf32>
    %304 = arith.select %302, %299, %303 : vector<8x2048xi1>, vector<8x2048xf32>
    %c8_109 = arith.constant 8 : index
    %c0_110 = arith.constant 0 : index
    %c0_111 = arith.constant 0 : index
    %305 = vector.load %arg6[%c8_109, %c0_110, %c0_111] : memref<9x8x8xf32, #tpu.memory_space<vmem>>, vector<1x8x8xf32>
    %306 = vector.shape_cast %305 : vector<1x8x8xf32> to vector<8x8xf32>
    %cst_112 = arith.constant dense<0.000000e+00> : vector<8x2048xf32>
    %307 = tpu.matmul %306, %304, %cst_112 {dimension_numbers = #tpu.dot_dimension_numbers<[1], [0], [0], [1], [0, 0, 1, 1], [], []>} : vector<8x8xf32>, vector<8x2048xf32>, vector<8x2048xf32> -> vector<8x2048xf32>
    %308 = arith.addf %296, %307 : vector<8x2048xf32>
    %309 = arith.addf %308, %41 : vector<8x2048xf32>
    %c0_113 = arith.constant 0 : index
    %c0_114 = arith.constant 0 : index
    %310 = vector.load %arg8[%c0_113, %c0_114] : memref<8x1xf32, #tpu.memory_space<vmem>>, vector<8x1xf32>
    %311 = vector.broadcast %310 : vector<8x1xf32> to vector<8x2048xf32>
    %312 = arith.addf %309, %311 : vector<8x2048xf32>
    %313 = vector.extract_strided_slice %312 {offsets = [0, 0], sizes = [8, 1024], strides = [1, 1]} : vector<8x2048xf32> to vector<8x1024xf32>
    %c0_115 = arith.constant 0 : index
    %c0_116 = arith.constant 0 : index
    %314 = vector.load %arg10[%c0_115, %c0_116] : memref<16x1024xf32, #tpu.memory_space<vmem>>, vector<8x1024xf32>
    tpu.vector_store %arg10[%c0_115, %c0_116], %313 {strides = array<i32>} : memref<16x1024xf32, #tpu.memory_space<vmem>>, vector<8x1024xf32>,
    %315 = vector.extract_strided_slice %312 {offsets = [0, 1024], sizes = [8, 1024], strides = [1, 1]} : vector<8x2048xf32> to vector<8x1024xf32>
    %c8_117 = arith.constant 8 : index
    %c0_118 = arith.constant 0 : index
    %316 = vector.load %arg10[%c8_117, %c0_118] : memref<16x1024xf32, #tpu.memory_space<vmem>>, vector<8x1024xf32>
    tpu.vector_store %arg10[%c8_117, %c0_118], %315 {strides = array<i32>} : memref<16x1024xf32, #tpu.memory_space<vmem>>, vector<8x1024xf32>,
    return
  }
}

</mosaic_0001>

<bundles_post_ra>
// kernel: block_forward.1
= control target key start
LH: loop header
LB: loop body
LE: loop exit
PB: predicated region body
PF: predicated region fallthrough
CT: control target
= control target key end

     0   :  { %15 = vsyncpa [#allocation3], 0  ;;  %s16380_s13 = smov [#allocation2]   ;;  %s20107_s0 = inlined_call_operand.vmem [shape: f32[4,512], index: 0, kind: input, shape index: {}]   ;;  %s20108_s1 = inlined_call_operand.vmem [shape: f32[4,2], index: 1, kind: input, shape index: {}]   ;;  %s20109_s2 = inlined_call_operand.vmem [shape: f32[4,2], index: 2, kind: input, shape index: {}]   ;;  %s20110_s3 = inlined_call_operand.vmem [shape: f32[8,2], index: 3, kind: input, shape index: {}]   ;;  %s20111_s4 = inlined_call_operand.vmem [shape: f32[8,2], index: 4, kind: input, shape index: {}]   ;;  %s20112_s5 = inlined_call_operand.vmem [shape: f32[9,8,4], index: 5, kind: input, shape index: {}]   ;;  %s20113_s6 = inlined_call_operand.vmem [shape: f32[9,8,8], index: 6, kind: input, shape index: {}]   ;;  %s20114_s7 = inlined_call_operand.vmem [shape: f32[8,4], index: 7, kind: input, shape index: {}]   ;;  %s20115_s8 = inlined_call_operand.vmem [shape: f32[8,1], index: 8, kind: input, shape index: {}]   ;;  %s20116_s9 = inlined_call_operand.hbm [shape: bf16[256,1024], index: 9, kind: input, shape index: {}]   ;;  %s20117_s10 = inlined_call_operand.vmem [shape: f32[16,1024], index: 10, kind: output, shape index: {}]  }
   0x1   :  { %s39_s14 = sshll.u32 %s16380_s13, 4  ;;  %s16356_s17 = scalar_lea.hbm %s20116_s9, 16384  ;;  %s40_s14 = int_to_ptr.vmem [resolvable:$true] %s39_s14 }
   0x2   :  { %p16357_p0 = scmp.ne.s32.totalorder %s20116_s9, %s16356_s17  ;;  %p16360_p1 = scmp.lt.u32.totalorder %s16356_s17, %s20116_s9 }
   0x4   :  { %p16362_p2 = pnand %p16360_p1, %p16357_p0 }
   0x6   :  { %16365 = shalt.err (!%p16362_p2)
}
   0x7   :  { %s16366_s22 = scalar_lea.vmem %s40_s14, 16384  ;;  %p16371_p4 = scmp.lt.s32.totalorder %s40_s14, %s40_s14 }
   0x8   :  { %p16367_p3 = scmp.ne.s32.totalorder %s40_s14, %s16366_s22  ;;  %p16372_p5 = scmp.lt.s32.totalorder %s16366_s22, %s16366_s22 }
   0xa   :  { %p16373_p6 = por %p16372_p5, %p16371_p4 }
   0xc   :  { %p16374_p7 = pnand %p16373_p6, %p16367_p3 }
   0xe   :  { %16377 = shalt.err (!%p16374_p7)
}
   0xf   :  { %s16381_s23 = smov 512   ;;  %s16382_s24 = smov 32  }
  0x10   :  { %45 = dma.hbm_to_vmem [thread:$0]  %s20116_s9, 16384, %s40_s14, [#allocation3], %s16381_s23, %s16381_s23, %s16382_s24  }
  0x11   :  { %16378 = dma.done.wait [#allocation3], 16384  }
  0x12   :  { %16379 = vsyncadd [#allocation3], 4294950912  ;;  %v20120_v0 = vlaneseq  ;;  %v20118_v1 = vmov 0.0   ;;  %vm20191_vm0 = vcmask 1043456   ;;  %v16475_v4 = vld [vmem:[%s20107_s0] sm:$0xff]  ;;  %v16480_v5 = vld [vmem:[%s20107_s0 + $0x8] sm:$0xff] }
  0x13   :  { %390 = vmatprep.mubr.f32.mxu0 %v20118_v1  ;;  %461 = vmatprep.mubr.f32.mxu1 %v20118_v1  ;;  %v53_v6 = vcombine.high %v16475_v4, %v16475_v4  ;;  %v54_v7 = vcombine.high %v16480_v5, %v16480_v5  ;;  %vm20193_vm1 = vcmask 31744   ;;  %v58_v8 = vsel %vm20191_vm0, %v16475_v4, 0.0  ;;  %v16491_v9 = vld [vmem:[%s20108_s1] sm:$0xf]  ;;  %v573_v23 = vld [vmem:[#allocation2 + $0x8] sm:$0xff]  ;;  %s16391_s14 = smov 1  }
  0x14   :  { %v16469_v2 = vshrl.u32 %v20120_v0, 7  ;;  %v313_v10 = vld [vmem:[%s20114_s7] sm:$0xff]  ;;  %v69_v11 = vmul.f32 %v16475_v4, %v16475_v4  ;;  %v70_v12 = vmul.f32 %v16480_v5, %v16480_v5  ;;  %v61_v16 = vsel %vm20191_vm0, %v16480_v5, 0.0  ;;  %v577_v24 = vld [vmem:[#allocation2 + $0x28] sm:$0xff]  ;;  %s16390_s7 = smov 31   ;;  %s16392_s15 = smov 127  }
  0x15   :  { %v59_v15 = vsel %vm20191_vm0, %v53_v6, 0.0  ;;  %15278 = vmatprep.subr.msk.mxu0 %vm20191_vm0, %v53_v6  ;;  %15281 = vmatprep.subr.msk.mxu1 %vm20191_vm0, %v54_v7  ;;  %v572_v17 = vld [vmem:[#allocation2] sm:$0xff]  ;;  %v63_v25 = vsel %vm20191_vm0, %v54_v7, 0.0  ;;  %v581_v33 = vld [vmem:[#allocation2 + $0x48] sm:$0xff]  ;;  %v16232_v38 = vcombine.high %v573_v23, %v577_v24  ;;  %v16233_v41 = vcombine.low %v573_v23, %v577_v24  ;;  %s16393_s16 = smov 97   ;;  %s16394_s19 = smov 96  }
  0x16   :  { %v182_v3 = vsub.s32 0, %v16469_v2  ;;  %v189_v14 = vsub.s32 1, %v16469_v2  ;;  %15279 = vmatpush1.msk.msra.mxu0 %vm20191_vm0, %v16475_v4  ;;  %15282 = vmatpush1.msk.msra.mxu1 %vm20191_vm0, %v16480_v5  ;;  %v60_v18 = vadd.f32 %v59_v15, %v58_v8  ;;  %v73_v19 = vcombine.high %v69_v11, %v69_v11  ;;  %v576_v22 = vld [vmem:[#allocation2 + $0x20] sm:$0xff]  ;;  %v585_v34 = vld [vmem:[#allocation2 + $0x68] sm:$0xff]  ;;  %s16395_s20 = smov 95  }
  0x17   :  { %v74_v20 = vcombine.high %v70_v12, %v70_v12  ;;  %v77_v21 = vsel %vm20191_vm0, %v69_v11, 0.0  ;;  %15280 = vmatmul.mubr.msk.f32.vlgmr.msra.gmra.mrb[0].mxu0 %vm20193_vm1, %v313_v10  ;;  %15283 = vmatmul.mubr.msk.f32.vlgmr.msra.gmra.mrb[0].mxu1 %vm20193_vm1, %v313_v10  ;;  %v203_v26 = vsub.s32 3, %v16469_v2  ;;  %v580_v27 = vld [vmem:[#allocation2 + $0x40] sm:$0xff]  ;;  %v80_v31 = vsel %vm20191_vm0, %v70_v12, 0.0  ;;  %v589_v47 = vld [vmem:[#allocation2 + $0x88] sm:$0xff] }
  0x18   :  { %v183_v13 = vrot.slane %v16491_v9, %v182_v3  ;;  %v584_v28 = vld [vmem:[#allocation2 + $0x60] sm:$0xff]  ;;  %v62_v29 = vadd.f32 %v61_v16, %v60_v18  ;;  %v78_v30 = vsel %vm20191_vm0, %v73_v19, 0.0  ;;  %v190_v32 = vrot.slane %v16491_v9, %v189_v14  ;;  %15753 = vmatprep.subr.bf16.mxu1 %v16232_v38  ;;  %v593_v48 = vld [vmem:[#allocation2 + $0xa8] sm:$0xff] }
  0x19   :  { %v79_v35 = vadd.f32 %v78_v30, %v77_v21  ;;  %v16200_v36 = vcombine.high %v572_v17, %v576_v22  ;;  %v16201_v37 = vcombine.low %v572_v17, %v576_v22  ;;  %v82_v40 = vsel %vm20191_vm0, %v74_v20, 0.0  ;;  %v588_v43 = vld [vmem:[#allocation2 + $0x80] sm:$0xff]  ;;  %15755 = vmatpush1.bf16.msra.mxu1 %v16233_v41  ;;  %v597_v58 = vld [vmem:[#allocation2 + $0xc8] sm:$0xff] }
  0x1a   :  { %185 = vbcast.lane.b32.xlu1 %v183_v13, 256  ;;  %v64_v39 = vadd.f32 %v63_v25, %v62_v29  ;;  %v16202_v42 = vcombine.high %v580_v27, %v584_v28  ;;  %v16234_v45 = vcombine.high %v581_v33, %v585_v34  ;;  %v592_v46 = vld [vmem:[#allocation2 + $0xa0] sm:$0xff]  ;;  %v204_v49 = vrot.slane %v16491_v9, %v203_v26  ;;  %v601_v59 = vld [vmem:[#allocation2 + $0xe8] sm:$0xff] }
  0x1b   :  { %v81_v44 = vadd.f32 %v80_v31, %v79_v35  ;;  %15689 = vmatprep.subr.bf16.mxu0 %v16200_v36  ;;  %v228_v51 = vld [vmem:[%s20109_s2] sm:$0xf]  ;;  %v16203_v52 = vcombine.low %v580_v27, %v584_v28  ;;  %v16235_v53 = vcombine.low %v581_v33, %v585_v34  ;;  %v16204_v54 = vcombine.high %v588_v43, %v592_v46  ;;  %v605_v15 = vld [vmem:[#allocation2 + $0x108] sm:$0xff]  ;;  %s16389_s2 = smov 33  }
  0x1c   :  { %65 = vadd.xlane.f32.xlu0 %v64_v39  ;;  %15691 = vmatpush1.bf16.msra.mxu0 %v16201_v37  ;;  %v16236_v55 = vcombine.high %v589_v47, %v593_v48  ;;  %v596_v56 = vld [vmem:[#allocation2 + $0xc0] sm:$0xff]  ;;  %v232_v60 = vrot.slane %v228_v51, %v182_v3  ;;  %v16205_v61 = vcombine.low %v588_v43, %v592_v46  ;;  %v196_v8 = vsub.s32 2, %v16469_v2  ;;  %v609_v17 = vld [vmem:[#allocation2 + $0x128] sm:$0xff] }
  0x1d   :  { %v83_v50 = vadd.f32 %v82_v40, %v81_v44  ;;  %15693 = vmatprep.subr.bf16.mxu0 %v16202_v42  ;;  %15757 = vmatprep.subr.bf16.mxu1 %v16234_v45  ;;  %v600_v57 = vld [vmem:[#allocation2 + $0xe0] sm:$0xff]  ;;  %v16237_v62 = vcombine.low %v589_v47, %v593_v48  ;;  %v16238_v6 = vcombine.high %v597_v58, %v601_v59  ;;  %v613_v23 = vld [vmem:[#allocation2 + $0x148] sm:$0xff]  ;;  %vm20190_vm2 = vcmask 261120  }
  0x1e   :  { %192 = vbcast.lane.b32.xlu1 %v190_v32, 256  ;;  %15759 = vmatpush1.bf16.msra.mxu1 %v16235_v53  ;;  %v16206_v63 = vcombine.high %v596_v56, %v600_v57  ;;  %v239_v7 = vrot.slane %v228_v51, %v189_v14  ;;  %v16207_v10 = vcombine.low %v596_v56, %v600_v57  ;;  %v604_v12 = vld [vmem:[#allocation2 + $0x100] sm:$0xff]  ;;  %v617_v25 = vld [vmem:[#allocation2 + $0x168] sm:$0xff]  ;;  %vm20213_vm5 = vcmask 269312  }
  0x1f   :  { %15761 = vmatprep.subr.bf16.mxu1 %v16236_v55  ;;  %v16239_v11 = vcombine.low %v597_v58, %v601_v59  ;;  %v246_v3 = vrot.slane %v228_v51, %v196_v8  ;;  %v608_v13 = vld [vmem:[#allocation2 + $0x120] sm:$0xff]  ;;  %v253_v14 = vrot.slane %v228_v51, %v203_v26  ;;  %v16240_v19 = vcombine.high %v605_v15, %v609_v17  ;;  %v621_v32 = vld [vmem:[#allocation2 + $0x188] sm:$0xff] }
  0x20   :  { %84 = vadd.xlane.f32.xlu0 %v83_v50  ;;  %15695 = vmatpush1.bf16.msra.mxu0 %v16203_v52  ;;  %v16208_v16 = vcombine.high %v604_v12, %v608_v13  ;;  %v16209_v18 = vcombine.low %v604_v12, %v608_v13  ;;  %v16241_v20 = vcombine.low %v605_v15, %v609_v17  ;;  %v612_v21 = vld [vmem:[#allocation2 + $0x140] sm:$0xff]  ;;  %v625_v34 = vld [vmem:[#allocation2 + $0x1a8] sm:$0xff] }
  0x21   :  { %15697 = vmatprep.subr.bf16.mxu0 %v16204_v54  ;;  %v616_v22 = vld [vmem:[#allocation2 + $0x160] sm:$0xff]  ;;  %v16242_v28 = vcombine.high %v613_v23, %v617_v25  ;;  %v16243_v29 = vcombine.low %v613_v23, %v617_v25  ;;  %v197_v30 = vrot.slane %v16491_v9, %v196_v8  ;;  %v16244_v36 = vcombine.high %v621_v32, %v625_v34  ;;  %v629_v40 = vld [vmem:[#allocation2 + $0x1c8] sm:$0xff] }
  0x22   :  { %206 = vbcast.lane.b32.xlu1 %v204_v49, 256  ;;  %15763 = vmatpush1.bf16.msra.mxu1 %v16237_v62  ;;  %v16210_v24 = vcombine.high %v612_v21, %v616_v22  ;;  %v16211_v27 = vcombine.low %v612_v21, %v616_v22  ;;  %v620_v26 = vld [vmem:[#allocation2 + $0x180] sm:$0xff]  ;;  %v16245_v37 = vcombine.low %v621_v32, %v625_v34  ;;  %v633_v41 = vld [vmem:[#allocation2 + $0x1e8] sm:$0xff] }
  0x23   :  { %15765 = vmatprep.subr.bf16.mxu1 %v16238_v6  ;;  %v624_v31 = vld [vmem:[#allocation2 + $0x1a0] sm:$0xff]  ;;  %v16246_v43 = vcombine.high %v629_v40, %v633_v41  ;;  %v16247_v44 = vcombine.low %v629_v40, %v633_v41  ;;  %v637_v47 = vld [vmem:[#allocation2 + $0x208] sm:$0xff] }
  0x24   :  { %15699 = vmatpush1.bf16.msra.mxu0 %v16205_v61  ;;  %v16212_v33 = vcombine.high %v620_v26, %v624_v31  ;;  %v16213_v35 = vcombine.low %v620_v26, %v624_v31  ;;  %v628_v38 = vld [vmem:[#allocation2 + $0x1c0] sm:$0xff]  ;;  %v641_v49 = vld [vmem:[#allocation2 + $0x228] sm:$0xff] }
  0x25   :  { %15701 = vmatprep.subr.bf16.mxu0 %v16206_v63  ;;  %v632_v39 = vld [vmem:[#allocation2 + $0x1e0] sm:$0xff]  ;;  %v16248_v51 = vcombine.high %v637_v47, %v641_v49  ;;  %v16249_v52 = vcombine.low %v637_v47, %v641_v49  ;;  %v645_v55 = vld [vmem:[#allocation2 + $0x248] sm:$0xff] }
  0x26   :  { %234 = vbcast.lane.b32.xlu1 %v232_v60, 256  ;;  %15767 = vmatpush1.bf16.msra.mxu1 %v16239_v11  ;;  %v16214_v9 = vcombine.high %v628_v38, %v632_v39  ;;  %v16215_v42 = vcombine.low %v628_v38, %v632_v39  ;;  %v636_v45 = vld [vmem:[#allocation2 + $0x200] sm:$0xff]  ;;  %v649_v57 = vld [vmem:[#allocation2 + $0x268] sm:$0xff] }
  0x27   :  { %15769 = vmatprep.subr.bf16.mxu1 %v16240_v19  ;;  %v640_v46 = vld [vmem:[#allocation2 + $0x220] sm:$0xff]  ;;  %v16250_v59 = vcombine.high %v645_v55, %v649_v57  ;;  %v16251_v60 = vcombine.low %v645_v55, %v649_v57  ;;  %v653_v63 = vld [vmem:[#allocation2 + $0x288] sm:$0xff] }
  0x28   :  { %15703 = vmatpush1.bf16.msra.mxu0 %v16207_v10  ;;  %v16216_v48 = vcombine.high %v636_v45, %v640_v46  ;;  %v16217_v50 = vcombine.low %v636_v45, %v640_v46  ;;  %v644_v53 = vld [vmem:[#allocation2 + $0x240] sm:$0xff]  ;;  %v661_v13 = vld [vmem:[#allocation2 + $0x2c8] sm:$0xff] }
  0x29   :  { %15705 = vmatprep.subr.bf16.mxu0 %v16208_v16  ;;  %v648_v54 = vld [vmem:[#allocation2 + $0x260] sm:$0xff]  ;;  %v665_v16 = vld [vmem:[#allocation2 + $0x2e8] sm:$0xff] }
  0x2a   :  { %241 = vbcast.lane.b32.xlu1 %v239_v7, 256  ;;  %15771 = vmatpush1.bf16.msra.mxu1 %v16241_v20  ;;  %v16218_v56 = vcombine.high %v644_v53, %v648_v54  ;;  %v16219_v58 = vcombine.low %v644_v53, %v648_v54  ;;  %v652_v61 = vld [vmem:[#allocation2 + $0x280] sm:$0xff]  ;;  %v657_v7 = vld [vmem:[#allocation2 + $0x2a8] sm:$0xff]  ;;  %v16546_v54 = vld [vmem:[#allocation2 + $0x38] sm:$0xff] }
  0x2b   :  { %15773 = vmatprep.subr.bf16.mxu1 %v16242_v28  ;;  %v656_v62 = vld [vmem:[#allocation2 + $0x2a0] sm:$0xff]  ;;  %v16252_v10 = vcombine.high %v653_v63, %v657_v7  ;;  %v16253_v11 = vcombine.low %v653_v63, %v657_v7  ;;  %v669_v21 = vld [vmem:[#allocation2 + $0x308] sm:$0xff] }
  0x2c   :  { %15707 = vmatpush1.bf16.msra.mxu0 %v16209_v18  ;;  %v16220_v6 = vcombine.high %v652_v61, %v656_v62  ;;  %v16221_v8 = vcombine.low %v652_v61, %v656_v62  ;;  %v664_v12 = vld [vmem:[#allocation2 + $0x2e0] sm:$0xff]  ;;  %v16255_v18 = vcombine.low %v661_v13, %v665_v16  ;;  %v673_v23 = vld [vmem:[#allocation2 + $0x328] sm:$0xff] }
  0x2d   :  { %15709 = vmatprep.subr.bf16.mxu0 %v16210_v24  ;;  %v668_v19 = vld [vmem:[#allocation2 + $0x300] sm:$0xff]  ;;  %v16256_v25 = vcombine.high %v669_v21, %v673_v23  ;;  %v681_v31 = vld [vmem:[#allocation2 + $0x368] sm:$0xff] }
  0x2e   :  { %248 = vbcast.lane.b32.xlu1 %v246_v3, 256  ;;  %15775 = vmatpush1.bf16.msra.mxu1 %v16243_v29  ;;  %v660_v3 = vld [vmem:[#allocation2 + $0x2c0] sm:$0xff]  ;;  %v689_v39 = vld [vmem:[#allocation2 + $0x3a8] sm:$0xff] }
  0x2f   :  { %15777 = vmatprep.subr.bf16.mxu1 %v16244_v36  ;;  %v16222_v15 = vcombine.high %v660_v3, %v664_v12  ;;  %v16223_v17 = vcombine.low %v660_v3, %v664_v12  ;;  %v672_v20 = vld [vmem:[#allocation2 + $0x320] sm:$0xff]  ;;  %v697_v47 = vld [vmem:[#allocation2 + $0x3e8] sm:$0xff] }
  0x30   :  { %15711 = vmatpush1.bf16.msra.mxu0 %v16211_v27  ;;  %v16224_v22 = vcombine.high %v668_v19, %v672_v20  ;;  %v16225_v24 = vcombine.low %v668_v19, %v672_v20  ;;  %v16257_v27 = vcombine.low %v669_v21, %v673_v23  ;;  %v676_v28 = vld [vmem:[#allocation2 + $0x340] sm:$0xff]  ;;  %v16386_v19 = vmov 1934713408  }
  0x31   :  { %15713 = vmatprep.subr.bf16.mxu0 %v16212_v33  ;;  %v680_v29 = vld [vmem:[#allocation2 + $0x360] sm:$0xff]  ;;  %v146_v20 = vunpack.c.l.s4 %v16386_v19 }
  0x32   :  { %255 = vbcast.lane.b32.xlu1 %v253_v14, 256  ;;  %15779 = vmatpush1.bf16.msra.mxu1 %v16245_v37  ;;  %v16254_v14 = vcombine.high %v661_v13, %v665_v16  ;;  %v16226_v26 = vcombine.high %v676_v28, %v680_v29  ;;  %v16227_v32 = vcombine.low %v676_v28, %v680_v29  ;;  %v688_v36 = vld [vmem:[#allocation2 + $0x3a0] sm:$0xff]  ;;  %v685_v37 = vld [vmem:[#allocation2 + $0x388] sm:$0xff] }
  0x33   :  { %15781 = vmatprep.subr.bf16.mxu1 %v16246_v43  ;;  %v16261_v41 = vcombine.low %v685_v37, %v689_v39  ;;  %v696_v43 = vld [vmem:[#allocation2 + $0x3e0] sm:$0xff] }
  0x34   :  { %15715 = vmatpush1.bf16.msra.mxu0 %v16213_v35  ;;  %v684_v35 = vld [vmem:[#allocation2 + $0x380] sm:$0xff] }
  0x35   :  { %15717 = vmatprep.subr.bf16.mxu0 %v16214_v9  ;;  %v16228_v38 = vcombine.high %v684_v35, %v688_v36  ;;  %v16229_v40 = vcombine.low %v684_v35, %v688_v36  ;;  %v16260_v9 = vcombine.high %v685_v37, %v689_v39 }
  0x36   :  { %199 = vbcast.lane.b32.xlu0 %v197_v30, 256  ;;  %15783 = vmatpush1.bf16.msra.mxu1 %v16247_v44  ;;  %v677_v30 = vld [vmem:[#allocation2 + $0x348] sm:$0xff] }
  0x37   :  { %15785 = vmatprep.subr.bf16.mxu1 %v16248_v51  ;;  %v16258_v33 = vcombine.high %v677_v30, %v681_v31  ;;  %v16259_v34 = vcombine.low %v677_v30, %v681_v31  ;;  %v693_v44 = vld [vmem:[#allocation2 + $0x3c8] sm:$0xff]  ;;  %v16540_v51 = vld [vmem:[#allocation2 + $0x30] sm:$0xff] }
  0x38   :  { %15719 = vmatpush1.bf16.msra.mxu0 %v16215_v42  ;;  %v692_v42 = vld [vmem:[#allocation2 + $0x3c0] sm:$0xff]  ;;  %v16263_v49 = vcombine.low %v693_v44, %v697_v47 }
  0x39   :  { %15721 = vmatprep.subr.bf16.mxu0 %v16216_v48  ;;  %v16230_v45 = vcombine.high %v692_v42, %v696_v43  ;;  %v16231_v46 = vcombine.low %v692_v42, %v696_v43  ;;  %v16262_v48 = vcombine.high %v693_v44, %v697_v47 }
  0x3a   :  { %15787 = vmatpush1.bf16.msra.mxu1 %v16249_v52  ;;  %v16542_v52 = vld [vmem:[#allocation2 + $0x18] sm:$0xff] }
  0x3b   :  { %15789 = vmatprep.subr.bf16.mxu1 %v16250_v59  ;;  %v16297_v57 = vcombine.low %v16542_v52, %v16546_v54 }
  0x3c   :  { %15723 = vmatpush1.bf16.msra.mxu0 %v16217_v50  ;;  %v16538_v50 = vld [vmem:[#allocation2 + $0x10] sm:$0xff] }
  0x3d   :  { %15725 = vmatprep.subr.bf16.mxu0 %v16218_v56  ;;  %v16264_v53 = vcombine.high %v16538_v50, %v16540_v51  ;;  %v16265_v55 = vcombine.low %v16538_v50, %v16540_v51  ;;  %v16296_v56 = vcombine.high %v16542_v52, %v16546_v54  ;;  %v606_v52 = vld [vmem:[#allocation2 + $0x110] sm:$0xff]  ;;  %v16387_v54 = vmov 1935823168  }
  0x3e   :  { %15791 = vmatpush1.bf16.msra.mxu1 %v16251_v60 }
  0x3f   :  { %15793 = vmatprep.subr.bf16.mxu1 %v16252_v10 }
  0x40   :  { %15727 = vmatpush1.bf16.msra.mxu0 %v16219_v58 }
  0x41   :  { %15729 = vmatprep.subr.bf16.mxu0 %v16220_v6  ;;  %v16384_v6 = vmov 839922192  }
  0x42   :  { %15795 = vmatpush1.bf16.msra.mxu1 %v16253_v11  ;;  %v93_v7 = vunpack.c.l.s4 %v16384_v6 }
  0x43   :  { %15797 = vmatprep.subr.bf16.mxu1 %v16254_v14 }
  0x44   :  { %15731 = vmatpush1.bf16.msra.mxu0 %v16221_v8  ;;  %v94_v3 = vunpack.c.0.s8 %v93_v7 }
  0x45   :  { %15733 = vmatprep.subr.bf16.mxu0 %v16222_v15  ;;  %v16385_v15 = vmov 1983009808  }
  0x46   :  { %15799 = vmatpush1.bf16.msra.mxu1 %v16255_v18  ;;  %v97_v13 = vsub.s32 %v94_v3, %v16469_v2  ;;  %v115_v16 = vunpack.c.l.s4 %v16385_v15 }
  0x47   :  { %15801 = vmatprep.subr.bf16.mxu1 %v16256_v25 }
  0x48   :  { %15735 = vmatpush1.bf16.msra.mxu0 %v16223_v17  ;;  %v116_v14 = vunpack.c.0.s8 %v115_v16 }
  0x49   :  { %15737 = vmatprep.subr.bf16.mxu0 %v16224_v22 }
  0x4a   :  { %15803 = vmatpush1.bf16.msra.mxu1 %v16257_v27  ;;  %v147_v27 = vunpack.c.0.s8 %v146_v20 }
  0x4b   :  { %15805 = vmatprep.subr.bf16.mxu1 %v16258_v33 }
  0x4c   :  { %15739 = vmatpush1.bf16.msra.mxu0 %v16225_v24  ;;  %v16558_v24 = vsub.s32 %v116_v14, %v16469_v2 }
  0x4d   :  { %15741 = vmatprep.subr.bf16.mxu0 %v16226_v26 }
  0x4e   :  { %15807 = vmatpush1.bf16.msra.mxu1 %v16259_v34 }
  0x4f   :  { %15809 = vmatprep.subr.bf16.mxu1 %v16260_v9 }
  0x50   :  { %15743 = vmatpush1.bf16.msra.mxu0 %v16227_v32 }
  0x51   :  { %15745 = vmatprep.subr.bf16.mxu0 %v16228_v38 }
  0x52   :  { %15811 = vmatpush1.bf16.msra.mxu1 %v16261_v41 }
  0x53   :  { %15813 = vmatprep.subr.bf16.mxu1 %v16262_v48 }
  0x54   :  { %15747 = vmatpush1.bf16.msra.mxu0 %v16229_v40 }
  0x55   :  { %15749 = vmatprep.subr.bf16.mxu0 %v16230_v45 }
  0x56   :  { %15815 = vmatpush1.bf16.msra.mxu1 %v16263_v49 }
  0x57   :  { %15881 = vmatprep.subr.bf16.mxu1 %v16296_v56 }
  0x58   :  { %15751 = vmatpush1.bf16.msra.mxu0 %v16231_v46 }
  0x59   :  { %15817 = vmatprep.subr.bf16.mxu0 %v16264_v53 }
  0x8c   :  { %v186_v59 = vpop.permute.xlu1 %185 }
  0x90   :  { %v193_v8 = vpop.permute.xlu1 %192 }
  0x94   :  { %v207_v12 = vpop.permute.xlu1 %206 }
  0x98   :  { %v235_v18 = vpop.permute.xlu1 %234 }
  0x9c   :  { %v242_v30 = vpop.permute.xlu1 %241 }
  0xa0   :  { %v249_v39 = vpop.permute.xlu1 %248 }
  0xa9   :  { %v66_v58 = vpop.xlane.xlu0 %65 }
  0xaa   :  { %v68_v60 = vmul.f32 0.001953125, %v66_v58 }
  0xac   :  { %v87_v62 = vmul.f32 %v68_v60, %v68_v60  ;;  %v98_v17 = vrot.slane %v68_v60, %v97_v13 }
  0xad   :  { %v85_v61 = vpop.xlane.xlu0 %84 }
  0xae   :  { %v86_v63 = vmul.f32 0.001953125, %v85_v61  ;;  %v100_v22 = vsub.f32 %v16475_v4, %v98_v17  ;;  %v101_v23 = vsub.f32 %v16480_v5, %v98_v17  ;;  %v150_v4 = vsub.s32 %v147_v27, %v16469_v2 }
  0xb0   :  { %v88_v10 = vsub.f32 %v86_v63, %v87_v62  ;;  %v256_v63 = vpop.permute.xlu1 %255 }
  0xb1   :  { %v200_v47 = vpop.permute.xlu0 %199 }
  0xb2   :  { %v89_v11 = vadd.f32 1e-05, %v88_v10 }
  0xb4   :  { %16352 = vrsqrt.f32 %v89_v11 }
  0xbe   :  { %v16353_v21 = vpop.eup %16352 }
  0xbf   :  { %v109_v25 = vrot.slane %v16353_v21, %v97_v13 }
  0xc1   :  { %v111_v28 = vmul.f32 %v109_v25, %v100_v22  ;;  %v112_v29 = vmul.f32 %v109_v25, %v101_v23 }
  0xc3   :  { %v113_v26 = vcombine.high %v111_v28, %v20118_v1  ;;  %v120_v31 = vrot.slane %v111_v28, %v16558_v24  ;;  %v128_v32 = vcombine.high %v112_v29, %v20118_v1  ;;  %v135_v33 = vrot.slane %v112_v29, %v16558_v24 }
  0xc5   :  { %v127_v5 = vrot.slane %v113_v26, %v16558_v24  ;;  %v142_v34 = vrot.slane %v128_v32, %v16558_v24  ;;  %v143_v35 = vcombine.low %v120_v31, %v135_v33  ;;  %v144_v36 = vcombine.high %v120_v31, %v135_v33 }
  0xc7   :  { %v159_v37 = vcombine.low %v127_v5, %v142_v34  ;;  %v160_v38 = vcombine.high %v127_v5, %v142_v34  ;;  %v151_v40 = vrot.slane %v143_v35, %v150_v4  ;;  %v158_v42 = vrot.slane %v144_v36, %v150_v4  ;;  %v582_v35 = vld [vmem:[#allocation2 + $0x50] sm:$0xff] }
  0xc9   :  { %v167_v9 = vrot.slane %v159_v37, %v150_v4  ;;  %v174_v41 = vrot.slane %v160_v38, %v150_v4  ;;  %v586_v37 = vld [vmem:[#allocation2 + $0x70] sm:$0xff]  ;;  %v583_v38 = vld [vmem:[#allocation2 + $0x58] sm:$0xff] }
  0xcb   :  { %v175_v43 = vcombine.low %v151_v40, %v167_v9  ;;  %v15274_v44 = vcombine.low %v167_v9, %v167_v9  ;;  %v176_v45 = vcombine.high %v151_v40, %v167_v9  ;;  %v15275_v46 = vcombine.high %v167_v9, %v167_v9 }
  0xcc   :  { %v178_v48 = vcombine.high %v158_v42, %v174_v41  ;;  %v15277_v49 = vcombine.high %v174_v41, %v174_v41  ;;  %v177_v53 = vcombine.low %v158_v42, %v174_v41  ;;  %v15276_v56 = vcombine.low %v174_v41, %v174_v41 }
  0xcd   :  { %v220_v58 = vmul.f32 %v186_v59, %v175_v43  ;;  %v221_v60 = vmul.f32 %v15274_v44, %v186_v59  ;;  %v222_v61 = vmul.f32 %v193_v8, %v176_v45  ;;  %v223_v62 = vmul.f32 %v15275_v46, %v193_v8  ;;  %v590_v43 = vld [vmem:[#allocation2 + $0x90] sm:$0xff]  ;;  %v591_v45 = vld [vmem:[#allocation2 + $0x98] sm:$0xff] }
  0xce   :  { %v226_v6 = vmul.f32 %v207_v12, %v178_v48  ;;  %v227_v7 = vmul.f32 %v15277_v49, %v207_v12  ;;  %v224_v10 = vmul.f32 %v200_v47, %v177_v53  ;;  %v225_v11 = vmul.f32 %v15276_v56, %v200_v47  ;;  %v594_v44 = vld [vmem:[#allocation2 + $0xb0] sm:$0xff]  ;;  %v595_v46 = vld [vmem:[#allocation2 + $0xb8] sm:$0xff] }
  0xcf   :  { %v257_v3 = vadd.f32 %v235_v18, %v220_v58  ;;  %v258_v13 = vadd.f32 %v235_v18, %v221_v60  ;;  %v259_v15 = vadd.f32 %v242_v30, %v222_v61  ;;  %v260_v16 = vadd.f32 %v242_v30, %v223_v62  ;;  %v598_v56 = vld [vmem:[#allocation2 + $0xd0] sm:$0xff]  ;;  %v599_v60 = vld [vmem:[#allocation2 + $0xd8] sm:$0xff] }
  0xd0   :  { %v261_v17 = vadd.f32 %v249_v39, %v224_v10  ;;  %v262_v14 = vadd.f32 %v249_v39, %v225_v11  ;;  %v263_v19 = vadd.f32 %v256_v63, %v226_v6  ;;  %v264_v20 = vadd.f32 %v256_v63, %v227_v7  ;;  %v587_v39 = vld [vmem:[#allocation2 + $0x78] sm:$0xff]  ;;  %v602_v58 = vld [vmem:[#allocation2 + $0xf0] sm:$0xff] }
  0xd1   :  { %v265_v21 = vmax.f32 %v257_v3, 0.0  ;;  %v266_v22 = vmax.f32 %v258_v13, 0.0  ;;  %v267_v23 = vmax.f32 %v259_v15, 0.0  ;;  %v268_v25 = vmax.f32 %v260_v16, 0.0  ;;  %v603_v61 = vld [vmem:[#allocation2 + $0xf8] sm:$0xff]  ;;  %v614_v15 = vld [vmem:[#allocation2 + $0x150] sm:$0xff] }
  0xd2   :  { %v269_v59 = vmax.f32 %v261_v17, 0.0  ;;  %v270_v27 = vmax.f32 %v262_v14, 0.0  ;;  %v271_v8 = vmax.f32 %v263_v19, 0.0  ;;  %v272_v28 = vmax.f32 %v264_v20, 0.0  ;;  %v607_v6 = vld [vmem:[#allocation2 + $0x118] sm:$0xff]  ;;  %v618_v19 = vld [vmem:[#allocation2 + $0x170] sm:$0xff] }
  0xd3   :  { %v281_v29 = vcombine.low %v265_v21, %v266_v22  ;;  %v289_v12 = vcombine.low %v267_v23, %v268_v25  ;;  %v16266_v41 = vcombine.high %v582_v35, %v586_v37  ;;  %v16298_v42 = vcombine.high %v583_v38, %v587_v39  ;;  %v611_v7 = vld [vmem:[#allocation2 + $0x138] sm:$0xff] }
  0xd4   :  { %v297_v26 = vcombine.low %v269_v59, %v270_v27  ;;  %v305_v31 = vcombine.low %v271_v8, %v272_v28  ;;  %v16267_v47 = vcombine.low %v582_v35, %v586_v37  ;;  %v16299_v48 = vcombine.low %v583_v38, %v587_v39  ;;  %v615_v20 = vld [vmem:[#allocation2 + $0x158] sm:$0xff] }
  0xd5   :  { %v288_v18 = vrot.slane %v281_v29, %v16558_v24  ;;  %v296_v30 = vrot.slane %v289_v12, %v16558_v24  ;;  %v16268_v49 = vcombine.high %v590_v43, %v594_v44  ;;  %v16300_v53 = vcombine.high %v591_v45, %v595_v46  ;;  %v619_v21 = vld [vmem:[#allocation2 + $0x178] sm:$0xff] }
  0xd6   :  { %v304_v32 = vrot.slane %v297_v26, %v16558_v24  ;;  %v312_v33 = vrot.slane %v305_v31, %v16558_v24  ;;  %v16269_v62 = vcombine.low %v590_v43, %v594_v44  ;;  %v16301_v63 = vcombine.low %v591_v45, %v595_v46  ;;  %v622_v31 = vld [vmem:[#allocation2 + $0x190] sm:$0xff] }
  0xd7   :  { %v540_v4 = vcombine.low %v288_v18, %v296_v30  ;;  %v16270_v50 = vcombine.high %v598_v56, %v602_v58  ;;  %v16302_v51 = vcombine.high %v599_v60, %v603_v61  ;;  %v16271_v10 = vcombine.low %v598_v56, %v602_v58  ;;  %v626_v18 = vld [vmem:[#allocation2 + $0x1b0] sm:$0xff] }
  0xd8   :  { %v541_v5 = vcombine.low %v304_v32, %v312_v33  ;;  %v16303_v11 = vcombine.low %v599_v60, %v603_v61  ;;  %v16304_v13 = vcombine.high %v607_v6, %v611_v7  ;;  %v16305_v59 = vcombine.low %v607_v6, %v611_v7  ;;  %v630_v45 = vld [vmem:[#allocation2 + $0x1d0] sm:$0xff]  ;;  %v643_v6 = vld [vmem:[#allocation2 + $0x238] sm:$0xff] }
  0xd9   :  { %v548_v34 = vrot.slane %v540_v4, %v16558_v24  ;;  %v16274_v12 = vcombine.high %v614_v15, %v618_v19  ;;  %v16306_v26 = vcombine.high %v615_v20, %v619_v21  ;;  %v16307_v37 = vcombine.low %v615_v20, %v619_v21  ;;  %v634_v46 = vld [vmem:[#allocation2 + $0x1f0] sm:$0xff] }
  0xda   :  { %v555_v36 = vrot.slane %v541_v5, %v16558_v24  ;;  %v623_v5 = vld [vmem:[#allocation2 + $0x198] sm:$0xff]  ;;  %v16277_v58 = vcombine.low %v622_v31, %v626_v18  ;;  %v16279_v7 = vcombine.low %v630_v45, %v634_v46 }
  0xdc   :  { %v16573_v40 = vcombine.high %v548_v34, %v555_v36  ;;  %v16575_v9 = vcombine.low %v548_v34, %v555_v36  ;;  %v627_v34 = vld [vmem:[#allocation2 + $0x1b8] sm:$0xff]  ;;  %v16275_v36 = vcombine.low %v614_v15, %v618_v19  ;;  %v650_v15 = vld [vmem:[#allocation2 + $0x270] sm:$0xff] }
  0xdd   :  { %v16308_v44 = vcombine.high %v623_v5, %v627_v34  ;;  %v16309_v60 = vcombine.low %v623_v5, %v627_v34  ;;  %v674_v5 = vld [vmem:[#allocation2 + $0x330] sm:$0xff]  ;;  %v671_v34 = vld [vmem:[#allocation2 + $0x318] sm:$0xff] }
  0xde   :  { %1020 = vmatprep.mubr.f32.mxu0 %v16573_v40  ;;  %1103 = vmatprep.mubr.f32.mxu1 %v16573_v40 }
  0xdf   :  { %1021 = vmatmul.mubr.f32.vlgmr.msra.gmra.mrb[2].mxu0 %v16575_v9  ;;  %1104 = vmatmul.mubr.f32.vlgmr.msra.gmra.mrb[2].mxu1 %v16575_v9 }
  0xe0   :  { %15819 = vmatpush1.bf16.msra.mxu0 %v16265_v55  ;;  %15883 = vmatpush1.bf16.msra.mxu1 %v16297_v57  ;;  %v513_v55 = vunpack.c.l.s4 %v16387_v54  ;;  %v610_v57 = vld [vmem:[#allocation2 + $0x130] sm:$0xff] }
  0xe1   :  { %15821 = vmatprep.subr.bf16.mxu0 %v16266_v41  ;;  %15885 = vmatprep.subr.bf16.mxu1 %v16298_v42  ;;  %v16272_v3 = vcombine.high %v606_v52, %v610_v57  ;;  %v16273_v25 = vcombine.low %v606_v52, %v610_v57  ;;  %v16276_v41 = vcombine.high %v622_v31, %v626_v18  ;;  %v638_v54 = vld [vmem:[#allocation2 + $0x210] sm:$0xff]  ;;  %v639_v57 = vld [vmem:[#allocation2 + $0x218] sm:$0xff] }
  0xe2   :  { %v514_v14 = vunpack.c.0.s8 %v513_v55  ;;  %v642_v55 = vld [vmem:[#allocation2 + $0x230] sm:$0xff]  ;;  %v16313_v19 = vcombine.low %v639_v57, %v643_v6  ;;  %v663_v31 = vld [vmem:[#allocation2 + $0x2d8] sm:$0xff] }
  0xe4   :  { %15823 = vmatpush1.bf16.msra.mxu0 %v16267_v47  ;;  %15887 = vmatpush1.bf16.msra.mxu1 %v16299_v48  ;;  %v517_v4 = vsub.s32 %v514_v14, %v16469_v2  ;;  %v16281_v14 = vcombine.low %v638_v54, %v642_v55 }
  0xe5   :  { %15825 = vmatprep.subr.bf16.mxu0 %v16268_v49  ;;  %15889 = vmatprep.subr.bf16.mxu1 %v16300_v53  ;;  %v631_v49 = vld [vmem:[#allocation2 + $0x1d8] sm:$0xff] }
  0xe6   :  { %v635_v53 = vld [vmem:[#allocation2 + $0x1f8] sm:$0xff] }
  0xe8   :  { %15827 = vmatpush1.bf16.msra.mxu0 %v16269_v62  ;;  %15891 = vmatpush1.bf16.msra.mxu1 %v16301_v63  ;;  %v16278_v63 = vcombine.high %v630_v45, %v634_v46 }
  0xe9   :  { %15829 = vmatprep.subr.bf16.mxu0 %v16270_v50  ;;  %15893 = vmatprep.subr.bf16.mxu1 %v16302_v51  ;;  %v16310_v50 = vcombine.high %v631_v49, %v635_v53 }
  0xea   :  { %v392_v16 = vpop.f32.mrb[0].mxu0  ;;  %v463_v17 = vpop.f32.mrb[0].mxu1 }
  0xeb   :  { %v394_v22 = vpop.f32.mrb[1].mxu0  ;;  %v465_v23 = vpop.f32.mrb[1].mxu1 }
  0xec   :  { %15831 = vmatpush1.bf16.msra.mxu0 %v16271_v10  ;;  %15895 = vmatpush1.bf16.msra.mxu1 %v16303_v11  ;;  %v472_v27 = vcombine.low %v392_v16, %v394_v22  ;;  %v473_v8 = vcombine.high %v392_v16, %v394_v22  ;;  %v474_v28 = vcombine.low %v463_v17, %v465_v23  ;;  %v646_v11 = vld [vmem:[#allocation2 + $0x250] sm:$0xff]  ;;  %v647_v16 = vld [vmem:[#allocation2 + $0x258] sm:$0xff] }
  0xed   :  { %v475_v29 = vcombine.high %v463_v17, %v465_v23  ;;  %15833 = vmatprep.subr.bf16.mxu0 %v16272_v3  ;;  %15897 = vmatprep.subr.bf16.mxu1 %v16304_v13  ;;  %v16311_v10 = vcombine.low %v631_v49, %v635_v53  ;;  %v16280_v3 = vcombine.high %v638_v54, %v642_v55  ;;  %v651_v17 = vld [vmem:[#allocation2 + $0x278] sm:$0xff]  ;;  %v654_v22 = vld [vmem:[#allocation2 + $0x290] sm:$0xff] }
  0xee   :  { %v482_v30 = vrot.slane %v472_v27, %v16558_v24  ;;  %v489_v32 = vrot.slane %v473_v8, %v16558_v24  ;;  %v496_v33 = vrot.slane %v474_v28, %v16558_v24  ;;  %v16312_v13 = vcombine.high %v639_v57, %v643_v6  ;;  %v658_v23 = vld [vmem:[#allocation2 + $0x2b0] sm:$0xff]  ;;  %v695_v57 = vld [vmem:[#allocation2 + $0x3d8] sm:$0xff] }
  0xef   :  { %v503_v35 = vrot.slane %v475_v29, %v16558_v24  ;;  %v16282_v20 = vcombine.high %v646_v11, %v650_v15  ;;  %v16314_v21 = vcombine.high %v647_v16, %v651_v17  ;;  %v16283_v27 = vcombine.low %v646_v11, %v650_v15  ;;  %v686_v49 = vld [vmem:[#allocation2 + $0x390] sm:$0xff]  ;;  %v699_v6 = vld [vmem:[#allocation2 + $0x3f8] sm:$0xff] }
  0xf0   :  { %v504_v38 = vcombine.low %v482_v30, %v496_v33  ;;  %v505_v39 = vcombine.high %v482_v30, %v496_v33  ;;  %15835 = vmatpush1.bf16.msra.mxu0 %v16273_v25  ;;  %15899 = vmatpush1.bf16.msra.mxu1 %v16305_v59  ;;  %v655_v25 = vld [vmem:[#allocation2 + $0x298] sm:$0xff]  ;;  %v16315_v8 = vcombine.low %v647_v16, %v651_v17  ;;  %v690_v53 = vld [vmem:[#allocation2 + $0x3b0] sm:$0xff] }
  0xf1   :  { %v506_v42 = vcombine.low %v489_v32, %v503_v35  ;;  %v507_v43 = vcombine.high %v489_v32, %v503_v35  ;;  %15837 = vmatprep.subr.bf16.mxu0 %v16274_v12  ;;  %15901 = vmatprep.subr.bf16.mxu1 %v16306_v26  ;;  %v659_v59 = vld [vmem:[#allocation2 + $0x2b8] sm:$0xff]  ;;  %v16284_v28 = vcombine.high %v654_v22, %v658_v23  ;;  %v662_v12 = vld [vmem:[#allocation2 + $0x2d0] sm:$0xff] }
  0xf2   :  { %v518_v47 = vrot.slane %v504_v38, %v517_v4  ;;  %v525_v48 = vrot.slane %v505_v39, %v517_v4  ;;  %v16316_v29 = vcombine.high %v655_v25, %v659_v59  ;;  %v666_v26 = vld [vmem:[#allocation2 + $0x2f0] sm:$0xff]  ;;  %v16285_v18 = vcombine.low %v654_v22, %v658_v23  ;;  %v675_v35 = vld [vmem:[#allocation2 + $0x338] sm:$0xff] }
  0xf3   :  { %v532_v56 = vrot.slane %v506_v42, %v517_v4  ;;  %v539_v24 = vrot.slane %v507_v43, %v517_v4  ;;  %v16317_v30 = vcombine.low %v655_v25, %v659_v59  ;;  %v16286_v32 = vcombine.high %v662_v12, %v666_v26  ;;  %v670_v4 = vld [vmem:[#allocation2 + $0x310] sm:$0xff]  ;;  %v679_v43 = vld [vmem:[#allocation2 + $0x358] sm:$0xff] }
  0xf4   :  { %15839 = vmatpush1.bf16.msra.mxu0 %v16275_v36  ;;  %15903 = vmatpush1.bf16.msra.mxu1 %v16307_v37  ;;  %v16592_v61 = vcombine.high %v518_v47, %v525_v48  ;;  %v16594_v62 = vcombine.low %v518_v47, %v525_v48  ;;  %v16287_v36 = vcombine.low %v662_v12, %v666_v26  ;;  %v682_v42 = vld [vmem:[#allocation2 + $0x370] sm:$0xff] }
  0xf5   :  { %15841 = vmatprep.subr.bf16.mxu0 %v16276_v41  ;;  %15905 = vmatprep.subr.bf16.mxu1 %v16308_v44  ;;  %v16596_v51 = vcombine.high %v532_v56, %v539_v24  ;;  %v16598_v52 = vcombine.low %v532_v56, %v539_v24  ;;  %v16288_v38 = vcombine.high %v670_v4, %v674_v5  ;;  %v678_v41 = vld [vmem:[#allocation2 + $0x350] sm:$0xff]  ;;  %v683_v44 = vld [vmem:[#allocation2 + $0x378] sm:$0xff] }
  0xf6   :  { %1026 = vmatprep.mubr.f32.mxu0 %v16592_v61  ;;  %1109 = vmatprep.mubr.f32.mxu1 %v16592_v61  ;;  %v16320_v39 = vcombine.high %v671_v34, %v675_v35  ;;  %v16289_v45 = vcombine.low %v670_v4, %v674_v5  ;;  %v16321_v46 = vcombine.low %v671_v34, %v675_v35  ;;  %v687_v56 = vld [vmem:[#allocation2 + $0x398] sm:$0xff]  ;;  %v694_v54 = vld [vmem:[#allocation2 + $0x3d0] sm:$0xff] }
  0xf7   :  { %1027 = vmatmul.mubr.f32.gmra.mrb[4].mxu0 %v16594_v62  ;;  %1110 = vmatmul.mubr.f32.gmra.mrb[4].mxu1 %v16594_v62  ;;  %v16290_v47 = vcombine.high %v678_v41, %v682_v42  ;;  %v16322_v48 = vcombine.high %v679_v43, %v683_v44  ;;  %v691_v24 = vld [vmem:[#allocation2 + $0x3b8] sm:$0xff]  ;;  %v698_v55 = vld [vmem:[#allocation2 + $0x3f0] sm:$0xff]  ;;  %v16327_v15 = vcombine.low %v695_v57, %v699_v6 }
  0xf8   :  { %15843 = vmatpush1.bf16.msra.mxu0 %v16277_v58  ;;  %15907 = vmatpush1.bf16.msra.mxu1 %v16309_v60  ;;  %v16291_v58 = vcombine.low %v678_v41, %v682_v42  ;;  %v16323_v60 = vcombine.low %v679_v43, %v683_v44  ;;  %v16294_v11 = vcombine.high %v694_v54, %v698_v55 }
  0xf9   :  { %15845 = vmatprep.subr.bf16.mxu0 %v16278_v63  ;;  %15909 = vmatprep.subr.bf16.mxu1 %v16310_v50  ;;  %v16292_v63 = vcombine.high %v686_v49, %v690_v53  ;;  %v16324_v50 = vcombine.high %v687_v56, %v691_v24 }
  0xfa   :  { %1032 = vmatprep.mubr.f32.mxu0 %v16596_v51  ;;  %1115 = vmatprep.mubr.f32.mxu1 %v16596_v51 }
  0xfb   :  { %1033 = vmatmul.mubr.f32.gmra.mrb[6].mxu0 %v16598_v52  ;;  %1116 = vmatmul.mubr.f32.gmra.mrb[6].mxu1 %v16598_v52 }
  0xfc   :  { %15847 = vmatpush1.bf16.msra.mxu0 %v16279_v7  ;;  %15911 = vmatpush1.bf16.msra.mxu1 %v16311_v10  ;;  %v16293_v7 = vcombine.low %v686_v49, %v690_v53  ;;  %v16325_v10 = vcombine.low %v687_v56, %v691_v24 }
  0xfd   :  { %1186 = vmatprep.mubr.f32.mxu0 %v16573_v40  ;;  %1269 = vmatprep.mubr.f32.mxu1 %v16573_v40  ;;  %v667_v40 = vld [vmem:[#allocation2 + $0x2f8] sm:$0xff] }
  0xfe   :  { %15849 = vmatprep.subr.bf16.mxu0 %v16280_v3  ;;  %15913 = vmatprep.subr.bf16.mxu1 %v16312_v13  ;;  %v16318_v33 = vcombine.high %v663_v31, %v667_v40  ;;  %v16319_v37 = vcombine.low %v663_v31, %v667_v40  ;;  %v16326_v3 = vcombine.high %v695_v57, %v699_v6 }
  0xff   :  { %v16295_v13 = vcombine.low %v694_v54, %v698_v55 }
 0x100   :  { %15851 = vmatpush1.bf16.msra.mxu0 %v16281_v14  ;;  %15915 = vmatpush1.bf16.msra.mxu1 %v16313_v19 }
 0x101   :  { %15853 = vmatprep.subr.bf16.mxu0 %v16282_v20  ;;  %15917 = vmatprep.subr.bf16.mxu1 %v16314_v21 }
 0x104   :  { %15855 = vmatpush1.bf16.msra.mxu0 %v16283_v27  ;;  %15919 = vmatpush1.bf16.msra.mxu1 %v16315_v8 }
 0x105   :  { %15857 = vmatprep.subr.bf16.mxu0 %v16284_v28  ;;  %15921 = vmatprep.subr.bf16.mxu1 %v16316_v29 }
 0x108   :  { %15859 = vmatpush1.bf16.msra.mxu0 %v16285_v18  ;;  %15923 = vmatpush1.bf16.msra.mxu1 %v16317_v30 }
 0x109   :  { %15861 = vmatprep.subr.bf16.mxu0 %v16286_v32  ;;  %15925 = vmatprep.subr.bf16.mxu1 %v16318_v33 }
 0x10c   :  { %15863 = vmatpush1.bf16.msra.mxu0 %v16287_v36  ;;  %15927 = vmatpush1.bf16.msra.mxu1 %v16319_v37 }
 0x10d   :  { %15865 = vmatprep.subr.bf16.mxu0 %v16288_v38  ;;  %15929 = vmatprep.subr.bf16.mxu1 %v16320_v39 }
 0x110   :  { %15867 = vmatpush1.bf16.msra.mxu0 %v16289_v45  ;;  %15931 = vmatpush1.bf16.msra.mxu1 %v16321_v46 }
 0x111   :  { %15869 = vmatprep.subr.bf16.mxu0 %v16290_v47  ;;  %15933 = vmatprep.subr.bf16.mxu1 %v16322_v48 }
 0x114   :  { %15871 = vmatpush1.bf16.msra.mxu0 %v16291_v58  ;;  %15935 = vmatpush1.bf16.msra.mxu1 %v16323_v60 }
 0x115   :  { %15873 = vmatprep.subr.bf16.mxu0 %v16292_v63  ;;  %15937 = vmatprep.subr.bf16.mxu1 %v16324_v50 }
 0x118   :  { %15875 = vmatpush1.bf16.msra.mxu0 %v16293_v7  ;;  %15939 = vmatpush1.bf16.msra.mxu1 %v16325_v10 }
 0x119   :  { %15877 = vmatprep.subr.bf16.mxu0 %v16294_v11  ;;  %15941 = vmatprep.subr.bf16.mxu1 %v16326_v3 }
 0x11c   :  { %15879 = vmatpush1.bf16.msra.mxu0 %v16295_v13  ;;  %15943 = vmatpush1.bf16.msra.mxu1 %v16327_v15 }
 0x11f   :  { %1187 = vmatmul.mubr.f32.vlgmr.msra.gmra.mrb[8].mxu0 %v16575_v9  ;;  %1270 = vmatmul.mubr.f32.vlgmr.msra.gmra.mrb[8].mxu1 %v16575_v9  ;;  %v16388_v9 = vmov 1966171168  }
 0x120   :  { %1192 = vmatprep.mubr.f32.mxu0 %v16592_v61  ;;  %1275 = vmatprep.mubr.f32.mxu1 %v16592_v61  ;;  %v1305_v16 = vunpack.c.l.s4 %v16388_v9 }
 0x122   :  { %v1306_v17 = vunpack.c.0.s8 %v1305_v16 }
 0x123   :  { %1193 = vmatmul.mubr.f32.gmra.mrb[10].mxu0 %v16594_v62  ;;  %1276 = vmatmul.mubr.f32.gmra.mrb[10].mxu1 %v16594_v62 }
 0x124   :  { %1198 = vmatprep.mubr.f32.mxu0 %v16596_v51  ;;  %1281 = vmatprep.mubr.f32.mxu1 %v16596_v51  ;;  %v16623_v19 = vsub.s32 %v1306_v17, %v16469_v2 }
 0x127   :  { %1199 = vmatmul.mubr.f32.gmra.mrb[12].mxu0 %v16598_v52  ;;  %1282 = vmatmul.mubr.f32.gmra.mrb[12].mxu1 %v16598_v52 }
 0x128   :  { %2331 = vmatprep.mubr.f32.mxu0 %v20118_v1  ;;  %2402 = vmatprep.mubr.f32.mxu1 %v20118_v1 }
 0x1b2   :  { %v1022_v61 = vpop.f32.mrb[2].mxu0  ;;  %v1105_v14 = vpop.f32.mrb[2].mxu1 }
 0x1b3   :  { %v1024_v62 = vpop.f32.mrb[3].mxu0  ;;  %v1107_v20 = vpop.f32.mrb[3].mxu1 }
 0x1b4   :  { %v1296_v21 = vcombine.low %v1022_v61, %v1024_v62  ;;  %v1297_v51 = vcombine.high %v1022_v61, %v1024_v62  ;;  %v1298_v22 = vcombine.low %v1105_v14, %v1107_v20  ;;  %v1299_v23 = vcombine.high %v1105_v14, %v1107_v20 }
 0x1b6   :  { %v1310_v52 = vrot.slane %v1296_v21, %v16623_v19  ;;  %v1317_v25 = vrot.slane %v1297_v51, %v16623_v19  ;;  %v1324_v59 = vrot.slane %v1298_v22, %v16623_v19  ;;  %v1331_v27 = vrot.slane %v1299_v23, %v16623_v19 }
 0x1b8   :  { %v1360_v8 = vcombine.low %v1310_v52, %v1324_v59  ;;  %v1361_v28 = vcombine.high %v1310_v52, %v1324_v59  ;;  %v1362_v29 = vcombine.low %v1317_v25, %v1331_v27  ;;  %v1363_v12 = vcombine.high %v1317_v25, %v1331_v27 }
 0x1ba   :  { %v1374_v2 = vrot.slane %v1360_v8, %v16623_v19  ;;  %v1381_v26 = vrot.slane %v1362_v29, %v16623_v19  ;;  %v1388_v31 = vrot.slane %v1361_v28, %v16623_v19  ;;  %v1395_v40 = vrot.slane %v1363_v12, %v16623_v19 }
 0x1bc   :  { %v1871_v18 = vrot.slane %v1374_v2, %v16623_v19  ;;  %v1885_v30 = vrot.slane %v1381_v26, %v16623_v19  ;;  %v1937_v32 = vrot.slane %v1388_v31, %v16623_v19  ;;  %v1944_v33 = vrot.slane %v1395_v40, %v16623_v19 }
 0x1be   :  { %v1893_v4 = vcombine.low %v1871_v18, %v1885_v30  ;;  %v1894_v5 = vcombine.high %v1871_v18, %v1885_v30  ;;  %v1945_v34 = vcombine.low %v1937_v32, %v1944_v33  ;;  %v1946_v35 = vcombine.high %v1937_v32, %v1944_v33 }
 0x1c0   :  { %v16638_v36 = vrot.slane %v1893_v4, %v16623_v19  ;;  %v16641_v37 = vrot.slane %v1894_v5, %v16623_v19  ;;  %v16648_v38 = vrot.slane %v1945_v34, %v16623_v19  ;;  %v16651_v39 = vrot.slane %v1946_v35, %v16623_v19 }
 0x1c2   :  { %20396 = vst [vmem:[#allocation5_spill] sm:$0xff] %v16638_v36  ;;  %20397 = vst [vmem:[#allocation6_spill] sm:$0xff] %v16641_v37  ;;  %2105 = vrot.lane.b32.xlu1 %v16641_v37, %s16382_s24  ;;  %2103 = vrot.lane.b32.xlu0 %v16638_v36, %s16382_s24 }
 0x1c3   :  { %20398 = vst [vmem:[#allocation7_spill] sm:$0xff] %v16648_v38 }
 0x1c6   :  { %2121 = vrot.lane.b32.xlu1 %v16651_v39, %s16382_s24  ;;  %2119 = vrot.lane.b32.xlu0 %v16648_v38, %s16382_s24 }
 0x1ca   :  { %1974 = vrot.lane.b32.xlu1 %v16641_v37, %s16389_s2  ;;  %1972 = vrot.lane.b32.xlu0 %v16638_v36, %s16389_s2  ;;  %v1028_v41 = vpop.f32.mrb[4].mxu0  ;;  %v1111_v42 = vpop.f32.mrb[4].mxu1 }
 0x1cb   :  { %v1113_v43 = vpop.f32.mrb[5].mxu1  ;;  %v1030_v44 = vpop.f32.mrb[5].mxu0 }
 0x1cc   :  { %v1450_v45 = vcombine.low %v1111_v42, %v1113_v43  ;;  %v1451_v46 = vcombine.high %v1111_v42, %v1113_v43  ;;  %v1448_v47 = vcombine.low %v1028_v41, %v1030_v44  ;;  %v1449_v48 = vcombine.high %v1028_v41, %v1030_v44 }
 0x1ce   :  { %1990 = vrot.lane.b32.xlu1 %v16651_v39, %s16389_s2  ;;  %1988 = vrot.lane.b32.xlu0 %v16648_v38, %s16389_s2  ;;  %v1476_v49 = vrot.slane %v1450_v45, %v16623_v19  ;;  %v1483_v53 = vrot.slane %v1451_v46, %v16623_v19  ;;  %v1462_v56 = vrot.slane %v1448_v47, %v16623_v19  ;;  %v1034_v24 = vpop.f32.mrb[6].mxu0  ;;  %v1117_v58 = vpop.f32.mrb[6].mxu1 }
 0x1cf   :  { %v1469_v60 = vrot.slane %v1449_v48, %v16623_v19  ;;  %v1036_v63 = vpop.f32.mrb[7].mxu0  ;;  %v1119_v50 = vpop.f32.mrb[7].mxu1  ;;  %v16731_v48 = vcombine.high %v16638_v36, %v16638_v36 }
 0x1d0   :  { %v1512_v54 = vcombine.low %v1462_v56, %v1476_v49  ;;  %v1513_v55 = vcombine.high %v1462_v56, %v1476_v49  ;;  %v1584_v57 = vcombine.low %v1034_v24, %v1036_v63  ;;  %v1585_v6 = vcombine.high %v1034_v24, %v1036_v63 }
 0x1d1   :  { %v1514_v7 = vcombine.low %v1469_v60, %v1483_v53  ;;  %v1515_v10 = vcombine.high %v1469_v60, %v1483_v53  ;;  %v1586_v11 = vcombine.low %v1117_v58, %v1119_v50  ;;  %v1587_v3 = vcombine.high %v1117_v58, %v1119_v50  ;;  %20407 = vst [vmem:[#allocation16_spill] sm:$0xff] %v16731_v48 }
 0x1d2   :  { %3457 = vrot.lane.b32.xlu1 %v16638_v36, %s16390_s7  ;;  %3459 = vrot.lane.b32.xlu0 %v16641_v37, %s16390_s7  ;;  %v1526_v13 = vrot.slane %v1512_v54, %v16623_v19  ;;  %v1540_v15 = vrot.slane %v1513_v55, %v16623_v19  ;;  %v1598_v9 = vrot.slane %v1584_v57, %v16623_v19 }
 0x1d3   :  { %v1533_v16 = vrot.slane %v1514_v7, %v16623_v19  ;;  %v1547_v17 = vrot.slane %v1515_v10, %v16623_v19  ;;  %v1605_v61 = vrot.slane %v1585_v6, %v16623_v19  ;;  %v1612_v14 = vrot.slane %v1586_v11, %v16623_v19 }
 0x1d4   :  { %v1619_v62 = vrot.slane %v1587_v3, %v16623_v19  ;;  %v14941_v20 = vrot.slane %v1526_v13, %v16623_v19  ;;  %v15077_v21 = vrot.slane %v1540_v15, %v16623_v19  ;;  %v16755_v54 = vcombine.high %v16641_v37, %v16641_v37 }
 0x1d5   :  { %v1648_v51 = vcombine.low %v1598_v9, %v1612_v14  ;;  %v1649_v22 = vcombine.high %v1598_v9, %v1612_v14  ;;  %v14955_v23 = vrot.slane %v1533_v16, %v16623_v19  ;;  %v15091_v52 = vrot.slane %v1547_v17, %v16623_v19 }
 0x1d6   :  { %3475 = vrot.lane.b32.xlu1 %v16651_v39, %s16390_s7  ;;  %3473 = vrot.lane.b32.xlu0 %v16648_v38, %s16390_s7  ;;  %v1650_v25 = vcombine.low %v1605_v61, %v1619_v62  ;;  %v1651_v59 = vcombine.high %v1605_v61, %v1619_v62  ;;  %20408 = vst [vmem:[#allocation17_spill] sm:$0xff] %v16755_v54 }
 0x1d7   :  { %v1662_v27 = vrot.slane %v1648_v51, %v16623_v19  ;;  %v1676_v8 = vrot.slane %v1649_v22, %v16623_v19  ;;  %v14991_v28 = vcombine.low %v14941_v20, %v14955_v23  ;;  %v14992_v29 = vcombine.high %v14941_v20, %v14955_v23 }
 0x1d8   :  { %v1669_v12 = vrot.slane %v1650_v25, %v16623_v19  ;;  %v1683_v2 = vrot.slane %v1651_v59, %v16623_v19  ;;  %v15127_v26 = vcombine.low %v15077_v21, %v15091_v52  ;;  %v15128_v31 = vcombine.high %v15077_v21, %v15091_v52 }
 0x1d9   :  { %v14969_v40 = vrot.slane %v1662_v27, %v16623_v19  ;;  %v15105_v18 = vrot.slane %v1676_v8, %v16623_v19  ;;  %v16702_v4 = vrot.slane %v14991_v28, %v16623_v19  ;;  %v16705_v35 = vrot.slane %v14992_v29, %v16623_v19 }
 0x1da   :  { %4224 = vrot.lane.b32.xlu1 %v16638_v36, %s16391_s14  ;;  %4226 = vrot.lane.b32.xlu0 %v16641_v37, %s16391_s14  ;;  %v14983_v30 = vrot.slane %v1669_v12, %v16623_v19  ;;  %v15119_v32 = vrot.slane %v1683_v2, %v16623_v19  ;;  %v16708_v41 = vrot.slane %v15127_v26, %v16623_v19 }
 0x1db   :  { %20399 = vst [vmem:[#allocation8_spill] sm:$0xff] %v16702_v4  ;;  %20400 = vst [vmem:[#allocation9_spill] sm:$0xff] %v16705_v35  ;;  %v16721_v45 = vrot.slane %v15128_v31, %v16623_v19  ;;  %v16759_v55 = vcombine.high %v16648_v38, %v16648_v38  ;;  %v16767_v57 = vcombine.high %v16651_v39, %v16651_v39 }
 0x1dc   :  { %v14995_v33 = vcombine.low %v14969_v40, %v14983_v30  ;;  %v14996_v5 = vcombine.high %v14969_v40, %v14983_v30  ;;  %v15131_v34 = vcombine.low %v15105_v18, %v15119_v32  ;;  %20401 = vst [vmem:[#allocation10_spill] sm:$0xff] %v16708_v41  ;;  %v15132_v42 = vcombine.high %v15105_v18, %v15119_v32 }
 0x1dd   :  { %20404 = vst [vmem:[#allocation13_spill] sm:$0xff] %v16721_v45 }
 0x1de   :  { %4242 = vrot.lane.b32.xlu1 %v16651_v39, %s16391_s14  ;;  %4240 = vrot.lane.b32.xlu0 %v16648_v38, %s16391_s14  ;;  %v16715_v43 = vrot.slane %v14995_v33, %v16623_v19  ;;  %v16718_v44 = vrot.slane %v14996_v5, %v16623_v19  ;;  %v16724_v46 = vrot.slane %v15131_v34, %v16623_v19 }
 0x1df   :  { %v16727_v47 = vrot.slane %v15132_v42, %v16623_v19 }
 0x1e0   :  { %20402 = vst [vmem:[#allocation11_spill] sm:$0xff] %v16715_v43  ;;  %20403 = vst [vmem:[#allocation12_spill] sm:$0xff] %v16718_v44  ;;  %v20432_v43 = vlaneseq }
 0x1e1   :  { %20405 = vst [vmem:[#allocation14_spill] sm:$0xff] %v16724_v46  ;;  %20406 = vst [vmem:[#allocation15_spill] sm:$0xff] %v16727_v47 }
 0x1e2   :  { %5595 = vrot.lane.b32.xlu1 %v16641_v37, %s16392_s15  ;;  %2107 = vrot.lane.b32.xlu0 %v16731_v48, %s16382_s24  ;;  %v17146_v4 = vand.u32 127, %v20432_v43  ;;  %v20437_v43 = vmov 0 }
 0x1e4   :  { %20433 = vst [vmem:[#allocation41_spill] sm:$0xff] %v17146_v4 }
 0x1e6   :  { %2109 = vrot.lane.b32.xlu1 %v16755_v54, %s16382_s24  ;;  %2123 = vrot.lane.b32.xlu0 %v16759_v55, %s16382_s24 }
 0x1ea   :  { %2125 = vrot.lane.b32.xlu1 %v16767_v57, %s16382_s24  ;;  %1976 = vrot.lane.b32.xlu0 %v16731_v48, %s16389_s2 }
 0x1ee   :  { %1978 = vrot.lane.b32.xlu1 %v16755_v54, %s16389_s2  ;;  %1992 = vrot.lane.b32.xlu0 %v16759_v55, %s16389_s2 }
 0x1f2   :  { %v1188_v6 = vpop.f32.mrb[8].mxu0  ;;  %v1271_v7 = vpop.f32.mrb[8].mxu1  ;;  %1994 = vrot.lane.b32.xlu1 %v16767_v57, %s16389_s2  ;;  %3461 = vrot.lane.b32.xlu0 %v16731_v48, %s16390_s7 }
 0x1f3   :  { %v1273_v10 = vpop.f32.mrb[9].mxu1  ;;  %v1190_v11 = vpop.f32.mrb[9].mxu0 }
 0x1f4   :  { %v1302_v3 = vcombine.low %v1271_v7, %v1273_v10  ;;  %v1303_v13 = vcombine.high %v1271_v7, %v1273_v10  ;;  %v1300_v15 = vcombine.low %v1188_v6, %v1190_v11  ;;  %v1301_v9 = vcombine.high %v1188_v6, %v1190_v11 }
 0x1f6   :  { %v1352_v16 = vrot.slane %v1302_v3, %v16623_v19  ;;  %v1359_v17 = vrot.slane %v1303_v13, %v16623_v19  ;;  %v1338_v61 = vrot.slane %v1300_v15, %v16623_v19  ;;  %v1345_v14 = vrot.slane %v1301_v9, %v16623_v19  ;;  %v1194_v62 = vpop.f32.mrb[10].mxu0  ;;  %v1277_v20 = vpop.f32.mrb[10].mxu1  ;;  %3463 = vrot.lane.b32.xlu1 %v16755_v54, %s16390_s7 }
 0x1f7   :  { %v1279_v21 = vpop.f32.mrb[11].mxu1  ;;  %3477 = vrot.lane.b32.xlu0 %v16759_v55, %s16390_s7  ;;  %v1196_v51 = vpop.f32.mrb[11].mxu0 }
 0x1f8   :  { %v1364_v22 = vcombine.low %v1338_v61, %v1352_v16  ;;  %v1365_v23 = vcombine.high %v1338_v61, %v1352_v16  ;;  %v1366_v52 = vcombine.low %v1345_v14, %v1359_v17  ;;  %v1367_v25 = vcombine.high %v1345_v14, %v1359_v17 }
 0x1f9   :  { %v1454_v59 = vcombine.low %v1277_v20, %v1279_v21  ;;  %v1455_v27 = vcombine.high %v1277_v20, %v1279_v21  ;;  %v1452_v8 = vcombine.low %v1194_v62, %v1196_v51  ;;  %v1453_v28 = vcombine.high %v1194_v62, %v1196_v51 }
 0x1fa   :  { %v1402_v29 = vrot.slane %v1364_v22, %v16623_v19  ;;  %v1409_v12 = vrot.slane %v1366_v52, %v16623_v19  ;;  %v1416_v2 = vrot.slane %v1365_v23, %v16623_v19  ;;  %v1423_v26 = vrot.slane %v1367_v25, %v16623_v19  ;;  %v1200_v31 = vpop.f32.mrb[12].mxu0  ;;  %v1283_v40 = vpop.f32.mrb[12].mxu1  ;;  %3479 = vrot.lane.b32.xlu1 %v16767_v57, %s16390_s7 }
 0x1fb   :  { %v1504_v18 = vrot.slane %v1454_v59, %v16623_v19  ;;  %v1511_v30 = vrot.slane %v1455_v27, %v16623_v19  ;;  %v1490_v32 = vrot.slane %v1452_v8, %v16623_v19  ;;  %v1497_v33 = vrot.slane %v1453_v28, %v16623_v19  ;;  %v1285_v5 = vpop.f32.mrb[13].mxu1  ;;  %4228 = vrot.lane.b32.xlu0 %v16731_v48, %s16391_s14  ;;  %v1202_v34 = vpop.f32.mrb[13].mxu0 }
 0x1fc   :  { %v1841_v42 = vrot.slane %v1416_v2, %v16623_v19  ;;  %v1848_v6 = vrot.slane %v1423_v26, %v16623_v19  ;;  %v1878_v7 = vrot.slane %v1402_v29, %v16623_v19  ;;  %v1892_v10 = vrot.slane %v1409_v12, %v16623_v19 }
 0x1fd   :  { %v1516_v11 = vcombine.low %v1490_v32, %v1504_v18  ;;  %v1517_v3 = vcombine.high %v1490_v32, %v1504_v18  ;;  %v1518_v13 = vcombine.low %v1497_v33, %v1511_v30  ;;  %v1519_v15 = vcombine.high %v1497_v33, %v1511_v30 }
 0x1fe   :  { %v1849_v9 = vcombine.high %v1841_v42, %v1848_v6  ;;  %v1895_v16 = vcombine.low %v1878_v7, %v1892_v10  ;;  %v1896_v17 = vcombine.high %v1878_v7, %v1892_v10  ;;  %v1947_v61 = vcombine.low %v1841_v42, %v1848_v6  ;;  %4230 = vrot.lane.b32.xlu1 %v16755_v54, %s16391_s14 }
 0x1ff   :  { %4244 = vrot.lane.b32.xlu0 %v16759_v55, %s16391_s14  ;;  %v1590_v14 = vcombine.low %v1283_v40, %v1285_v5  ;;  %v1591_v62 = vcombine.high %v1283_v40, %v1285_v5  ;;  %v1588_v20 = vcombine.low %v1200_v31, %v1202_v34  ;;  %v1589_v21 = vcombine.high %v1200_v31, %v1202_v34 }
 0x200   :  { %v16818_v25 = vrot.slane %v1895_v16, %v16623_v19  ;;  %v16821_v59 = vrot.slane %v1896_v17, %v16623_v19  ;;  %v1554_v27 = vrot.slane %v1516_v11, %v16623_v19  ;;  %v1561_v2 = vrot.slane %v1518_v13, %v16623_v19 }
 0x201   :  { %v1640_v51 = vrot.slane %v1590_v14, %v16623_v19  ;;  %v1647_v22 = vrot.slane %v1591_v62, %v16623_v19  ;;  %v1626_v23 = vrot.slane %v1588_v20, %v16623_v19  ;;  %v1633_v52 = vrot.slane %v1589_v21, %v16623_v19 }
 0x202   :  { %4246 = vrot.lane.b32.xlu1 %v16767_v57, %s16391_s14  ;;  %20409 = vst [vmem:[#allocation18_spill] sm:$0xff] %v16818_v25  ;;  %20410 = vst [vmem:[#allocation19_spill] sm:$0xff] %v16821_v59  ;;  %v1568_v26 = vrot.slane %v1517_v3, %v16623_v19  ;;  %v1575_v31 = vrot.slane %v1519_v15, %v16623_v19  ;;  %v16835_v32 = vrot.slane %v1849_v9, %v16623_v19 }
 0x203   :  { %5597 = vrot.lane.b32.xlu0 %v16731_v48, %s16392_s15  ;;  %v1652_v8 = vcombine.low %v1626_v23, %v1640_v51  ;;  %v1653_v28 = vcombine.high %v1626_v23, %v1640_v51  ;;  %v1654_v29 = vcombine.low %v1633_v52, %v1647_v22  ;;  %v1655_v12 = vcombine.high %v1633_v52, %v1647_v22 }
 0x204   :  { %v14948_v33 = vrot.slane %v1554_v27, %v16623_v19  ;;  %v16839_v5 = vrot.slane %v1947_v61, %v16623_v19  ;;  %v14962_v42 = vrot.slane %v1561_v2, %v16623_v19  ;;  %v15084_v10 = vrot.slane %v1568_v26, %v16623_v19 }
 0x205   :  { %v1690_v40 = vrot.slane %v1652_v8, %v16623_v19  ;;  %v1697_v18 = vrot.slane %v1654_v29, %v16623_v19  ;;  %v1704_v30 = vrot.slane %v1653_v28, %v16623_v19  ;;  %v1711_v34 = vrot.slane %v1655_v12, %v16623_v19  ;;  %v17036_v28 = vld [vmem:[%s20112_s5 + $0x8] sm:$0xff] }
 0x206   :  { %2113 = vrot.lane.b32.xlu1 %v16821_v59, %s16382_s24  ;;  %v15098_v11 = vrot.slane %v1575_v31, %v16623_v19  ;;  %v14993_v13 = vcombine.low %v14948_v33, %v14962_v42  ;;  %v14994_v9 = vcombine.high %v14948_v33, %v14962_v42  ;;  %v16927_v33 = vcombine.high %v16818_v25, %v16818_v25 }
 0x207   :  { %2111 = vrot.lane.b32.xlu0 %v16818_v25, %s16382_s24  ;;  %v14976_v6 = vrot.slane %v1690_v40, %v16623_v19  ;;  %v14990_v7 = vrot.slane %v1697_v18, %v16623_v19  ;;  %v15112_v3 = vrot.slane %v1704_v30, %v16623_v19  ;;  %v15126_v17 = vrot.slane %v1711_v34, %v16623_v19 }
 0x208   :  { %v15129_v61 = vcombine.low %v15084_v10, %v15098_v11  ;;  %v16856_v14 = vrot.slane %v14993_v13, %v16623_v19  ;;  %v15130_v20 = vcombine.high %v15084_v10, %v15098_v11  ;;  %v16864_v21 = vrot.slane %v14994_v9, %v16623_v19  ;;  %20419 = vst [vmem:[#allocation28_spill] sm:$0xff] %v16927_v33 }
 0x209   :  { %v14997_v15 = vcombine.low %v14976_v6, %v14990_v7  ;;  %v14998_v16 = vcombine.high %v14976_v6, %v14990_v7  ;;  %v15133_v22 = vcombine.low %v15112_v3, %v15126_v17  ;;  %v15134_v27 = vcombine.high %v15112_v3, %v15126_v17 }
 0x20a   :  { %2129 = vrot.lane.b32.xlu1 %v16835_v32, %s16382_s24  ;;  %20411 = vst [vmem:[#allocation20_spill] sm:$0xff] %v16856_v14  ;;  %20413 = vst [vmem:[#allocation22_spill] sm:$0xff] %v16864_v21  ;;  %v16878_v29 = vrot.slane %v15129_v61, %v16623_v19  ;;  %v16886_v2 = vrot.slane %v15130_v20, %v16623_v19  ;;  %v16935_v34 = vcombine.high %v16821_v59, %v16821_v59 }
 0x20b   :  { %2127 = vrot.lane.b32.xlu0 %v16839_v5, %s16382_s24  ;;  %v16859_v62 = vrot.slane %v14997_v15, %v16623_v19  ;;  %v16867_v51 = vrot.slane %v14998_v16, %v16623_v19  ;;  %v16881_v12 = vrot.slane %v15133_v22, %v16623_v19  ;;  %v16889_v26 = vrot.slane %v15134_v27, %v16623_v19 }
 0x20c   :  { %20415 = vst [vmem:[#allocation24_spill] sm:$0xff] %v16878_v29  ;;  %20417 = vst [vmem:[#allocation26_spill] sm:$0xff] %v16886_v2  ;;  %v16919_v19 = vcombine.high %v16835_v32, %v16835_v32  ;;  %v16943_v42 = vcombine.high %v16839_v5, %v16839_v5 }
 0x20d   :  { %20412 = vst [vmem:[#allocation21_spill] sm:$0xff] %v16859_v62  ;;  %20414 = vst [vmem:[#allocation23_spill] sm:$0xff] %v16867_v51 }
 0x20e   :  { %1982 = vrot.lane.b32.xlu1 %v16821_v59, %s16389_s2  ;;  %20416 = vst [vmem:[#allocation25_spill] sm:$0xff] %v16881_v12  ;;  %20418 = vst [vmem:[#allocation27_spill] sm:$0xff] %v16889_v26 }
 0x20f   :  { %1980 = vrot.lane.b32.xlu0 %v16818_v25, %s16389_s2  ;;  %20420 = vst [vmem:[#allocation29_spill] sm:$0xff] %v16935_v34 }
 0x212   :  { %1998 = vrot.lane.b32.xlu1 %v16835_v32, %s16389_s2 }
 0x213   :  { %1996 = vrot.lane.b32.xlu0 %v16839_v5, %s16389_s2 }
 0x216   :  { %3467 = vrot.lane.b32.xlu1 %v16821_v59, %s16390_s7 }
 0x217   :  { %3465 = vrot.lane.b32.xlu0 %v16818_v25, %s16390_s7 }
 0x21a   :  { %3483 = vrot.lane.b32.xlu1 %v16835_v32, %s16390_s7 }
 0x21b   :  { %3481 = vrot.lane.b32.xlu0 %v16839_v5, %s16390_s7 }
 0x21e   :  { %4234 = vrot.lane.b32.xlu1 %v16821_v59, %s16391_s14 }
 0x21f   :  { %4232 = vrot.lane.b32.xlu0 %v16818_v25, %s16391_s14 }
 0x222   :  { %4250 = vrot.lane.b32.xlu1 %v16835_v32, %s16391_s14 }
 0x223   :  { %4248 = vrot.lane.b32.xlu0 %v16839_v5, %s16391_s14 }
 0x226   :  { %2100 = vrot.lane.b32.xlu1 %v16919_v19, %s16382_s24 }
 0x227   :  { %5599 = vrot.lane.b32.xlu0 %v16755_v54, %s16392_s15 }
 0x22a   :  { %5593 = vrot.lane.b32.xlu1 %v16638_v36, %s16392_s15 }
 0x22b   :  { %2115 = vrot.lane.b32.xlu0 %v16927_v33, %s16382_s24 }
 0x22e   :  { %2117 = vrot.lane.b32.xlu1 %v16935_v34, %s16382_s24 }
 0x22f   :  { %5603 = vrot.lane.b32.xlu0 %v16821_v59, %s16392_s15 }
 0x232   :  { %5601 = vrot.lane.b32.xlu1 %v16818_v25, %s16392_s15 }
 0x233   :  { %2131 = vrot.lane.b32.xlu0 %v16943_v42, %s16382_s24 }
 0x234   :  { %v2106_v6 = vpop.permute.xlu1 %2105  ;;  %v16949_v7 = vpop.permute.xlu0 %2103 }
 0x235   :  { %v2134_v10 = vsel %vm20190_vm2, %v16949_v7, %v2106_v6 }
 0x236   :  { %15285 = vmatprep.subr.msk.mxu0 %vm20191_vm0, %v2134_v10  ;;  %1858 = vrot.lane.b32.xlu1 %v16919_v19, %s16389_s2 }
 0x237   :  { %5611 = vrot.lane.b32.xlu0 %v16651_v39, %s16392_s15 }
 0x238   :  { %v16958_v11 = vpop.permute.xlu1 %2121  ;;  %v16960_v3 = vpop.permute.xlu0 %2119 }
 0x23a   :  { %5609 = vrot.lane.b32.xlu1 %v16648_v38, %s16392_s15 }
 0x23b   :  { %1984 = vrot.lane.b32.xlu0 %v16927_v33, %s16389_s2 }
 0x23c   :  { %v16966_v13 = vpop.permute.xlu1 %1974  ;;  %v16968_v15 = vpop.permute.xlu0 %1972 }
 0x23e   :  { %1986 = vrot.lane.b32.xlu1 %v16935_v34, %s16389_s2 }
 0x23f   :  { %5615 = vrot.lane.b32.xlu0 %v16767_v57, %s16392_s15 }
 0x240   :  { %v16974_v9 = vpop.permute.xlu1 %1990  ;;  %v16976_v16 = vpop.permute.xlu0 %1988 }
 0x242   :  { %5613 = vrot.lane.b32.xlu1 %v16759_v55, %s16392_s15 }
 0x243   :  { %2000 = vrot.lane.b32.xlu0 %v16943_v42, %s16389_s2 }
 0x244   :  { %v16982_v17 = vpop.permute.xlu1 %3457  ;;  %v16984_v61 = vpop.permute.xlu0 %3459 }
 0x246   :  { %3454 = vrot.lane.b32.xlu1 %v16919_v19, %s16390_s7 }
 0x247   :  { %5619 = vrot.lane.b32.xlu0 %v16835_v32, %s16392_s15 }
 0x248   :  { %v16990_v20 = vpop.permute.xlu1 %3475  ;;  %v16992_v22 = vpop.permute.xlu0 %3473 }
 0x24a   :  { %5617 = vrot.lane.b32.xlu1 %v16839_v5, %s16392_s15 }
 0x24b   :  { %3469 = vrot.lane.b32.xlu0 %v16927_v33, %s16390_s7 }
 0x24c   :  { %v16998_v27 = vpop.permute.xlu1 %4224  ;;  %v17000_v10 = vpop.permute.xlu0 %4226 }
 0x24d   :  { %20421 = vst [vmem:[#allocation30_spill] sm:$0xff] %v16998_v27  ;;  %20422 = vst [vmem:[#allocation31_spill] sm:$0xff] %v17000_v10  ;;  %v20459_v27 = vmov 0  ;;  %v17281_v10 = vadd.s32 1152, %v17146_v4 }
 0x24e   :  { %3471 = vrot.lane.b32.xlu1 %v16935_v34, %s16390_s7 }
 0x24f   :  { %6348 = vrot.lane.b32.xlu0 %v16731_v48, %s16393_s16  ;;  %20462 = vst [vmem:[#allocation59_spill] sm:$0xff] %v17281_v10 }
 0x250   :  { %v17006_v30 = vpop.permute.xlu1 %4242  ;;  %v17008_v40 = vpop.permute.xlu0 %4240 }
 0x251   :  { %20423 = vst [vmem:[#allocation32_spill] sm:$0xff] %v17006_v30  ;;  %20424 = vst [vmem:[#allocation33_spill] sm:$0xff] %v17008_v40  ;;  %v17168_v40 = vadd.s32 1024, %v17146_v4 }
 0x252   :  { %6346 = vrot.lane.b32.xlu1 %v16641_v37, %s16393_s16 }
 0x253   :  { %3485 = vrot.lane.b32.xlu0 %v16943_v42, %s16390_s7  ;;  %20440 = vst [vmem:[#allocation46_spill] sm:$0xff] %v17168_v40 }
 0x254   :  { %v17014_v18 = vpop.permute.xlu1 %5595  ;;  %v2108_v31 = vpop.permute.xlu0 %2107 }
 0x255   :  { %20425 = vst [vmem:[#allocation34_spill] sm:$0xff] %v17014_v18  ;;  %v2135_v58 = vsel %vm20190_vm2, %v2106_v6, %v2108_v31 }
 0x256   :  { %4221 = vrot.lane.b32.xlu1 %v16919_v19, %s16391_s14 }
 0x257   :  { %6350 = vrot.lane.b32.xlu0 %v16755_v54, %s16393_s16 }
 0x258   :  { %v17020_v50 = vpop.permute.xlu1 %2109  ;;  %v17022_v63 = vpop.permute.xlu0 %2123 }
 0x259   :  { %v2136_v60 = vsel %vm20190_vm2, %v2108_v31, %v17020_v50 }
 0x25a   :  { %15288 = vmatprep.subr.msk.mxu1 %vm20191_vm0, %v2136_v60  ;;  %6344 = vrot.lane.b32.xlu1 %v16638_v36, %s16393_s16 }
 0x25b   :  { %4236 = vrot.lane.b32.xlu0 %v16927_v33, %s16391_s14  ;;  %15289 = vmatpush1.msk.msra.mxu1 %vm20191_vm0, %v2135_v58 }
 0x25c   :  { %v17038_v52 = vpop.permute.xlu1 %2125  ;;  %v17040_v8 = vpop.permute.xlu0 %1976  ;;  %15290 = vmatmul.mubr.msk.f32.vlgmr.msra.gmra.mrb[14].mxu1 %vm20193_vm1, %v17036_v28 }
 0x25d   :  { %2544 = vmatprep.mubr.f32.mxu1 %v20118_v1 }
 0x25e   :  { %4238 = vrot.lane.b32.xlu1 %v16935_v34, %s16391_s14 }
 0x25f   :  { %6354 = vrot.lane.b32.xlu0 %v16821_v59, %s16393_s16 }
 0x260   :  { %v17049_v58 = vpop.permute.xlu1 %1978  ;;  %v17051_v60 = vpop.permute.xlu0 %1992 }
 0x262   :  { %6352 = vrot.lane.b32.xlu1 %v16818_v25, %s16393_s16 }
 0x263   :  { %4252 = vrot.lane.b32.xlu0 %v16943_v42, %s16391_s14 }
 0x264   :  { %v17057_v31 = vpop.permute.xlu1 %1994  ;;  %v17059_v6 = vpop.permute.xlu0 %3461 }
 0x266   :  { %6360 = vrot.lane.b32.xlu1 %v16648_v38, %s16393_s16 }
 0x267   :  { %6362 = vrot.lane.b32.xlu0 %v16651_v39, %s16393_s16 }
 0x268   :  { %v17065_v23 = vpop.permute.xlu1 %3463 }
 0x269   :  { %v17067_v24 = vpop.permute.xlu0 %3477 }
 0x26a   :  { %6364 = vrot.lane.b32.xlu1 %v16759_v55, %s16393_s16 }
 0x26b   :  { %6366 = vrot.lane.b32.xlu0 %v16767_v57, %s16393_s16 }
 0x26c   :  { %v17073_v56 = vpop.permute.xlu1 %3479 }
 0x26d   :  { %v17075_v53 = vpop.permute.xlu0 %4228 }
 0x26e   :  { %20426 = vst [vmem:[#allocation35_spill] sm:$0xff] %v17075_v53  ;;  %6368 = vrot.lane.b32.xlu1 %v16839_v5, %s16393_s16 }
 0x26f   :  { %6370 = vrot.lane.b32.xlu0 %v16835_v32, %s16393_s16 }
 0x270   :  { %v17081_v49 = vpop.permute.xlu1 %4230 }
 0x271   :  { %20427 = vst [vmem:[#allocation36_spill] sm:$0xff] %v17081_v49  ;;  %v17083_v1 = vpop.permute.xlu0 %4244  ;;  %v20444_v49 = vmov 0.0  }
 0x272   :  { %20428 = vst [vmem:[#allocation37_spill] sm:$0xff] %v17083_v1  ;;  %7113 = vrot.lane.b32.xlu1 %v16641_v37, %s16394_s19 }
 0x273   :  { %7115 = vrot.lane.b32.xlu0 %v16731_v48, %s16394_s19 }
 0x274   :  { %v17089_v0 = vpop.permute.xlu1 %4246 }
 0x275   :  { %20429 = vst [vmem:[#allocation38_spill] sm:$0xff] %v17089_v0  ;;  %v17091_v26 = vpop.permute.xlu0 %5597 }
 0x276   :  { %20430 = vst [vmem:[#allocation39_spill] sm:$0xff] %v17091_v26  ;;  %7111 = vrot.lane.b32.xlu1 %v16638_v36, %s16394_s19  ;;  %v1753_v26 = vand.u32 1023, %v17146_v4 }
 0x277   :  { %7117 = vrot.lane.b32.xlu0 %v16755_v54, %s16394_s19 }
 0x278   :  { %v17097_v2 = vpop.permute.xlu1 %2113  ;;  %vm17163_vm3 = vcmp.ge.s32.totalorder %v1753_v26, 32 }
 0x279   :  { %v2112_v12 = vpop.permute.xlu0 %2111  ;;  %v20438_v43 = vsel %vm17163_vm3, 4294967295, %v20437_v43 }
 0x27a   :  { %5605 = vrot.lane.b32.xlu1 %v16927_v33, %s16392_s15  ;;  %20439 = vst [vmem:[#allocation45_spill] sm:$0xff] %v20438_v43  ;;  %v2138_v26 = vsel %vm20190_vm2, %v2112_v12, %v17097_v2  ;;  %v17646_v43 = vld [vmem:[%s20112_s5 + $0x10] sm:$0xff] }
 0x27b   :  { %5607 = vrot.lane.b32.xlu0 %v16935_v34, %s16392_s15 }
 0x27c   :  { %v17103_v29 = vpop.permute.xlu1 %2129 }
 0x27d   :  { %v17105_v47 = vpop.permute.xlu0 %2127 }
 0x27e   :  { %7119 = vrot.lane.b32.xlu1 %v16818_v25, %s16394_s19 }
 0x27f   :  { %7121 = vrot.lane.b32.xlu0 %v16821_v59, %s16394_s19 }
 0x280   :  { %v17111_v45 = vpop.permute.xlu1 %1982 }
 0x281   :  { %v17113_v46 = vpop.permute.xlu0 %1980 }
 0x282   :  { %5621 = vrot.lane.b32.xlu1 %v16943_v42, %s16392_s15 }
 0x283   :  { %5623 = vrot.lane.b32.xlu0 %v16919_v19, %s16392_s15 }
 0x284   :  { %v17119_v41 = vpop.permute.xlu1 %1998 }
 0x285   :  { %v17121_v51 = vpop.permute.xlu0 %1996 }
 0x286   :  { %7127 = vrot.lane.b32.xlu1 %v16648_v38, %s16394_s19 }
 0x287   :  { %7129 = vrot.lane.b32.xlu0 %v16651_v39, %s16394_s19 }
 0x288   :  { %v17127_v21 = vpop.permute.xlu1 %3467 }
 0x289   :  { %v17129_v62 = vpop.permute.xlu0 %3465 }
 0x28a   :  { %6356 = vrot.lane.b32.xlu1 %v16927_v33, %s16393_s16 }
 0x28b   :  { %6358 = vrot.lane.b32.xlu0 %v16935_v34, %s16393_s16 }
 0x28c   :  { %v17135_v14 = vpop.permute.xlu1 %3483 }
 0x28d   :  { %v17137_v44 = vpop.permute.xlu0 %3481 }
 0x28e   :  { %7131 = vrot.lane.b32.xlu1 %v16759_v55, %s16394_s19 }
 0x28f   :  { %7133 = vrot.lane.b32.xlu0 %v16767_v57, %s16394_s19 }
 0x290   :  { %v17143_v35 = vpop.permute.xlu1 %4234 }
 0x291   :  { %20431 = vst [vmem:[#allocation40_spill] sm:$0xff] %v17143_v35  ;;  %v17148_v18 = vpop.permute.xlu0 %4232  ;;  %v1761_v35 = vand.u32 1023, %v17168_v40 }
 0x292   :  { %20434 = vst [vmem:[#allocation42_spill] sm:$0xff] %v17148_v18  ;;  %6372 = vrot.lane.b32.xlu1 %v16943_v42, %s16393_s16 }
 0x293   :  { %6374 = vrot.lane.b32.xlu0 %v16919_v19, %s16393_s16  ;;  %vm17204_vm4 = vcmp.ge.s32.totalorder %v1761_v35, 32 }
 0x294   :  { %v17155_v1 = vpop.permute.xlu1 %4250 }
 0x295   :  { %20435 = vst [vmem:[#allocation43_spill] sm:$0xff] %v17155_v1  ;;  %v17157_v0 = vpop.permute.xlu0 %4248 }
 0x296   :  { %20436 = vst [vmem:[#allocation44_spill] sm:$0xff] %v17157_v0  ;;  %7135 = vrot.lane.b32.xlu1 %v16839_v5, %s16394_s19 }
 0x297   :  { %7137 = vrot.lane.b32.xlu0 %v16835_v32, %s16394_s19 }
 0x298   :  { %v2101_v30 = vpop.permute.xlu1 %2100 }
 0x299   :  { %v2165_v18 = vsel %vm20190_vm2, %v2101_v30, %v16949_v7  ;;  %v17172_v1 = vpop.permute.xlu0 %5599  ;;  %v17185_v7 = vadd.s32 128, %v17146_v4 }
 0x29a   :  { %20441 = vst [vmem:[#allocation47_spill] sm:$0xff] %v17172_v1  ;;  %v2198_v0 = vsel %vm17163_vm3, %v2165_v18, 0.0  ;;  %7123 = vrot.lane.b32.xlu1 %v16927_v33, %s16394_s19  ;;  %v2137_v1 = vsel %vm20190_vm2, %v17020_v50, %v2112_v12  ;;  %v20445_v50 = vmov 0 }
 0x29b   :  { %7125 = vrot.lane.b32.xlu0 %v16935_v34, %s16394_s19  ;;  %15286 = vmatpush1.msk.msra.mxu0 %vm20191_vm0, %v2198_v0  ;;  %20442 = vst [vmem:[#allocation48_spill] sm:$0xff] %v17185_v7  ;;  %v2142_v0 = vsel %vm20190_vm2, %v16960_v3, %v16958_v11  ;;  %v20446_v50 = vsel %vm17204_vm4, 4294967295, %v20445_v50 }
 0x29c   :  { %15287 = vmatmul.mubr.msk.f32.vlgmr.msra.gmra.mrb[14].mxu0 %vm20193_vm1, %v17036_v28  ;;  %v17191_v18 = vpop.permute.xlu1 %5593  ;;  %15291 = vmatprep.subr.msk.mxu0 %vm20191_vm0, %v2138_v26  ;;  %20447 = vst [vmem:[#allocation50_spill] sm:$0xff] %v20446_v50  ;;  %v17212_v26 = vadd.s32 384, %v17146_v4 }
 0x29d   :  { %20443 = vst [vmem:[#allocation49_spill] sm:$0xff] %v17191_v18  ;;  %v2116_v53 = vpop.permute.xlu0 %2115  ;;  %15292 = vmatpush1.msk.msra.mxu0 %vm20191_vm0, %v2137_v1  ;;  %2473 = vmatprep.mubr.f32.mxu0 %v20444_v49 }
 0x29e   :  { %15297 = vmatprep.subr.msk.mxu0 %vm20191_vm0, %v2142_v0  ;;  %7864 = vrot.lane.b32.xlu1 %v16641_v37, %s16395_s20  ;;  %20448 = vst [vmem:[#allocation51_spill] sm:$0xff] %v17212_v26  ;;  %v2139_v1 = vsel %vm20190_vm2, %v17097_v2, %v2116_v53 }
 0x29f   :  { %7866 = vrot.lane.b32.xlu0 %v16731_v48, %s16395_s20  ;;  %v17221_v48 = vadd.s32 256, %v17146_v4 }
 0x2a0   :  { %v2118_v12 = vpop.permute.xlu1 %2117  ;;  %15293 = vmatmul.mubr.msk.f32.vlgmr.msra.gmra.mrb[16].mxu0 %vm20193_vm1, %v17036_v28 }
 0x2a1   :  { %v2141_v0 = vsel %vm20190_vm2, %v2118_v12, %v16960_v3  ;;  %v17216_v18 = vpop.permute.xlu0 %5603  ;;  %v2140_v35 = vsel %vm20190_vm2, %v2116_v53, %v2118_v12  ;;  %2615 = vmatprep.mubr.f32.mxu0 %v20444_v49  ;;  %20450 = vst [vmem:[#allocation53_spill] sm:$0xff] %v17221_v48  ;;  %v20451_v12 = vand.u32 31, %v17185_v7  ;;  %v2003_v53 = vsel %vm20213_vm5, %v16968_v15, %v16966_v13 }
 0x2a2   :  { %20449 = vst [vmem:[#allocation52_spill] sm:$0xff] %v17216_v18  ;;  %v2206_v37 = vsel %vm17204_vm4, %v2141_v0, 0.0  ;;  %7139 = vrot.lane.b32.xlu1 %v16943_v42, %s16394_s19  ;;  %15294 = vmatprep.subr.msk.mxu1 %vm20191_vm0, %v2140_v35  ;;  %v20452_v18 = vmov 0  ;;  %v17253_v35 = vadd.s32 640, %v17146_v4  ;;  %v2146_v3 = vsel %vm20190_vm2, %v17105_v47, %v17103_v29 }
 0x2a3   :  { %7141 = vrot.lane.b32.xlu0 %v16919_v19, %s16394_s19  ;;  %15295 = vmatpush1.msk.msra.mxu1 %vm20191_vm0, %v2139_v1  ;;  %vm17236_vm6 = vcmp.ge.s32.totalorder %v20451_v12, 1  ;;  %v2144_v1 = vsel %vm20190_vm2, %v17022_v63, %v17038_v52  ;;  %v2143_v12 = vsel %vm20190_vm2, %v16958_v11, %v17022_v63  ;;  %v2145_v11 = vsel %vm20190_vm2, %v17038_v52, %v17105_v47 }
 0x2a4   :  { %v20453_v18 = vsel %vm17236_vm6, 4294967295, %v20452_v18  ;;  %15298 = vmatpush1.msk.msra.mxu0 %vm20191_vm0, %v2206_v37  ;;  %v17244_v2 = vpop.permute.xlu1 %5601  ;;  %15296 = vmatmul.mubr.msk.f32.vlgmr.msra.gmra.mrb[16].mxu1 %vm20193_vm1, %v17036_v28  ;;  %20456 = vst [vmem:[#allocation56_spill] sm:$0xff] %v17253_v35  ;;  %v17259_v37 = vadd.s32 512, %v17146_v4  ;;  %v17289_v63 = vadd.s32 896, %v17146_v4  ;;  %v2005_v47 = vsel %vm20213_vm5, %v17040_v8, %v17049_v58 }
 0x2a5   :  { %20454 = vst [vmem:[#allocation54_spill] sm:$0xff] %v20453_v18  ;;  %20455 = vst [vmem:[#allocation55_spill] sm:$0xff] %v17244_v2  ;;  %15299 = vmatmul.mubr.msk.f32.vlgmr.msra.gmra.mrb[18].mxu0 %vm20193_vm1, %v17036_v28  ;;  %15300 = vmatprep.subr.msk.mxu1 %vm20191_vm0, %v2144_v1  ;;  %v2132_v0 = vpop.permute.xlu0 %2131  ;;  %v20458_v2 = vand.u32 31, %v17146_v4 }
 0x2a6   :  { %20457 = vst [vmem:[#allocation57_spill] sm:$0xff] %v17259_v37  ;;  %15303 = vmatprep.subr.msk.mxu0 %vm20191_vm0, %v2146_v3  ;;  %15301 = vmatpush1.msk.msra.mxu1 %vm20191_vm0, %v2143_v12  ;;  %v2148_v1 = vsel %vm20190_vm2, %v2132_v0, %v2101_v30  ;;  %v20463_v30 = vand.u32 31, %v17212_v26  ;;  %v20464_v3 = vmov 0  ;;  %v20474_v12 = vand.u32 31, %v17253_v35 }
 0x2a7   :  { %vm17269_vm7 = vcmp.ge.s32.totalorder %v20458_v2, 1  ;;  %15304 = vmatpush1.msk.msra.mxu0 %vm20191_vm0, %v2145_v11  ;;  %v2084_v2 = vsel %vm17236_vm6, %v2003_v53, 0.0  ;;  %7862 = vrot.lane.b32.xlu1 %v16638_v36, %s16395_s20  ;;  %v2147_v53 = vsel %vm20190_vm2, %v17103_v29, %v2132_v0  ;;  %v20480_v0 = vmov 0 }
 0x2a8   :  { %v20460_v27 = vsel %vm17269_vm7, 4294967295, %v20459_v27  ;;  %15309 = vmatprep.subr.msk.mxu0 %vm20191_vm0, %v2084_v2  ;;  %7868 = vrot.lane.b32.xlu0 %v16755_v54, %s16395_s20  ;;  %vm20183_vm8 = vmand %vm17163_vm3, %vm17269_vm7  ;;  %v17301_v52 = vpop.permute.xlu1 %1858  ;;  %vm17305_vm9 = vcmp.ge.s32.totalorder %v20463_v30, 1  ;;  %v20468_v54 = vand.u32 31, %v17221_v48  ;;  %v20469_v30 = vmov 0 }
 0x2a9   :  { %20461 = vst [vmem:[#allocation58_spill] sm:$0xff] %v20460_v27  ;;  %v20465_v3 = vsel %vm17305_vm9, 4294967295, %v20464_v3  ;;  %15306 = vmatprep.subr.msk.mxu1 %vm20191_vm0, %v2148_v1  ;;  %2686 = vmatprep.mubr.f32.mxu1 %v20444_v49  ;;  %v2034_v11 = vsel %vm20213_vm5, %v17301_v52, %v16968_v15  ;;  %v17316_v2 = vpop.permute.xlu0 %5611  ;;  %v17330_v1 = vadd.s32 768, %v17146_v4  ;;  %v2086_v29 = vsel %vm17305_vm9, %v2005_v47, 0.0  ;;  %v17359_v47 = vld [vmem:[%s20112_s5] sm:$0xff] }
 0x2aa   :  { %20466 = vst [vmem:[#allocation60_spill] sm:$0xff] %v20465_v3  ;;  %20467 = vst [vmem:[#allocation61_spill] sm:$0xff] %v17316_v2  ;;  %vm17320_vm10 = vcmp.ge.s32.totalorder %v20468_v54, 1  ;;  %2757 = vmatprep.mubr.f32.mxu0 %v20444_v49  ;;  %15302 = vmatmul.mubr.msk.f32.vlgmr.msra.gmra.mrb[18].mxu1 %vm20193_vm1, %v17036_v28  ;;  %v2083_v54 = vsel %vm20183_vm8, %v2034_v11, 0.0  ;;  %v2004_v15 = vsel %vm20213_vm5, %v16966_v13, %v17040_v8  ;;  %vm17363_vm11 = vcmp.ge.s32.totalorder %v20474_v12, 1 }
 0x2ab   :  { %v20470_v30 = vsel %vm17320_vm10, 4294967295, %v20469_v30  ;;  %20472 = vst [vmem:[#allocation63_spill] sm:$0xff] %v17330_v1  ;;  %15305 = vmatmul.mubr.msk.f32.vlgmr.msra.gmra.mrb[20].mxu0 %vm20193_vm1, %v17036_v28  ;;  %15307 = vmatpush1.msk.msra.mxu1 %vm20191_vm0, %v2147_v53  ;;  %v2007_v11 = vsel %vm20213_vm5, %v17113_v46, %v17111_v45  ;;  %v20475_v8 = vmov 0  ;;  %v17368_v13 = vadd.s32 1408, %v17146_v4 }
 0x2ac   :  { %20471 = vst [vmem:[#allocation62_spill] sm:$0xff] %v20470_v30  ;;  %15312 = vmatprep.subr.msk.mxu1 %vm20191_vm0, %v2086_v29  ;;  %7870 = vrot.lane.b32.xlu1 %v16818_v25, %s16395_s20  ;;  %v17354_v53 = vpop.permute.xlu1 %5609  ;;  %v20476_v8 = vsel %vm17363_vm11, 4294967295, %v20475_v8  ;;  %v20479_v29 = vand.u32 31, %v17259_v37  ;;  %v2006_v2 = vsel %vm20213_vm5, %v17049_v58, %v17113_v46  ;;  %v20484_v25 = vmov 0 }
 0x2ad   :  { %20473 = vst [vmem:[#allocation64_spill] sm:$0xff] %v17354_v53  ;;  %20477 = vst [vmem:[#allocation65_spill] sm:$0xff] %v20476_v8  ;;  %7872 = vrot.lane.b32.xlu0 %v16821_v59, %s16395_s20  ;;  %2828 = vmatprep.mubr.f32.mxu1 %v20444_v49  ;;  %v1985_v12 = vpop.permute.xlu0 %1984  ;;  %v20483_v53 = vand.u32 31, %v17168_v40  ;;  %v2011_v36 = vsel %vm20213_vm5, %v16976_v16, %v16974_v9  ;;  %v17395_v46 = vadd.s32 1536, %v17146_v4  ;;  %v20490_v59 = vmov 0 }
 0x2ae   :  { %20478 = vst [vmem:[#allocation66_spill] sm:$0xff] %v17368_v13  ;;  %vm17372_vm12 = vcmp.ge.s32.totalorder %v20479_v29, 1  ;;  %v17389_v29 = vadd.s32 1664, %v17146_v4  ;;  %15310 = vmatpush1.msk.msra.mxu0 %vm20191_vm0, %v2083_v54  ;;  %2950 = vmatprep.mubr.f32.mxu0 %v20444_v49  ;;  %v2085_v3 = vsel %vm17320_vm10, %v2004_v15, 0.0  ;;  %v2088_v54 = vsel %vm17363_vm11, %v2007_v11, 0.0 }
 0x2af   :  { %v20481_v0 = vsel %vm17372_vm12, 4294967295, %v20480_v0  ;;  %vm17384_vm13 = vcmp.ge.s32.totalorder %v20483_v53, 1  ;;  %20488 = vst [vmem:[#allocation70_spill] sm:$0xff] %v17395_v46  ;;  %v20489_v53 = vand.u32 31, %v17281_v10  ;;  %15308 = vmatmul.mubr.msk.f32.vlgmr.msra.gmra.mrb[20].mxu1 %vm20193_vm1, %v17036_v28  ;;  %15311 = vmatmul.mubr.msk.f32.vlgmr.msra.gmra.mrb[14].mxu0 %vm20193_vm1, %v17359_v47  ;;  %v20493_v58 = vand.u32 31, %v17289_v63 }
 0x2b0   :  { %20482 = vst [vmem:[#allocation67_spill] sm:$0xff] %v20481_v0  ;;  %v20485_v25 = vsel %vm17384_vm13, 4294967295, %v20484_v25  ;;  %20487 = vst [vmem:[#allocation69_spill] sm:$0xff] %v17389_v29  ;;  %v20494_v27 = vmov 0  ;;  %v17424_v15 = vadd.s32 1280, %v17146_v4  ;;  %v2087_v28 = vsel %vm17372_vm12, %v2006_v2, 0.0  ;;  %15313 = vmatpush1.msk.msra.mxu1 %vm20191_vm0, %v2085_v3  ;;  %15315 = vmatprep.subr.msk.mxu0 %vm20191_vm0, %v2088_v54  ;;  %v1987_v11 = vpop.permute.xlu1 %1986 }
 0x2b1   :  { %20486 = vst [vmem:[#allocation68_spill] sm:$0xff] %v20485_v25  ;;  %vm17402_vm14 = vcmp.ge.s32.totalorder %v20489_v53, 1  ;;  %vm17416_vm15 = vcmp.ge.s32.totalorder %v20493_v58, 1  ;;  %v17421_v53 = vadd.s32 1920, %v17146_v4  ;;  %vm20192_vm8 = vmand %vm17204_vm4, %vm17384_vm13  ;;  %15316 = vmatpush1.msk.msra.mxu0 %vm20191_vm0, %v2087_v28  ;;  %7874 = vrot.lane.b32.xlu1 %v16927_v33, %s16395_s20  ;;  %v2009_v3 = vsel %vm20213_vm5, %v1985_v12, %v1987_v11  ;;  %v17443_v54 = vpop.permute.xlu0 %5615 }
 0x2b2   :  { %v20491_v59 = vsel %vm17402_vm14, 4294967295, %v20490_v59  ;;  %v20495_v27 = vsel %vm17416_vm15, 4294967295, %v20494_v27  ;;  %20498 = vst [vmem:[#allocation74_spill] sm:$0xff] %v17424_v15  ;;  %v2092_v30 = vsel %vm17402_vm14, %v2011_v36, 0.0  ;;  %v2010_v2 = vsel %vm20213_vm5, %v1987_v11, %v16976_v16  ;;  %20499 = vst [vmem:[#allocation75_spill] sm:$0xff] %v17443_v54  ;;  %7876 = vrot.lane.b32.xlu0 %v16935_v34, %s16395_s20  ;;  %3092 = vmatprep.mubr.f32.mxu0 %v20444_v49 }
 0x2b3   :  { %20492 = vst [vmem:[#allocation71_spill] sm:$0xff] %v20491_v59  ;;  %20496 = vst [vmem:[#allocation72_spill] sm:$0xff] %v20495_v27  ;;  %v20196_v0 = vand.u32 31, %v17389_v29  ;;  %15321 = vmatprep.subr.msk.mxu0 %vm20191_vm0, %v2092_v30  ;;  %v2090_v36 = vsel %vm17416_vm15, %v2009_v3, 0.0  ;;  %v20500_v28 = vand.u32 31, %v17330_v1  ;;  %v20501_v58 = vmov 0  ;;  %3021 = vmatprep.mubr.f32.mxu1 %v20444_v49 }
 0x2b4   :  { %20497 = vst [vmem:[#allocation73_spill] sm:$0xff] %v17421_v53  ;;  %v2008_v16 = vsel %vm20213_vm5, %v17111_v45, %v1985_v12  ;;  %v2091_v30 = vsel %vm20192_vm8, %v2010_v2, 0.0  ;;  %15317 = vmatmul.mubr.msk.f32.vlgmr.msra.gmra.mrb[16].mxu0 %vm20193_vm1, %v17359_v47  ;;  %15314 = vmatmul.mubr.msk.f32.vlgmr.msra.gmra.mrb[14].mxu1 %vm20193_vm1, %v17359_v47  ;;  %v17473_v45 = vpop.permute.xlu1 %5613  ;;  %v17476_v12 = vadd.s32 1792, %v17146_v4  ;;  %v2015_v2 = vsel %vm20213_vm5, %v17121_v51, %v17119_v41 }
 0x2b5   :  { %vm17454_vm2 = vcmp.ge.s32.totalorder %v20500_v28, 1  ;;  %20504 = vst [vmem:[#allocation77_spill] sm:$0xff] %v17473_v45  ;;  %7878 = vrot.lane.b32.xlu1 %v16648_v38, %s16395_s20  ;;  %vm20506_vm8 = vcmask 1043456   ;;  %vm17486_vm0 = vcmp.ge.s32.totalorder %v20196_v0, 1  ;;  %v20507_v28 = vmov 0  ;;  %v2001_v3 = vpop.permute.xlu0 %2000  ;;  %3234 = vmatprep.mubr.f32.mxu0 %v20444_v49 }
 0x2b6   :  { %v20502_v58 = vsel %vm17454_vm2, 4294967295, %v20501_v58  ;;  %20505 = vst [vmem:[#allocation78_spill] sm:$0xff] %v17476_v12  ;;  %15318 = vmatprep.subr.msk.mxu1 %vm20506_vm8, %v2090_v36  ;;  %v20508_v28 = vsel %vm17486_vm0, 4294967295, %v20507_v28  ;;  %v20510_v11 = vand.u32 31, %v17368_v13  ;;  %v20511_v8 = vmov 0  ;;  %7880 = vrot.lane.b32.xlu0 %v16651_v39, %s16395_s20 }
 0x2b7   :  { %20503 = vst [vmem:[#allocation76_spill] sm:$0xff] %v20502_v58  ;;  %20509 = vst [vmem:[#allocation79_spill] sm:$0xff] %v20508_v28  ;;  %v2013_v54 = vsel %vm20213_vm5, %v17051_v60, %v17057_v31  ;;  %v20514_v45 = vand.u32 31, %v17395_v46  ;;  %v20515_v36 = vmov 0  ;;  %v2014_v0 = vsel %vm20213_vm5, %v17057_v31, %v17121_v51  ;;  %3163 = vmatprep.mubr.f32.mxu1 %v20444_v49 }
 0x2b8   :  { %vm17492_vm1 = vcmp.ge.s32.totalorder %v20510_v11, 1  ;;  %v2089_v11 = vsel %vm17454_vm2, %v2008_v16, 0.0  ;;  %vm20518_vm13 = vcmask 1043456   ;;  %vm20519_vm15 = vcmask 252928  }
 0x2b9   :  { %v20512_v8 = vsel %vm17492_vm1, 4294967295, %v20511_v8  ;;  %vm17501_vm8 = vcmp.ge.s32.totalorder %v20514_v45, 1  ;;  %15322 = vmatpush1.msk.msra.mxu0 %vm20518_vm13, %v2091_v30  ;;  %v3488_v33 = vsel %vm20519_vm15, %v16982_v17, %v16984_v61  ;;  %vm20520_vm14 = vmmov %vm20518_vm13  ;;  %v2017_v45 = vsel %vm20213_vm5, %v2001_v3, %v17301_v52  ;;  %7882 = vrot.lane.b32.xlu1 %v16759_v55, %s16395_s20 }
 0x2ba   :  { %20513 = vst [vmem:[#allocation80_spill] sm:$0xff] %v20512_v8  ;;  %v20516_v36 = vsel %vm17501_vm8, 4294967295, %v20515_v36  ;;  %15319 = vmatpush1.msk.msra.mxu1 %vm20520_vm14, %v2089_v11  ;;  %v20521_v51 = vand.u32 31, %v17185_v7  ;;  %v20522_v31 = vmov 0  ;;  %v20525_v16 = vand.u32 31, %v17421_v53  ;;  %7884 = vrot.lane.b32.xlu0 %v16767_v57, %s16395_s20 }
 0x2bb   :  { %20517 = vst [vmem:[#allocation81_spill] sm:$0xff] %v20516_v36  ;;  %v20526_v30 = vmov 0  ;;  %v20529_v38 = vand.u32 31, %v17424_v15  ;;  %v20530_v34 = vmov 0  ;;  %v2012_v52 = vsel %vm20213_vm5, %v16974_v9, %v17051_v60  ;;  %v17556_v60 = vpop.permute.xlu0 %5619 }
 0x2bc   :  { %vm17522_vm10 = vcmp.le.s32.totalorder %v20521_v51, 30  ;;  %vm17528_vm13 = vcmp.ge.s32.totalorder %v20525_v16, 1  ;;  %vm20533_vm14 = vcmask 31744   ;;  %v2096_v11 = vsel %vm17486_vm0, %v2015_v2, 0.0  ;;  %v17547_v16 = vpop.permute.xlu1 %3454 }
 0x2bd   :  { %v20523_v31 = vsel %vm17522_vm10, 4294967295, %v20522_v31  ;;  %v20527_v30 = vsel %vm17528_vm13, 4294967295, %v20526_v30  ;;  %vm17534_vm15 = vcmp.ge.s32.totalorder %v20529_v38, 1  ;;  %15323 = vmatmul.mubr.msk.f32.vlgmr.msra.gmra.mrb[18].mxu0 %vm20533_vm14, %v17359_v47  ;;  %v20220_v51 = vand.u32 31, %v17476_v12  ;;  %vm20535_vm12 = vmmov %vm20533_vm14  ;;  %7886 = vrot.lane.b32.xlu1 %v16839_v5, %s16395_s20 }
 0x2be   :  { %20524 = vst [vmem:[#allocation82_spill] sm:$0xff] %v20523_v31  ;;  %20528 = vst [vmem:[#allocation83_spill] sm:$0xff] %v20527_v30  ;;  %v20531_v34 = vsel %vm17534_vm15, 4294967295, %v20530_v34  ;;  %v2095_v38 = vsel %vm17501_vm8, %v2014_v0, 0.0  ;;  %vm20534_vm2 = vcmask 1043456   ;;  %15320 = vmatmul.mubr.msk.f32.vlgmr.msra.gmra.mrb[16].mxu1 %vm20535_vm12, %v17359_v47  ;;  %v2094_v9 = vsel %vm17492_vm1, %v2013_v54, 0.0  ;;  %3376 = vmatprep.mubr.f32.mxu0 %v20444_v49 }
 0x2bf   :  { %20532 = vst [vmem:[#allocation84_spill] sm:$0xff] %v20531_v34  ;;  %15327 = vmatprep.subr.msk.mxu0 %vm20534_vm2, %v2096_v11  ;;  %v20536_v7 = vand.u32 31, %v17146_v4  ;;  %v20537_v2 = vmov 0  ;;  %vm20540_vm5 = vmmov %vm20534_vm2  ;;  %v3569_v0 = vsel %vm17522_vm10, %v3488_v33, 0.0  ;;  %v2098_v11 = vsel %vm17528_vm13, %v2017_v45, 0.0  ;;  %3305 = vmatprep.mubr.f32.mxu1 %v20444_v49 }
 0x2c0   :  { %15324 = vmatprep.subr.msk.mxu1 %vm20540_vm5, %v2094_v9  ;;  %vm20541_vm0 = vmmov %vm20534_vm2  ;;  %v2093_v54 = vsel %vm17534_vm15, %v2012_v52, 0.0  ;;  %vm17584_vm12 = vcmp.ge.s32.totalorder %v20220_v51, 1  ;;  %v17593_v52 = vpop.permute.xlu1 %5617  ;;  %v20552_v9 = vmov 0  ;;  %v20564_v51 = vmov 0  ;;  %7888 = vrot.lane.b32.xlu0 %v16835_v32, %s16395_s20 }
 0x2c1   :  { %vm17560_vm14 = vcmp.le.s32.totalorder %v20536_v7, 30  ;;  %15328 = vmatpush1.msk.msra.mxu0 %vm20541_vm0, %v2095_v38  ;;  %vm20542_vm2 = vmmov %vm20541_vm0  ;;  %vm20543_vm0 = vcmask 252928   ;;  %v20544_v7 = vmov 0  ;;  %v20551_v38 = vand.u32 31, %v17212_v26  ;;  %7890 = vrot.lane.b32.xlu1 %v16943_v42, %s16395_s20 }
 0x2c2   :  { %v20538_v2 = vsel %vm17560_vm14, 4294967295, %v20537_v2  ;;  %15334 = vmatprep.subr.msk.mxu0 %vm20542_vm2, %v3569_v0  ;;  %v3519_v33 = vsel %vm20543_vm0, %v17547_v16, %v16982_v17  ;;  %v20545_v7 = vsel %vm17584_vm12, 4294967295, %v20544_v7  ;;  %vm20547_vm2 = vcmask 269312   ;;  %vm20548_vm10 = vmmov %vm20540_vm5 }
 0x2c3   :  { %20539 = vst [vmem:[#allocation85_spill] sm:$0xff] %v20538_v2  ;;  %20546 = vst [vmem:[#allocation86_spill] sm:$0xff] %v20545_v7  ;;  %v2016_v45 = vsel %vm20547_vm2, %v17119_v41, %v2001_v3  ;;  %15325 = vmatpush1.msk.msra.mxu1 %vm20548_vm10, %v2093_v54  ;;  %vm17602_vm15 = vcmp.le.s32.totalorder %v20551_v38, 30  ;;  %v3470_v41 = vpop.permute.xlu0 %3469  ;;  %vm20557_vm2 = vcmask 252928   ;;  %v20559_v54 = vand.u32 31, %v17253_v35 }
 0x2c4   :  { %vm20549_vm5 = vmmov %vm20543_vm0  ;;  %v20553_v9 = vsel %vm17602_vm15, 4294967295, %v20552_v9  ;;  %v3492_v0 = vsel %vm20557_vm2, %v17129_v62, %v17127_v21  ;;  %v20563_v38 = vand.u32 31, %v17259_v37  ;;  %v20577_v37 = vmov 0  ;;  %7892 = vrot.lane.b32.xlu0 %v16919_v19, %s16395_s20 }
 0x2c5   :  { %v3490_v17 = vsel %vm20549_vm5, %v17059_v6, %v17065_v23  ;;  %vm20550_vm0 = vmmov %vm20548_vm10  ;;  %20554 = vst [vmem:[#allocation87_spill] sm:$0xff] %v20553_v9  ;;  %vm20556_vm5 = vcmask 31744   ;;  %v20581_v35 = vmov 0 }
 0x2c6   :  { %15330 = vmatprep.subr.msk.mxu1 %vm20550_vm0, %v2098_v11  ;;  %vm20555_vm10 = vmand %vm17163_vm3, %vm17560_vm14  ;;  %15329 = vmatmul.mubr.msk.f32.vlgmr.msra.gmra.mrb[20].mxu0 %vm20556_vm5, %v17359_v47  ;;  %v2097_v11 = vsel %vm17584_vm12, %v2016_v45, 0.0  ;;  %v3491_v45 = vsel %vm20557_vm2, %v17065_v23, %v17129_v62  ;;  %v20569_v62 = vand.u32 31, %v17221_v48  ;;  %v20570_v23 = vmov 0 }
 0x2c7   :  { %v3568_v3 = vsel %vm20555_vm10, %v3519_v33, 0.0  ;;  %vm20558_vm0 = vmmov %vm20556_vm5  ;;  %vm17625_vm10 = vcmp.le.s32.totalorder %v20559_v54, 30  ;;  %v20560_v33 = vmov 0  ;;  %vm17631_vm5 = vcmp.le.s32.totalorder %v20563_v38, 30  ;;  %v3472_v38 = vpop.permute.xlu1 %3471  ;;  %v17668_v4 = vpop.permute.xlu0 %6348  ;;  %3701 = vmatprep.mubr.f32.mxu0 %v20444_v49 }
 0x2c8   :  { %15326 = vmatmul.mubr.msk.f32.vlgmr.msra.gmra.mrb[18].mxu1 %vm20558_vm0, %v17359_v47  ;;  %v20561_v33 = vsel %vm17625_vm10, 4294967295, %v20560_v33  ;;  %v20565_v51 = vsel %vm17631_vm5, 4294967295, %v20564_v51  ;;  %vm20567_vm0 = vcmask 1043456   ;;  %v3571_v54 = vsel %vm17602_vm15, %v3490_v17, 0.0  ;;  %vm20568_vm3 = vmmov %vm20557_vm2 }
 0x2c9   :  { %20562 = vst [vmem:[#allocation88_spill] sm:$0xff] %v20561_v33  ;;  %20566 = vst [vmem:[#allocation89_spill] sm:$0xff] %v20565_v51  ;;  %15331 = vmatpush1.msk.msra.mxu1 %vm20567_vm0, %v2097_v11  ;;  %v3496_v26 = vsel %vm20568_vm3, %v16992_v22, %v16990_v20  ;;  %vm17653_vm2 = vcmp.le.s32.totalorder %v20569_v62, 30  ;;  %vm20574_vm15 = vcmask 1043456   ;;  %v20576_v11 = vand.u32 31, %v17281_v10  ;;  %3447 = vmatprep.mubr.f32.mxu1 %v20444_v49  ;;  %v20624_v10 = vld [vmem:[#allocation30_spill] sm:$0xff] }
 0x2ca   :  { %v20571_v23 = vsel %vm17653_vm2, 4294967295, %v20570_v23  ;;  %vm20573_vm0 = vmmov %vm20568_vm3  ;;  %15337 = vmatprep.subr.msk.mxu1 %vm20574_vm15, %v3571_v54  ;;  %v20580_v62 = vand.u32 31, %v17168_v40 }
 0x2cb   :  { %20572 = vst [vmem:[#allocation90_spill] sm:$0xff] %v20571_v23  ;;  %v3489_v17 = vsel %vm20573_vm0, %v16984_v61, %v17059_v6  ;;  %vm20575_vm14 = vmmov %vm20574_vm15  ;;  %vm17664_vm12 = vcmp.le.s32.totalorder %v20576_v11, 30  ;;  %v3573_v61 = vsel %vm17625_vm10, %v3492_v0, 0.0  ;;  %v3572_v6 = vsel %vm17631_vm5, %v3491_v45, 0.0 }
 0x2cc   :  { %15335 = vmatpush1.msk.msra.mxu0 %vm20575_vm14, %v3568_v3  ;;  %v20578_v37 = vsel %vm17664_vm12, 4294967295, %v20577_v37  ;;  %vm17672_vm3 = vcmp.le.s32.totalorder %v20580_v62, 30  ;;  %vm20584_vm15 = vcmask 31744   ;;  %vm20585_vm13 = vmmov %vm20573_vm0  ;;  %v20587_v0 = vand.u32 31, %v17289_v63 }
 0x2cd   :  { %20579 = vst [vmem:[#allocation91_spill] sm:$0xff] %v20578_v37  ;;  %v20582_v35 = vsel %vm17672_vm3, 4294967295, %v20581_v35  ;;  %15336 = vmatmul.mubr.msk.f32.vlgmr.msra.gmra.mrb[14].mxu0 %vm20584_vm15, %v17646_v43  ;;  %15340 = vmatprep.subr.msk.mxu0 %vm20575_vm14, %v3573_v61  ;;  %v3494_v3 = vsel %vm20585_vm13, %v3470_v41, %v3472_v38  ;;  %vm20586_vm8 = vmmov %vm20573_vm0  ;;  %v20588_v11 = vmov 0  ;;  %v3570_v45 = vsel %vm17653_vm2, %v3489_v17, 0.0  ;;  %v17705_v61 = vpop.permute.xlu1 %6346 }
 0x2ce   :  { %20583 = vst [vmem:[#allocation92_spill] sm:$0xff] %v20582_v35  ;;  %v3495_v54 = vsel %vm20586_vm8, %v3472_v38, %v16992_v22  ;;  %vm17694_vm10 = vcmp.le.s32.totalorder %v20587_v0, 30  ;;  %15332 = vmatmul.mubr.msk.f32.vlgmr.msra.gmra.mrb[20].mxu1 %vm20584_vm15, %v17359_v47  ;;  %15341 = vmatpush1.msk.msra.mxu0 %vm20575_vm14, %v3572_v6  ;;  %v3577_v62 = vsel %vm17664_vm12, %v3496_v26, 0.0  ;;  %vm20591_vm8 = vmmov %vm20575_vm14  ;;  %v3486_v22 = vpop.permute.xlu0 %3485  ;;  %v20593_v38 = vand.u32 31, %v17330_v1 }
 0x2cf   :  { %v20589_v11 = vsel %vm17694_vm10, 4294967295, %v20588_v11  ;;  %15338 = vmatpush1.msk.msra.mxu1 %vm20591_vm8, %v3570_v45  ;;  %vm20592_vm13 = vmmov %vm20591_vm8  ;;  %v20594_v0 = vmov 0  ;;  %vm20597_vm15 = vcmask 252928   ;;  %v3575_v17 = vsel %vm17694_vm10, %v3494_v3, 0.0  ;;  %3843 = vmatprep.mubr.f32.mxu0 %v20444_v49 }
 0x2d0   :  { %20590 = vst [vmem:[#allocation93_spill] sm:$0xff] %v20589_v11  ;;  %15346 = vmatprep.subr.msk.mxu0 %vm20592_vm13, %v3577_v62  ;;  %vm17711_vm0 = vcmp.le.s32.totalorder %v20593_v38, 30  ;;  %v3493_v47 = vsel %vm20597_vm15, %v17127_v21, %v3470_v41  ;;  %vm20598_vm14 = vmand %vm17204_vm4, %vm17672_vm3  ;;  %3772 = vmatprep.mubr.f32.mxu1 %v20444_v49  ;;  %v20600_v41 = vand.u32 31, %v17389_v29  ;;  %v20601_v6 = vmov 0 }
 0x2d1   :  { %v20595_v0 = vsel %vm17711_vm0, 4294967295, %v20594_v0  ;;  %v3576_v26 = vsel %vm20598_vm14, %v3495_v54, 0.0  ;;  %vm20599_vm13 = vmmov %vm20597_vm15  ;;  %v20604_v54 = vand.u32 31, %v17395_v46  ;;  %v20605_v45 = vmov 0 }
 0x2d2   :  { %20596 = vst [vmem:[#allocation94_spill] sm:$0xff] %v20595_v0  ;;  %v3500_v21 = vsel %vm20599_vm13, %v17137_v44, %v17135_v14  ;;  %vm17735_vm15 = vcmp.le.s32.totalorder %v20600_v41, 30  ;;  %vm20608_vm8 = vcmask 31744   ;;  %v20610_v3 = vand.u32 31, %v17368_v13  ;;  %v17775_v29 = vpop.permute.xlu0 %6350  ;;  %v20623_v13 = vld [vmem:[#allocation31_spill] sm:$0xff] }
 0x2d3   :  { %v20602_v6 = vsel %vm17735_vm15, 4294967295, %v20601_v6  ;;  %vm17741_vm14 = vcmp.le.s32.totalorder %v20604_v54, 30  ;;  %15342 = vmatmul.mubr.msk.f32.vlgmr.msra.gmra.mrb[16].mxu0 %vm20608_vm8, %v17646_v43  ;;  %vm20609_vm13 = vmmov %vm20608_vm8  ;;  %v20611_v62 = vmov 0  ;;  %v20614_v38 = vand.u32 31, %v17421_v53  ;;  %v17761_v54 = vpop.permute.xlu1 %4221  ;;  %v20662_v53 = vld [vmem:[#allocation65_spill] sm:$0xff] }
 0x2d4   :  { %20603 = vst [vmem:[#allocation95_spill] sm:$0xff] %v20602_v6  ;;  %v20606_v45 = vsel %vm17741_vm14, 4294967295, %v20605_v45  ;;  %15339 = vmatmul.mubr.msk.f32.vlgmr.msra.gmra.mrb[14].mxu1 %vm20609_vm13, %v17646_v43  ;;  %vm17751_vm4 = vcmp.le.s32.totalorder %v20610_v3, 30  ;;  %v20615_v41 = vmov 0  ;;  %vm20618_vm8 = vcmask 252928   ;;  %3985 = vmatprep.mubr.f32.mxu0 %v20444_v49 }
 0x2d5   :  { %20607 = vst [vmem:[#allocation96_spill] sm:$0xff] %v20606_v45  ;;  %v20612_v62 = vsel %vm17751_vm4, 4294967295, %v20611_v62  ;;  %vm17757_vm3 = vcmp.le.s32.totalorder %v20614_v38, 30  ;;  %v3498_v50 = vsel %vm20618_vm8, %v17067_v24, %v17073_v56  ;;  %vm20619_vm13 = vmmov %vm20618_vm8  ;;  %v3574_v3 = vsel %vm17711_vm0, %v3493_v47, 0.0  ;;  %3914 = vmatprep.mubr.f32.mxu1 %v20444_v49 }
 0x2d6   :  { %20613 = vst [vmem:[#allocation97_spill] sm:$0xff] %v20612_v62  ;;  %v20616_v41 = vsel %vm17757_vm3, 4294967295, %v20615_v41  ;;  %v3499_v1 = vsel %vm20619_vm13, %v17073_v56, %v17137_v44  ;;  %vm20620_vm12 = vcmask 1043456   ;;  %vm20622_vm2 = vmmov %vm20618_vm8  ;;  %vm20625_vm10 = vcmask 7168  }
 0x2d7   :  { %20617 = vst [vmem:[#allocation98_spill] sm:$0xff] %v20616_v41  ;;  %15343 = vmatprep.subr.msk.mxu1 %vm20620_vm12, %v3575_v17  ;;  %vm20621_vm5 = vmmov %vm20620_vm12  ;;  %v3502_v38 = vsel %vm20622_vm2, %v3486_v22, %v17547_v16  ;;  %v4255_v40 = vsel %vm20625_vm10, %v20624_v10, %v20623_v13  ;;  %v20626_v46 = vand.u32 31, %v17424_v15  ;;  %v20627_v44 = vmov 0  ;;  %v4237_v17 = vpop.permute.xlu0 %4236  ;;  %v20656_v15 = vld [vmem:[#allocation33_spill] sm:$0xff] }
 0x2d8   :  { %15347 = vmatpush1.msk.msra.mxu0 %vm20621_vm5, %v3576_v26  ;;  %vm20630_vm12 = vmmov %vm20622_vm2  ;;  %15344 = vmatpush1.msk.msra.mxu1 %vm20621_vm5, %v3574_v3  ;;  %v3581_v16 = vsel %vm17735_vm15, %v3500_v21, 0.0  ;;  %vm20632_vm2 = vcmask 7168   ;;  %v3580_v47 = vsel %vm17741_vm14, %v3499_v1, 0.0  ;;  %vm20633_vm13 = vcmask 31744   ;;  %v17808_v26 = vpop.permute.xlu1 %6344 }
 0x2d9   :  { %vm17782_vm8 = vcmp.le.s32.totalorder %v20626_v46, 30  ;;  %v3497_v56 = vsel %vm20630_vm12, %v16990_v20, %v17067_v24  ;;  %vm20631_vm10 = vmmov %vm20621_vm5  ;;  %v4286_v46 = vsel %vm20632_vm2, %v17761_v54, %v20624_v10  ;;  %15348 = vmatmul.mubr.msk.f32.vlgmr.msra.gmra.mrb[18].mxu0 %vm20633_vm13, %v17646_v43  ;;  %v3579_v24 = vsel %vm17751_vm4, %v3498_v50, 0.0 }
 0x2da   :  { %v20628_v44 = vsel %vm17782_vm8, 4294967295, %v20627_v44  ;;  %15352 = vmatprep.subr.msk.mxu0 %vm20631_vm10, %v3581_v16  ;;  %vm20634_vm12 = vmmov %vm20633_vm13  ;;  %v3583_v20 = vsel %vm17757_vm3, %v3502_v38, 0.0  ;;  %v3578_v10 = vsel %vm17782_vm8, %v3497_v56, 0.0  ;;  %15349 = vmatprep.subr.msk.mxu1 %vm20621_vm5, %v3579_v24  ;;  %v4320_v1 = vsel %vm17236_vm6, %v4255_v40, 0.0  ;;  %v20644_v16 = vld [vmem:[#allocation36_spill] sm:$0xff] }
 0x2db   :  { %20629 = vst [vmem:[#allocation31_spill] sm:$0xff] %v20628_v44  ;;  %15345 = vmatmul.mubr.msk.f32.vlgmr.msra.gmra.mrb[16].mxu1 %vm20634_vm12, %v17646_v43  ;;  %vm20635_vm10 = vmmov %vm20621_vm5  ;;  %v20636_v21 = vand.u32 31, %v17476_v12  ;;  %v20637_v50 = vmov 0  ;;  %vm20640_vm13 = vcmask 252928   ;;  %v4319_v56 = vsel %vm17269_vm7, %v4286_v46, 0.0  ;;  %4127 = vmatprep.mubr.f32.mxu0 %v20444_v49  ;;  %v20648_v24 = vld [vmem:[#allocation40_spill] sm:$0xff] }
 0x2dc   :  { %15353 = vmatpush1.msk.msra.mxu0 %vm20635_vm10, %v3580_v47  ;;  %v3501_v3 = vsel %vm20640_vm13, %v17135_v14, %v3486_v22  ;;  %vm20641_vm12 = vmmov %vm20621_vm5  ;;  %v20645_v47 = vld [vmem:[#allocation35_spill] sm:$0xff]  ;;  %4056 = vmatprep.mubr.f32.mxu1 %v20444_v49  ;;  %vm20651_vm13 = vcmask 31744   ;;  %v4239_v14 = vpop.permute.xlu1 %4238 }
 0x2dd   :  { %vm17818_vm2 = vcmp.le.s32.totalorder %v20636_v21, 30  ;;  %15350 = vmatpush1.msk.msra.mxu1 %vm20641_vm12, %v3578_v10  ;;  %vm20642_vm8 = vmmov %vm20621_vm5  ;;  %vm20646_vm5 = vcmask 7168   ;;  %v20649_v21 = vld [vmem:[#allocation42_spill] sm:$0xff]  ;;  %15354 = vmatmul.mubr.msk.f32.vlgmr.msra.gmra.mrb[20].mxu0 %vm20651_vm13, %v17646_v43  ;;  %v17852_v10 = vpop.permute.xlu0 %6354 }
 0x2de   :  { %v20638_v50 = vsel %vm17818_vm2, 4294967295, %v20637_v50  ;;  %15359 = vmatprep.subr.msk.mxu0 %vm20642_vm8, %v4320_v1  ;;  %v4257_v40 = vsel %vm20646_vm5, %v20645_v47, %v20644_v16  ;;  %vm20647_vm10 = vmmov %vm20642_vm8  ;;  %v3582_v46 = vsel %vm17818_vm2, %v3501_v3, 0.0  ;;  %v20655_v1 = vld [vmem:[#allocation32_spill] sm:$0xff]  ;;  %4452 = vmatprep.mubr.f32.mxu0 %v20444_v49 }
 0x2df   :  { %20639 = vst [vmem:[#allocation30_spill] sm:$0xff] %v20638_v50  ;;  %15355 = vmatprep.subr.msk.mxu1 %vm20647_vm10, %v3583_v20  ;;  %vm20650_vm6 = vmmov %vm20646_vm5  ;;  %v17850_v20 = vld [vmem:[%s20112_s5 + $0x18] sm:$0xff] }
 0x2e0   :  { %v4259_v12 = vsel %vm20650_vm6, %v20649_v21, %v20648_v24  ;;  %vm20652_vm8 = vmmov %vm20646_vm5  ;;  %v4263_v48 = vsel %vm20650_vm6, %v20656_v15, %v20655_v1 }
 0x2e1   :  { %v4258_v22 = vsel %vm20652_vm8, %v20644_v16, %v20649_v21  ;;  %vm20653_vm12 = vmmov %vm20651_vm13  ;;  %v20659_v16 = vld [vmem:[#allocation60_spill] sm:$0xff]  ;;  %v4324_v50 = vsel %vm17363_vm11, %v4259_v12, 0.0 }
 0x2e2   :  { %15351 = vmatmul.mubr.msk.f32.vlgmr.msra.gmra.mrb[18].mxu1 %vm20653_vm12, %v17646_v43  ;;  %vm20654_vm5 = vmmov %vm20647_vm10 }
 0x2e3   :  { %15360 = vmatpush1.msk.msra.mxu0 %vm20654_vm5, %v4319_v56  ;;  %vm20657_vm10 = vmmov %vm20650_vm6  ;;  %v4322_v56 = vsel %vm17305_vm9, %v4257_v40, 0.0  ;;  %4198 = vmatprep.mubr.f32.mxu1 %v20444_v49  ;;  %v17876_v40 = vpop.permute.xlu1 %6352 }
 0x2e4   :  { %v4256_v3 = vsel %vm20657_vm10, %v20623_v13, %v20645_v47  ;;  %vm20658_vm13 = vmmov %vm20654_vm5  ;;  %v20664_v13 = vld [vmem:[#allocation67_spill] sm:$0xff]  ;;  %vm20666_vm10 = vcmask 31744  }
 0x2e5   :  { %15356 = vmatpush1.msk.msra.mxu1 %vm20658_vm13, %v3582_v46  ;;  %vm20660_vm8 = vmmov %vm20650_vm6  ;;  %15361 = vmatmul.mubr.msk.f32.vlgmr.msra.gmra.mrb[14].mxu0 %vm20666_vm10, %v17850_v20  ;;  %v20668_v46 = vld [vmem:[#allocation62_spill] sm:$0xff] }
 0x2e6   :  { %v4261_v21 = vsel %vm20660_vm8, %v4237_v17, %v4239_v14  ;;  %vm20661_vm12 = vmmov %vm20654_vm5  ;;  %vm20669_vm8 = vnez %v20668_v46  ;;  %4594 = vmatprep.mubr.f32.mxu0 %v20444_v49 }
 0x2e7   :  { %15362 = vmatprep.subr.msk.mxu1 %vm20661_vm12, %v4322_v56  ;;  %vm20663_vm5 = vmmov %vm20650_vm6  ;;  %vm20665_vm6 = vnez %v20664_v13  ;;  %v4321_v56 = vsel %vm20669_vm8, %v4256_v3, 0.0  ;;  %vm20677_vm8 = vnez %v20485_v25  ;;  %v20679_v3 = vld [vmem:[#allocation44_spill] sm:$0xff] }
 0x2e8   :  { %v4262_v38 = vsel %vm20663_vm5, %v4239_v14, %v20656_v15  ;;  %v4323_v47 = vsel %vm20665_vm6, %v4258_v22, 0.0  ;;  %vm20667_vm13 = vmmov %vm20661_vm12  ;;  %vm20672_vm5 = vnez %v20491_v59  ;;  %vm20673_vm6 = vnez %v20495_v27  ;;  %v4253_v14 = vpop.permute.xlu0 %4252 }
 0x2e9   :  { %15365 = vmatprep.subr.msk.mxu0 %vm20667_vm13, %v4324_v50  ;;  %vm20670_vm12 = vmmov %vm20666_vm10  ;;  %v4328_v15 = vsel %vm20672_vm5, %v4263_v48, 0.0  ;;  %v4326_v12 = vsel %vm20673_vm6, %v4261_v21, 0.0  ;;  %vm20674_vm10 = vcmask 7168   ;;  %v4327_v22 = vsel %vm20677_vm8, %v4262_v38, 0.0  ;;  %v20681_v48 = vld [vmem:[#allocation38_spill] sm:$0xff]  ;;  %v20682_v21 = vld [vmem:[#allocation37_spill] sm:$0xff] }
 0x2ea   :  { %15357 = vmatmul.mubr.msk.f32.vlgmr.msra.gmra.mrb[20].mxu1 %vm20670_vm12, %v17646_v43  ;;  %vm20671_vm9 = vmmov %vm20667_vm13  ;;  %v4260_v50 = vsel %vm20674_vm10, %v20648_v24, %v4237_v17  ;;  %v20678_v43 = vld [vmem:[#allocation43_spill] sm:$0xff]  ;;  %v17904_v17 = vpop.permute.xlu1 %6360 }
 0x2eb   :  { %15366 = vmatpush1.msk.msra.mxu0 %vm20671_vm9, %v4323_v47  ;;  %vm20675_vm13 = vmmov %vm20671_vm9  ;;  %4523 = vmatprep.mubr.f32.mxu1 %v20444_v49 }
 0x2ec   :  { %15363 = vmatpush1.msk.msra.mxu1 %vm20675_vm13, %v4321_v56  ;;  %vm20676_vm11 = vmmov %vm20671_vm9 }
 0x2ed   :  { %15371 = vmatprep.subr.msk.mxu0 %vm20676_vm11, %v4328_v15  ;;  %vm20680_vm9 = vmmov %vm20674_vm10  ;;  %vm20684_vm10 = vcmask 31744   ;;  %v17916_v15 = vpop.permute.xlu0 %6362 }
 0x2ee   :  { %v4267_v47 = vsel %vm20680_vm9, %v20679_v3, %v20678_v43  ;;  %vm20683_vm12 = vmmov %vm20680_vm9  ;;  %15367 = vmatmul.mubr.msk.f32.vlgmr.msra.gmra.mrb[16].mxu0 %vm20684_vm10, %v17850_v20 }
 0x2ef   :  { %v4265_v59 = vsel %vm20683_vm12, %v20682_v21, %v20681_v48  ;;  %vm20685_vm13 = vmmov %vm20676_vm11  ;;  %4736 = vmatprep.mubr.f32.mxu0 %v20444_v49 }
 0x2f0   :  { %15368 = vmatprep.subr.msk.mxu1 %vm20685_vm13, %v4326_v12  ;;  %vm20686_vm11 = vmmov %vm20680_vm9  ;;  %vm20687_vm9 = vnez %v20502_v58 }
 0x2f1   :  { %v4266_v38 = vsel %vm20686_vm11, %v20681_v48, %v20679_v3  ;;  %v4325_v24 = vsel %vm20687_vm9, %v4260_v50, 0.0  ;;  %vm20688_vm8 = vmmov %vm20684_vm10  ;;  %v17936_v3 = vpop.permute.xlu1 %6364 }
 0x2f2   :  { %15364 = vmatmul.mubr.msk.f32.vlgmr.msra.gmra.mrb[14].mxu1 %vm20688_vm8, %v17850_v20  ;;  %vm20689_vm5 = vmmov %vm20685_vm13 }
 0x2f3   :  { %15372 = vmatpush1.msk.msra.mxu0 %vm20689_vm5, %v4327_v22  ;;  %vm20690_vm12 = vmmov %vm20686_vm11  ;;  %4665 = vmatprep.mubr.f32.mxu1 %v20444_v49 }
 0x2f4   :  { %v4269_v56 = vsel %vm20690_vm12, %v4253_v14, %v17761_v54  ;;  %vm20691_vm10 = vmmov %vm20686_vm11  ;;  %vm20693_vm11 = vnez %v20508_v28  ;;  %v4330_v54 = vsel %vm17492_vm1, %v4265_v59, 0.0  ;;  %vm20696_vm12 = vcmask 31744   ;;  %v17943_v59 = vpop.permute.xlu0 %6366 }
 0x2f5   :  { %v4264_v12 = vsel %vm20691_vm10, %v20655_v1, %v20682_v21  ;;  %vm20692_vm13 = vmmov %vm20689_vm5  ;;  %v4332_v50 = vsel %vm20693_vm11, %v4267_v47, 0.0  ;;  %15373 = vmatmul.mubr.msk.f32.vlgmr.msra.gmra.mrb[18].mxu0 %vm20696_vm12, %v17850_v20  ;;  %vm20699_vm11 = vnez %v20531_v34  ;;  %v20704_v21 = vld [vmem:[#allocation6_spill] sm:$0xff] }
 0x2f6   :  { %15369 = vmatpush1.msk.msra.mxu1 %vm20692_vm13, %v4325_v24  ;;  %vm20694_vm8 = vmmov %vm20689_vm5  ;;  %vm20695_vm5 = vnez %v20516_v36  ;;  %vm20698_vm13 = vnez %v20527_v30  ;;  %v4329_v47 = vsel %vm20699_vm11, %v4264_v12, 0.0  ;;  %4878 = vmatprep.mubr.f32.mxu0 %v20444_v49  ;;  %v20712_v12 = vld [vmem:[#allocation19_spill] sm:$0xff] }
 0x2f7   :  { %15377 = vmatprep.subr.msk.mxu0 %vm20694_vm8, %v4332_v50  ;;  %v4331_v22 = vsel %vm20695_vm5, %v4266_v38, 0.0  ;;  %vm20697_vm10 = vmmov %vm20694_vm8  ;;  %v4334_v1 = vsel %vm20698_vm13, %v4269_v56, 0.0  ;;  %vm20702_vm5 = vcmask 7168   ;;  %v17955_v38 = vpop.permute.xlu1 %6368  ;;  %v20714_v50 = vld [vmem:[#allocation17_spill] sm:$0xff] }
 0x2f8   :  { %15374 = vmatprep.subr.msk.mxu1 %vm20697_vm10, %v4330_v54  ;;  %vm20700_vm8 = vmmov %vm20696_vm12  ;;  %v4268_v48 = vsel %vm20702_vm5, %v20678_v43, %v4253_v14  ;;  %v20708_v14 = vld [vmem:[#allocation5_spill] sm:$0xff]  ;;  %v17968_v56 = vpop.permute.xlu0 %6370 }
 0x2f9   :  { %15370 = vmatmul.mubr.msk.f32.vlgmr.msra.gmra.mrb[16].mxu1 %vm20700_vm8, %v17850_v20  ;;  %vm20701_vm1 = vmmov %vm20697_vm10  ;;  %v17966_v43 = vld [vmem:[%s20112_s5 + $0x20] sm:$0xff] }
 0x2fa   :  { %15378 = vmatpush1.msk.msra.mxu0 %vm20701_vm1, %v4331_v22  ;;  %vm20703_vm12 = vmmov %vm20701_vm1  ;;  %4807 = vmatprep.mubr.f32.mxu1 %v20444_v49  ;;  %v20717_v22 = vld [vmem:[#allocation18_spill] sm:$0xff] }
 0x2fb   :  { %15375 = vmatpush1.msk.msra.mxu1 %vm20703_vm12, %v4329_v47  ;;  %vm20705_vm10 = vmmov %vm20701_vm1  ;;  %15379 = vmatmul.mubr.msk.f32.vlgmr.msra.gmra.mrb[20].mxu0 %vm20700_vm8, %v17850_v20  ;;  %v17979_v54 = vpop.permute.xlu1 %7113  ;;  %v20720_v47 = vld [vmem:[#allocation16_spill] sm:$0xff] }
 0x2fc   :  { %15384 = vmatprep.subr.msk.mxu0 %vm20705_vm10, %v20704_v21  ;;  %vm20706_vm13 = vmmov %vm20701_vm1  ;;  %vm20707_vm1 = vnez %v20545_v7  ;;  %5073 = vmatprep.mubr.f32.mxu0 %v20444_v49  ;;  %v20724_v21 = vld [vmem:[#allocation7_spill] sm:$0xff] }
 0x2fd   :  { %15380 = vmatprep.subr.msk.mxu1 %vm20706_vm13, %v4334_v1  ;;  %v4333_v24 = vsel %vm20707_vm1, %v4268_v48, 0.0  ;;  %vm20709_vm5 = vmmov %vm20705_vm10  ;;  %v17985_v1 = vpop.permute.xlu0 %7115  ;;  %vm20292_vm1 = vcmask 1039360   ;;  %v20722_v48 = vld [vmem:[#allocation29_spill] sm:$0xff] }
 0x2fe   :  { %15385 = vmatpush1.msk.msra.mxu0 %vm20709_vm5, %v20708_v14  ;;  %vm20710_vm12 = vmmov %vm20700_vm8  ;;  %v20729_v14 = vld [vmem:[#allocation34_spill] sm:$0xff] }
 0x2ff   :  { %15376 = vmatmul.mubr.msk.f32.vlgmr.msra.gmra.mrb[18].mxu1 %vm20710_vm12, %v17850_v20  ;;  %vm20711_vm13 = vmmov %vm20709_vm5 }
 0x300   :  { %15381 = vmatpush1.msk.msra.mxu1 %vm20711_vm13, %v4333_v24  ;;  %vm20713_vm10 = vmmov %vm20709_vm5  ;;  %4949 = vmatprep.mubr.f32.mxu1 %v20444_v49  ;;  %v20728_v24 = vld [vmem:[#allocation39_spill] sm:$0xff] }
 0x301   :  { %15390 = vmatprep.subr.msk.mxu0 %vm20713_vm10, %v20712_v12  ;;  %vm20715_vm8 = vmmov %vm20709_vm5  ;;  %v5627_v12 = vsel %vm20292_vm1, %v20729_v14, %v20728_v24 }
 0x302   :  { %15387 = vmatprep.subr.msk.mxu1 %vm20715_vm8, %v20714_v50  ;;  %vm20716_vm5 = vmmov %vm20710_vm12  ;;  %v20730_v50 = vld [vmem:[#allocation28_spill] sm:$0xff] }
 0x303   :  { %15386 = vmatmul.mubr.msk.f32.vlgmr.msra.gmra.mrb[14].mxu0 %vm20716_vm5, %v17966_v43  ;;  %vm20718_vm12 = vmmov %vm20715_vm8 }
 0x304   :  { %15391 = vmatpush1.msk.msra.mxu0 %vm20718_vm12, %v20717_v22  ;;  %vm20719_vm13 = vmmov %vm20716_vm5  ;;  %5215 = vmatprep.mubr.f32.mxu0 %v20444_v49 }
 0x305   :  { %15382 = vmatmul.mubr.msk.f32.vlgmr.msra.gmra.mrb[20].mxu1 %vm20719_vm13, %v17850_v20  ;;  %vm20721_vm10 = vmmov %vm20715_vm8  ;;  %15396 = vmatprep.subr.msk.mxu0 %vm20715_vm8, %v16651_v39  ;;  %v17997_v20 = vpop.permute.xlu1 %7111  ;;  %v18003_v39 = vpop.permute.xlu0 %7117 }
 0x306   :  { %15388 = vmatpush1.msk.msra.mxu1 %vm20721_vm10, %v20720_v47  ;;  %vm20723_vm11 = vmmov %vm20715_vm8  ;;  %5144 = vmatprep.mubr.f32.mxu1 %v20444_v49  ;;  %20727 = vst [vmem:[#allocation36_spill] sm:$0xff] %v18003_v39  ;;  %v20733_v47 = vld [vmem:[#allocation49_spill] sm:$0xff]  ;;  %v20739_v39 = vld [vmem:[#allocation55_spill] sm:$0xff] }
 0x307   :  { %15393 = vmatprep.subr.msk.mxu1 %vm20723_vm11, %v20722_v48  ;;  %15392 = vmatmul.mubr.msk.f32.vlgmr.msra.gmra.mrb[16].mxu0 %vm20716_vm5, %v17966_v43  ;;  %vm20725_vm12 = vmmov %vm20715_vm8  ;;  %v5626_v48 = vsel %vm20292_vm1, %v20733_v47, %v20729_v14  ;;  %v20740_v14 = vld [vmem:[#allocation47_spill] sm:$0xff] }
 0x308   :  { %15397 = vmatpush1.msk.msra.mxu0 %vm20725_vm12, %v20724_v21  ;;  %vm20726_vm13 = vmmov %vm20716_vm5  ;;  %5357 = vmatprep.mubr.f32.mxu0 %v20444_v49  ;;  %v20738_v21 = vld [vmem:[#allocation52_spill] sm:$0xff]  ;;  %v5629_v7 = vsel %vm20292_vm1, %v20740_v14, %v20739_v39 }
 0x309   :  { %15389 = vmatmul.mubr.msk.f32.vlgmr.msra.gmra.mrb[14].mxu1 %vm20726_vm13, %v17966_v43  ;;  %vm20731_vm11 = vmmov %vm20715_vm8  ;;  %v5606_v22 = vpop.permute.xlu1 %5605 }
 0x30a   :  { %15394 = vmatpush1.msk.msra.mxu1 %vm20731_vm11, %v20730_v50  ;;  %vm20732_vm10 = vmmov %vm20715_vm8  ;;  %5286 = vmatprep.mubr.f32.mxu1 %v20444_v49  ;;  %vm20736_vm11 = vnez %v20523_v31  ;;  %v5631_v50 = vsel %vm20292_vm1, %v20738_v21, %v5606_v22 }
 0x30b   :  { %15402 = vmatprep.subr.msk.mxu0 %vm20732_vm10, %v16835_v32  ;;  %15399 = vmatprep.subr.msk.mxu1 %vm20715_vm8, %v16767_v57  ;;  %vm20734_vm12 = vmmov %vm20715_vm8  ;;  %v5692_v57 = vsel %vm20736_vm11, %v5627_v12, 0.0  ;;  %v5608_v32 = vpop.permute.xlu0 %5607  ;;  %v20746_v12 = vld [vmem:[#allocation64_spill] sm:$0xff]  ;;  %vm20756_vm11 = vnez %v20571_v23 }
 0x30c   :  { %15398 = vmatmul.mubr.msk.f32.vlgmr.msra.gmra.mrb[18].mxu0 %vm20716_vm5, %v17966_v43  ;;  %vm20735_vm13 = vmmov %vm20716_vm5 }
 0x30d   :  { %15403 = vmatpush1.msk.msra.mxu0 %vm20734_vm12, %v16839_v5  ;;  %15395 = vmatmul.mubr.msk.f32.vlgmr.msra.gmra.mrb[16].mxu1 %vm20735_vm13, %v17966_v43  ;;  %vm20737_vm10 = vmmov %vm20715_vm8  ;;  %vm20742_vm12 = vnez %v20538_v2 }
 0x30e   :  { %15400 = vmatpush1.msk.msra.mxu1 %vm20737_vm10, %v16759_v55  ;;  %15409 = vmatprep.subr.msk.mxu0 %vm20715_vm8, %v5692_v57  ;;  %vm20741_vm5 = vmmov %vm20715_vm8  ;;  %v5691_v5 = vsel %vm20742_vm12, %v5626_v48, 0.0  ;;  %v18043_v55 = vpop.permute.xlu1 %7119  ;;  %v18053_v57 = vld [vmem:[%s20112_s5 + $0x28] sm:$0xff]  ;;  %vm20764_vm12 = vcmask 31744  }
 0x30f   :  { %15405 = vmatprep.subr.msk.mxu1 %vm20741_vm5, %v16919_v19  ;;  %5499 = vmatprep.mubr.f32.mxu0 %v20444_v49  ;;  %20743 = vst [vmem:[#allocation35_spill] sm:$0xff] %v18043_v55  ;;  %vm20744_vm10 = vmmov %vm20741_vm5  ;;  %v5633_v19 = vsel %vm20292_vm1, %v5608_v32, %v20746_v12  ;;  %vm20747_vm5 = vnez %v20561_v33  ;;  %v18057_v31 = vpop.permute.xlu0 %7121  ;;  %v5630_v55 = vsel %vm20292_vm1, %v20739_v39, %v20738_v21  ;;  %v20752_v33 = vld [vmem:[#allocation61_spill] sm:$0xff] }
 0x310   :  { %5428 = vmatprep.mubr.f32.mxu1 %v20444_v49  ;;  %15404 = vmatmul.mubr.msk.f32.vlgmr.msra.gmra.mrb[20].mxu0 %vm20735_vm13, %v17966_v43  ;;  %vm20745_vm8 = vmmov %vm20735_vm13  ;;  %v5696_v48 = vsel %vm20747_vm5, %v5631_v50, 0.0  ;;  %v20751_v50 = vld [vmem:[#allocation77_spill] sm:$0xff]  ;;  %vm20753_vm5 = vcmask 31744  }
 0x311   :  { %15410 = vmatpush1.msk.msra.mxu0 %vm20744_vm10, %v5691_v5  ;;  %15401 = vmatmul.mubr.msk.f32.vlgmr.msra.gmra.mrb[18].mxu1 %vm20745_vm8, %v17966_v43  ;;  %v5628_v5 = vsel %vm20292_vm1, %v20728_v24, %v20740_v14  ;;  %vm20748_vm13 = vmmov %vm20744_vm10  ;;  %vm20749_vm10 = vnez %v20553_v9  ;;  %v5635_v24 = vsel %vm20292_vm1, %v20752_v33, %v20751_v50 }
 0x312   :  { %15406 = vmatpush1.msk.msra.mxu1 %vm20748_vm13, %v16943_v42  ;;  %v5694_v2 = vsel %vm20749_vm10, %v5629_v7, 0.0  ;;  %5824 = vmatprep.mubr.f32.mxu0 %v20444_v49  ;;  %vm20750_vm8 = vmmov %vm20748_vm13  ;;  %vm20755_vm10 = vnez %v20589_v11  ;;  %v5622_v7 = vpop.permute.xlu1 %5621  ;;  %v5693_v39 = vsel %vm20756_vm11, %v5628_v5, 0.0  ;;  %vm20762_vm11 = vnez %v20578_v37 }
 0x313   :  { %15412 = vmatprep.subr.msk.mxu1 %vm20750_vm8, %v5694_v2  ;;  %5570 = vmatprep.mubr.f32.mxu1 %v20444_v49  ;;  %vm20754_vm13 = vmmov %vm20750_vm8  ;;  %v5698_v42 = vsel %vm20755_vm10, %v5633_v19, 0.0  ;;  %v5634_v2 = vsel %vm20292_vm1, %v20746_v12, %v20752_v33  ;;  %v5624_v21 = vpop.permute.xlu0 %5623  ;;  %v5639_v19 = vsel %vm20292_vm1, %v17556_v60, %v5622_v7  ;;  %v20759_v33 = vld [vmem:[#allocation75_spill] sm:$0xff] }
 0x314   :  { %15411 = vmatmul.mubr.msk.f32.vlgmr.msra.gmra.mrb[14].mxu0 %vm20753_vm5, %v18053_v57  ;;  %15415 = vmatprep.subr.msk.mxu0 %vm20754_vm13, %v5696_v48  ;;  %vm20757_vm8 = vmmov %vm20753_vm5  ;;  %vm20758_vm5 = vnez %v20565_v51  ;;  %v5632_v48 = vsel %vm20292_vm1, %v5606_v22, %v5608_v32  ;;  %v5637_v12 = vsel %vm20292_vm1, %v20759_v33, %v17593_v52 }
 0x315   :  { %15407 = vmatmul.mubr.msk.f32.vlgmr.msra.gmra.mrb[20].mxu1 %vm20757_vm8, %v17966_v43  ;;  %5966 = vmatprep.mubr.f32.mxu0 %v20444_v49  ;;  %v5695_v14 = vsel %vm20758_vm5, %v5630_v55, 0.0  ;;  %vm20760_vm8 = vmmov %vm20754_vm13  ;;  %v5700_v43 = vsel %vm20762_vm11, %v5635_v24, 0.0  ;;  %vm20763_vm5 = vnez %v20582_v35  ;;  %v5638_v55 = vsel %vm20292_vm1, %v17593_v52, %v17556_v60 }
 0x316   :  { %15413 = vmatpush1.msk.msra.mxu1 %vm20754_vm13, %v5693_v39  ;;  %5895 = vmatprep.mubr.f32.mxu1 %v20444_v49  ;;  %vm20761_vm10 = vmmov %vm20760_vm8  ;;  %v5699_v22 = vsel %vm20763_vm5, %v5634_v2, 0.0  ;;  %vm20304_vm13 = vcmask 793600   ;;  %v18107_v32 = vpop.permute.xlu1 %7127  ;;  %v5697_v5 = vsel %vm17711_vm0, %v5632_v48, 0.0  ;;  %v5658_v24 = vsel %vm20292_vm1, %v5624_v21, %v20733_v47 }
 0x317   :  { %15418 = vmatprep.subr.msk.mxu1 %vm20760_vm8, %v5698_v42  ;;  %15416 = vmatpush1.msk.msra.mxu0 %vm20761_vm10, %v5695_v14  ;;  %vm20765_vm9 = vmmov %vm20760_vm8  ;;  %v5704_v42 = vsel %vm17735_vm15, %v5639_v19, 0.0  ;;  %v18121_v39 = vpop.permute.xlu0 %7129  ;;  %v5636_v60 = vsel %vm20292_vm1, %v20751_v50, %v20759_v33  ;;  %v5702_v52 = vsel %vm17751_vm4, %v5637_v12, 0.0  ;;  %v1760_v2 = vand.u32 1023, %v17289_v63 }
 0x318   :  { %15417 = vmatmul.mubr.msk.f32.vlgmr.msra.gmra.mrb[16].mxu0 %vm20764_vm12, %v18053_v57  ;;  %15421 = vmatprep.subr.msk.mxu0 %vm20765_vm9, %v5700_v43  ;;  %vm20766_vm10 = vmmov %vm20764_vm12  ;;  %v5703_v47 = vsel %vm17741_vm14, %v5638_v55, 0.0  ;;  %v6378_v50 = vsel %vm20304_vm13, %v17705_v61, %v17668_v4  ;;  %v5706_v14 = vsel %vm17757_vm3, %v5658_v24, 0.0  ;;  %v6377_v33 = vsel %vm20304_vm13, %v17808_v26, %v17705_v61 }
 0x319   :  { %15414 = vmatmul.mubr.msk.f32.vlgmr.msra.gmra.mrb[14].mxu1 %vm20766_vm10, %v18053_v57  ;;  %15422 = vmatpush1.msk.msra.mxu0 %vm20760_vm8, %v5699_v22  ;;  %vm20767_vm9 = vmmov %vm20760_vm8  ;;  %vm18156_vm14 = vcmp.lt.s32.totalorder %v1760_v2, 992  ;;  %v20774_v55 = vmov 0  ;;  %v6380_v61 = vsel %vm20304_vm13, %v17775_v29, %v17876_v40 }
 0x31a   :  { %15419 = vmatpush1.msk.msra.mxu1 %vm20767_vm9, %v5697_v5  ;;  %6037 = vmatprep.mubr.f32.mxu1 %v20444_v49  ;;  %vm20768_vm12 = vmmov %vm20760_vm8  ;;  %v6357_v48 = vpop.permute.xlu1 %6356  ;;  %vm20769_vm9 = vnez %v20628_v44  ;;  %v20775_v55 = vsel %vm18156_vm14, 4294967295, %v20774_v55  ;;  %v6458_v5 = vsel %vm17269_vm7, %v6377_v33, 0.0 }
 0x31b   :  { %15424 = vmatprep.subr.msk.mxu1 %vm20768_vm12, %v5702_v52  ;;  %6108 = vmatprep.mubr.f32.mxu0 %v20444_v49  ;;  %v5701_v19 = vsel %vm20769_vm9, %v5636_v60, 0.0  ;;  %vm20770_vm12 = vmmov %vm20766_vm10  ;;  %v6359_v12 = vpop.permute.xlu0 %6358  ;;  %v6382_v22 = vsel %vm20304_vm13, %v17852_v10, %v6357_v48  ;;  %20776 = vst [vmem:[#allocation40_spill] sm:$0xff] %v20775_v55  ;;  %v20781_v60 = vld [vmem:[#allocation30_spill] sm:$0xff] }
 0x31c   :  { %15423 = vmatmul.mubr.msk.f32.vlgmr.msra.gmra.mrb[18].mxu0 %vm20766_vm10, %v18053_v57  ;;  %15427 = vmatprep.subr.msk.mxu0 %vm20760_vm8, %v5704_v42  ;;  %vm20771_vm1 = vmmov %vm20760_vm8  ;;  %vm20772_vm10 = vcmask 1039360   ;;  %v6381_v42 = vsel %vm20304_vm13, %v17876_v40, %v17852_v10  ;;  %v6384_v2 = vsel %vm20304_vm13, %v6359_v12, %v17904_v17  ;;  %v6379_v40 = vsel %vm20304_vm13, %v17668_v4, %v17775_v29 }
 0x31d   :  { %15420 = vmatmul.mubr.msk.f32.vlgmr.msra.gmra.mrb[16].mxu1 %vm20770_vm12, %v18053_v57  ;;  %15428 = vmatpush1.msk.msra.mxu0 %vm20771_vm1, %v5703_v47  ;;  %v5640_v43 = vsel %vm20772_vm10, %v5622_v7, %v5624_v21  ;;  %vm20773_vm8 = vmmov %vm20771_vm1  ;;  %vm20780_vm10 = vcmask 31744   ;;  %v18187_v47 = vld [vmem:[%s20112_s5 + $0x30] sm:$0xff]  ;;  %v6386_v4 = vsel %vm20304_vm13, %v17916_v15, %v17936_v3 }
 0x31e   :  { %15425 = vmatpush1.msk.msra.mxu1 %vm20773_vm8, %v5701_v19  ;;  %6179 = vmatprep.mubr.f32.mxu1 %v20444_v49  ;;  %vm20777_vm12 = vmmov %vm20771_vm1  ;;  %vm20778_vm1 = vnez %v20453_v18  ;;  %v18172_v24 = vpop.permute.xlu1 %7131  ;;  %v5705_v52 = vsel %vm17818_vm2, %v5640_v43, 0.0  ;;  %v20786_v19 = vld [vmem:[#allocation73_spill] sm:$0xff]  ;;  %vm20814_vm2 = vcmask 31744  }
 0x31f   :  { %15430 = vmatprep.subr.msk.mxu1 %vm20777_vm12, %v5706_v14  ;;  %6250 = vmatprep.mubr.f32.mxu0 %v20444_v49  ;;  %v6459_v7 = vsel %vm20778_vm1, %v6378_v50, 0.0  ;;  %vm20782_vm12 = vmmov %vm20780_vm10  ;;  %v18195_v10 = vpop.permute.xlu0 %7133  ;;  %v1768_v33 = vand.u32 1023, %v20786_v19 }
 0x320   :  { %15429 = vmatmul.mubr.msk.f32.vlgmr.msra.gmra.mrb[20].mxu0 %vm20780_vm10, %v18053_v57  ;;  %15434 = vmatprep.subr.msk.mxu0 %vm20773_vm8, %v6459_v7  ;;  %vm20783_vm1 = vmmov %vm20773_vm8  ;;  %vm20784_vm10 = vnez %v20662_v53  ;;  %vm20788_vm8 = vnez %v20664_v13  ;;  %v6385_v7 = vsel %vm20304_vm13, %v17904_v17, %v17916_v15  ;;  %v6388_v17 = vsel %vm20304_vm13, %v17943_v59, %v17955_v38  ;;  %v20800_v15 = vld [vmem:[#allocation71_spill] sm:$0xff] }
 0x321   :  { %15426 = vmatmul.mubr.msk.f32.vlgmr.msra.gmra.mrb[18].mxu1 %vm20782_vm12, %v18053_v57  ;;  %15435 = vmatpush1.msk.msra.mxu0 %vm20783_vm1, %v6458_v5  ;;  %v6463_v50 = vsel %vm20784_vm10, %v6382_v22, 0.0  ;;  %vm20785_vm12 = vnez %v20659_v16  ;;  %vm20787_vm10 = vmmov %vm20783_vm1  ;;  %v6462_v43 = vsel %vm20788_vm8, %v6381_v42, 0.0  ;;  %v6383_v42 = vsel %vm20304_vm13, %v6357_v48, %v6359_v12 }
 0x322   :  { %15431 = vmatpush1.msk.msra.mxu1 %vm20783_vm1, %v5705_v52  ;;  %v6461_v14 = vsel %vm20785_vm12, %v6380_v61, 0.0  ;;  %6321 = vmatprep.mubr.f32.mxu1 %v20444_v49  ;;  %vm20789_vm1 = vcmask 31744   ;;  %vm20790_vm7 = vmmov %vm20787_vm10  ;;  %v6373_v22 = vpop.permute.xlu1 %6372 }
 0x323   :  { %15437 = vmatprep.subr.msk.mxu1 %vm20787_vm10, %v6461_v14  ;;  %6591 = vmatprep.mubr.f32.mxu0 %v20444_v49  ;;  %vm20791_vm12 = vmand %vm18156_vm14, %vm20673_vm6  ;;  %vm20792_vm10 = vnez %v20668_v46  ;;  %v6375_v5 = vpop.permute.xlu0 %6374  ;;  %v6390_v52 = vsel %vm20304_vm13, %v17968_v56, %v6373_v22  ;;  %vm20803_vm6 = vcmask 31744  }
 0x324   :  { %15436 = vmatmul.mubr.msk.f32.vlgmr.msra.gmra.mrb[14].mxu0 %vm20789_vm1, %v18187_v47  ;;  %15440 = vmatprep.subr.msk.mxu0 %vm20790_vm7, %v6463_v50  ;;  %v6465_v29 = vsel %vm20791_vm12, %v6384_v2, 0.0  ;;  %v6460_v61 = vsel %vm20792_vm10, %v6379_v40, 0.0  ;;  %vm20793_vm8 = vmmov %vm20789_vm1  ;;  %vm18233_vm12 = vcmp.lt.s32.totalorder %v1768_v33, 992  ;;  %v20796_v2 = vmov 0 }
 0x325   :  { %15432 = vmatmul.mubr.msk.f32.vlgmr.msra.gmra.mrb[20].mxu1 %vm20793_vm8, %v18053_v57  ;;  %vm20794_vm1 = vmmov %vm20790_vm7  ;;  %v20797_v2 = vsel %vm18233_vm12, 4294967295, %v20796_v2  ;;  %6733 = vmatprep.mubr.f32.mxu0 %v20444_v49  ;;  %v6389_v50 = vsel %vm20304_vm13, %v17955_v38, %v17968_v56  ;;  %v6409_v14 = vsel %vm20304_vm13, %v6375_v5, %v17808_v26  ;;  %v6387_v56 = vsel %vm20304_vm13, %v17936_v3, %v17943_v59 }
 0x326   :  { %15441 = vmatpush1.msk.msra.mxu0 %vm20794_vm1, %v6462_v43  ;;  %vm20795_vm7 = vmmov %vm20794_vm1  ;;  %6662 = vmatprep.mubr.f32.mxu1 %v20444_v49  ;;  %20798 = vst [vmem:[#allocation42_spill] sm:$0xff] %v20797_v2  ;;  %v18249_v12 = vpop.permute.xlu1 %7135 }
 0x327   :  { %15438 = vmatpush1.msk.msra.mxu1 %vm20795_vm7, %v6460_v61  ;;  %vm20799_vm8 = vmmov %vm20794_vm1  ;;  %vm20801_vm1 = vnez %v20800_v15  ;;  %vm20802_vm7 = vnez %v20485_v25  ;;  %v18267_v38 = vpop.permute.xlu0 %7137  ;;  %v20966_v25 = vmov 0 }
 0x328   :  { %15443 = vmatprep.subr.msk.mxu1 %vm20799_vm8, %v6465_v29  ;;  %v6467_v57 = vsel %vm20801_vm1, %v6386_v4, 0.0  ;;  %v6466_v48 = vsel %vm20802_vm7, %v6385_v7, 0.0  ;;  %15442 = vmatmul.mubr.msk.f32.vlgmr.msra.gmra.mrb[16].mxu0 %vm20803_vm6, %v18187_v47  ;;  %vm20804_vm10 = vmmov %vm20799_vm8  ;;  %vm20805_vm8 = vnez %v20502_v58  ;;  %vm20820_vm7 = vcmask 793600  }
 0x329   :  { %15446 = vmatprep.subr.msk.mxu0 %vm20804_vm10, %v6467_v57  ;;  %v6464_v40 = vsel %vm20805_vm8, %v6383_v42, 0.0  ;;  %vm20806_vm15 = vmmov %vm20803_vm6  ;;  %vm20808_vm6 = vnez %v20508_v28  ;;  %6875 = vmatprep.mubr.f32.mxu0 %v20444_v49  ;;  %v6391_v61 = vsel %vm20820_vm7, %v6373_v22, %v6375_v5  ;;  %v20827_v5 = vld [vmem:[#allocation86_spill] sm:$0xff]  ;;  %v20959_v28 = vmov 0 }
 0x32a   :  { %15439 = vmatmul.mubr.msk.f32.vlgmr.msra.gmra.mrb[14].mxu1 %vm20806_vm15, %v18187_v47  ;;  %vm20807_vm1 = vmmov %vm20804_vm10  ;;  %v6471_v33 = vsel %vm20808_vm6, %v6390_v52, 0.0  ;;  %vm20809_vm10 = vnez %v20527_v30  ;;  %vm20813_vm6 = vnez %v20516_v36  ;;  %v7124_v59 = vpop.permute.xlu1 %7123  ;;  %v20970_v58 = vmov 0 }
 0x32b   :  { %15447 = vmatpush1.msk.msra.mxu0 %vm20807_vm1, %v6466_v48  ;;  %vm20810_vm15 = vmmov %vm20807_vm1  ;;  %vm20811_vm1 = vnez %v20512_v8  ;;  %6804 = vmatprep.mubr.f32.mxu1 %v20444_v49  ;;  %v6470_v26 = vsel %vm20813_vm6, %v6389_v50, 0.0  ;;  %v7126_v29 = vpop.permute.xlu0 %7125  ;;  %v20833_v50 = vld [vmem:[#allocation35_spill] sm:$0xff] }
 0x32c   :  { %15444 = vmatpush1.msk.msra.mxu1 %vm20810_vm15, %v6464_v40  ;;  %v6469_v43 = vsel %vm20811_vm1, %v6388_v17, 0.0  ;;  %vm20812_vm8 = vmmov %vm20810_vm15  ;;  %15448 = vmatmul.mubr.msk.f32.vlgmr.msra.gmra.mrb[18].mxu0 %vm20814_vm2, %v18187_v47  ;;  %v20834_v40 = vld [vmem:[#allocation36_spill] sm:$0xff] }
 0x32d   :  { %15449 = vmatprep.subr.msk.mxu1 %vm20812_vm8, %v6469_v43  ;;  %vm20815_vm3 = vmmov %vm20812_vm8  ;;  %vm20817_vm8 = vnez %v20531_v34  ;;  %7017 = vmatprep.mubr.f32.mxu0 %v20444_v49 }
 0x32e   :  { %15452 = vmatprep.subr.msk.mxu0 %vm20815_vm3, %v6471_v33  ;;  %vm20816_vm15 = vmand %vm18233_vm12, %vm20809_vm10  ;;  %v6468_v4 = vsel %vm20817_vm8, %v6387_v56, 0.0  ;;  %v7865_v22 = vpop.permute.xlu1 %7864 }
 0x32f   :  { %v6473_v3 = vsel %vm20816_vm15, %v6409_v14, 0.0  ;;  %vm20818_vm13 = vmmov %vm20814_vm2  ;;  %vm20823_vm15 = vcmask 785408   ;;  %v7867_v48 = vpop.permute.xlu0 %7866 }
 0x330   :  { %15445 = vmatmul.mubr.msk.f32.vlgmr.msra.gmra.mrb[16].mxu1 %vm20818_vm13, %v18187_v47  ;;  %vm20819_vm6 = vmmov %vm20815_vm3  ;;  %v7145_v7 = vsel %vm20823_vm15, %v17979_v54, %v17985_v1 }
 0x331   :  { %15453 = vmatpush1.msk.msra.mxu0 %vm20819_vm6, %v6470_v26  ;;  %vm20821_vm2 = vmmov %vm20815_vm3  ;;  %6946 = vmatprep.mubr.f32.mxu1 %v20444_v49  ;;  %vm20825_vm6 = vcmask 31744  }
 0x332   :  { %15450 = vmatpush1.msk.msra.mxu1 %vm20821_vm2, %v6468_v4  ;;  %vm20822_vm3 = vmmov %vm20821_vm2  ;;  %15454 = vmatmul.mubr.msk.f32.vlgmr.msra.gmra.mrb[20].mxu0 %vm20825_vm6, %v18187_v47  ;;  %v7140_v43 = vpop.permute.xlu1 %7139 }
 0x333   :  { %15455 = vmatprep.subr.msk.mxu1 %vm20822_vm3, %v6473_v3  ;;  %vm20824_vm13 = vmmov %vm20823_vm15  ;;  %7342 = vmatprep.mubr.f32.mxu0 %v20444_v49  ;;  %v7142_v3 = vpop.permute.xlu0 %7141 }
 0x334   :  { %v7144_v42 = vsel %vm20824_vm13, %v17997_v20, %v17979_v54  ;;  %vm20826_vm7 = vmmov %vm20821_vm2  ;;  %vm20828_vm2 = vnez %v20827_v5  ;;  %v18317_v54 = vld [vmem:[%s20112_s5 + $0x38] sm:$0xff]  ;;  %v7149_v57 = vsel %vm20824_vm13, %v18057_v31, %v7124_v59 }
 0x335   :  { %15459 = vmatprep.subr.msk.mxu0 %vm20826_vm7, %v7145_v7  ;;  %v6472_v52 = vsel %vm20828_vm2, %v6391_v61, 0.0  ;;  %vm20829_vm3 = vmmov %vm20825_vm6  ;;  %vm20306_vm2 = vcmask 777216  }
 0x336   :  { %15451 = vmatmul.mubr.msk.f32.vlgmr.msra.gmra.mrb[18].mxu1 %vm20829_vm3, %v18187_v47  ;;  %vm20830_vm10 = vmmov %vm20826_vm7  ;;  %v7896_v7 = vsel %vm20306_vm2, %v7865_v22, %v7867_v48 }
 0x337   :  { %15460 = vmatpush1.msk.msra.mxu0 %vm20830_vm10, %v7144_v42  ;;  %vm20831_vm15 = vmmov %vm20824_vm13  ;;  %7088 = vmatprep.mubr.f32.mxu1 %v20444_v49 }
 0x338   :  { %v7151_v17 = vsel %vm20831_vm15, %v7126_v29, %v18107_v32  ;;  %vm20832_vm6 = vmmov %vm20826_vm7  ;;  %vm20838_vm15 = vcmask 31744  }
 0x339   :  { %15456 = vmatpush1.msk.msra.mxu1 %vm20832_vm6, %v6472_v52  ;;  %vm20835_vm7 = vmmov %vm20824_vm13  ;;  %15461 = vmatmul.mubr.msk.f32.vlgmr.msra.gmra.mrb[14].mxu0 %vm20838_vm15, %v18317_v54  ;;  %v7216_v56 = vsel %vm18156_vm14, %v7151_v17, 0.0  ;;  %v20864_v17 = vld [vmem:[#allocation82_spill] sm:$0xff] }
 0x33a   :  { %v7147_v14 = vsel %vm20835_vm7, %v20834_v40, %v20833_v50  ;;  %vm20836_vm10 = vmmov %vm20832_vm6  ;;  %7484 = vmatprep.mubr.f32.mxu0 %v20444_v49 }
 0x33b   :  { %15462 = vmatprep.subr.msk.mxu1 %vm20836_vm10, %v7147_v14  ;;  %vm20837_vm3 = vmmov %vm20835_vm7  ;;  %v18410_v14 = vld [vmem:[%s20112_s5 + $0x40] sm:$0xff] }
 0x33c   :  { %v7148_v33 = vsel %vm20837_vm3, %v20833_v50, %v18057_v31  ;;  %vm20839_vm13 = vmmov %vm20832_vm6 }
 0x33d   :  { %15465 = vmatprep.subr.msk.mxu0 %vm20839_vm13, %v7149_v57  ;;  %vm20840_vm6 = vmmov %vm20837_vm3 }
 0x33e   :  { %v7146_v26 = vsel %vm20840_vm6, %v17985_v1, %v20834_v40  ;;  %vm20841_vm7 = vmmov %vm20838_vm15  ;;  %15466 = vmatpush1.msk.msra.mxu0 %vm20836_vm10, %v7148_v33  ;;  %v7152_v1 = vsel %vm20840_vm6, %v18107_v32, %v18121_v39  ;;  %v18363_v32 = vpop.permute.xlu1 %7862 }
 0x33f   :  { %15457 = vmatmul.mubr.msk.f32.vlgmr.msra.gmra.mrb[20].mxu1 %vm20841_vm7, %v18187_v47  ;;  %vm20842_vm3 = vmmov %vm20836_vm10  ;;  %vm20846_vm10 = vcmask 31744  }
 0x340   :  { %15463 = vmatpush1.msk.msra.mxu1 %vm20842_vm3, %v7146_v26  ;;  %7413 = vmatprep.mubr.f32.mxu1 %v20444_v49  ;;  %vm20843_vm15 = vmmov %vm20842_vm3 }
 0x341   :  { %15468 = vmatprep.subr.msk.mxu1 %vm20843_vm15, %v7216_v56  ;;  %vm20844_vm13 = vmmov %vm20840_vm6  ;;  %15467 = vmatmul.mubr.msk.f32.vlgmr.msra.gmra.mrb[16].mxu0 %vm20846_vm10, %v18317_v54 }
 0x342   :  { %v7153_v31 = vsel %vm20844_vm13, %v18121_v39, %v18172_v24  ;;  %vm20845_vm7 = vmmov %vm20842_vm3  ;;  %7626 = vmatprep.mubr.f32.mxu0 %v20444_v49 }
 0x343   :  { %15471 = vmatprep.subr.msk.mxu0 %vm20845_vm7, %v7153_v31  ;;  %vm20847_vm3 = vmmov %vm20840_vm6  ;;  %v16396_v31 = vmov 1  }
 0x344   :  { %v7150_v47 = vsel %vm20847_vm3, %v7124_v59, %v7126_v29  ;;  %vm20848_vm15 = vmmov %vm20846_vm10  ;;  %v7869_v59 = vpop.permute.xlu0 %7868  ;;  %16347 = vset.pattern.permute.xlu1 %v16396_v31 }
 0x345   :  { %15464 = vmatmul.mubr.msk.f32.vlgmr.msra.gmra.mrb[14].mxu1 %vm20848_vm15, %v18317_v54  ;;  %vm20849_vm8 = vmmov %vm20845_vm7  ;;  %v7897_v33 = vsel %vm20306_vm2, %v7867_v48, %v7869_v59  ;;  %v8734_v48 = vld [vmem:[%s20110_s3] sm:$0xff] }
 0x346   :  { %15472 = vmatpush1.msk.msra.mxu0 %vm20849_vm8, %v7152_v1  ;;  %vm20850_vm1 = vmmov %vm20847_vm3  ;;  %7555 = vmatprep.mubr.f32.mxu1 %v20444_v49 }
 0x347   :  { %v7176_v4 = vsel %vm20850_vm1, %v7142_v3, %v17997_v20  ;;  %vm20851_vm13 = vmmov %vm20850_vm1  ;;  %v7895_v20 = vsel %vm20306_vm2, %v18363_v32, %v7865_v22  ;;  %v7156_v29 = vsel %vm20850_vm1, %v18249_v12, %v18267_v38  ;;  %v7871_v22 = vpop.permute.xlu1 %7870  ;;  %8875 = vperm.xlu1 %16347, %v8734_v48  }
 0x348   :  { %v7157_v61 = vsel %vm20851_vm13, %v18267_v38, %v7140_v43  ;;  %vm20852_vm6 = vmmov %vm20845_vm7  ;;  %v7224_v42 = vsel %vm18233_vm12, %v7176_v4, 0.0  ;;  %v7873_v57 = vpop.permute.xlu0 %7872 }
 0x349   :  { %15469 = vmatpush1.msk.msra.mxu1 %vm20852_vm6, %v7150_v47  ;;  %vm20853_vm7 = vmmov %vm20850_vm1  ;;  %v20876_v47 = vld [vmem:[#allocation88_spill] sm:$0xff] }
 0x34a   :  { %v7155_v39 = vsel %vm20853_vm7, %v18195_v10, %v18249_v12  ;;  %vm20854_vm10 = vmmov %vm20852_vm6  ;;  %v20861_v12 = vld [vmem:[#allocation85_spill] sm:$0xff] }
 0x34b   :  { %15474 = vmatprep.subr.msk.mxu1 %vm20854_vm10, %v7155_v39  ;;  %vm20855_vm8 = vmmov %vm20848_vm15  ;;  %vm20862_vm10 = vnez %v20861_v12  ;;  %v7875_v56 = vpop.permute.xlu1 %7874  ;;  %v20952_v12 = vmov 0 }
 0x34c   :  { %15473 = vmatmul.mubr.msk.f32.vlgmr.msra.gmra.mrb[18].mxu0 %vm20855_vm8, %v18317_v54  ;;  %vm20856_vm3 = vmmov %vm20852_vm6  ;;  %v7976_v38 = vsel %vm20862_vm10, %v7895_v20, 0.0  ;;  %v7900_v26 = vsel %vm20306_vm2, %v7873_v57, %v7875_v56 }
 0x34d   :  { %15477 = vmatprep.subr.msk.mxu0 %vm20856_vm3, %v7157_v61  ;;  %vm20857_vm15 = vmmov %vm20850_vm1  ;;  %7768 = vmatprep.mubr.f32.mxu0 %v20444_v49 }
 0x34e   :  { %v7154_v52 = vsel %vm20857_vm15, %v18172_v24, %v18195_v10  ;;  %vm20858_vm13 = vmmov %vm20855_vm8  ;;  %vm20865_vm8 = vnez %v20864_v17  ;;  %v7898_v10 = vsel %vm20306_vm2, %v7869_v59, %v7871_v22  ;;  %v20954_v17 = vld [vmem:[#allocation63_spill] sm:$0xff] }
 0x34f   :  { %15470 = vmatmul.mubr.msk.f32.vlgmr.msra.gmra.mrb[16].mxu1 %vm20858_vm13, %v18317_v54  ;;  %vm20859_vm6 = vmmov %vm20856_vm3  ;;  %v7977_v24 = vsel %vm20865_vm8, %v7896_v7, 0.0  ;;  %v8724_v5 = vshra.s32 %v20954_v17, 10  ;;  %v20965_v17 = vld [vmem:[#allocation78_spill] sm:$0xff] }
 0x350   :  { %15478 = vmatpush1.msk.msra.mxu0 %vm20859_vm6, %v7156_v29  ;;  %vm20860_vm7 = vmmov %vm20856_vm3  ;;  %7697 = vmatprep.mubr.f32.mxu1 %v20444_v49  ;;  %vm20869_vm6 = vcmask 785408   ;;  %v16397_v29 = vmov 0   ;;  %v8732_v8 = vshra.s32 %v20965_v17, 10 }
 0x351   :  { %15475 = vmatpush1.msk.msra.mxu1 %vm20860_vm7, %v7154_v52  ;;  %vm20863_vm1 = vmmov %vm20856_vm3  ;;  %v7158_v40 = vsel %vm20869_vm6, %v7140_v43, %v7142_v3  ;;  %v7899_v43 = vsel %vm20306_vm2, %v7871_v22, %v7873_v57  ;;  %v7877_v3 = vpop.permute.xlu0 %7876  ;;  %16346 = vset.pattern.permute.xlu0 %v16397_v29  ;;  %v8735_v52 = vld [vmem:[%s20111_s4] sm:$0xff] }
 0x352   :  { %15480 = vmatprep.subr.msk.mxu1 %vm20863_vm1, %v7224_v42  ;;  %vm20866_vm3 = vmmov %vm20863_vm1  ;;  %16348 = vset.pattern.permute.xlu1 %v16397_v29 }
 0x353   :  { %15484 = vmatprep.subr.msk.mxu0 %vm20866_vm3, %v7977_v24  ;;  %vm20867_vm15 = vmmov %vm20858_vm13  ;;  %vm20868_vm13 = vnez %v20553_v9  ;;  %8786 = vperm.xlu0 %16346, %v8734_v48   ;;  %v20950_v9 = vmov 0 }
 0x354   :  { %15479 = vmatmul.mubr.msk.f32.vlgmr.msra.gmra.mrb[20].mxu0 %vm20867_vm15, %v18317_v54  ;;  %v7979_v50 = vsel %vm20868_vm13, %v7898_v10, 0.0  ;;  %vm20870_vm7 = vmmov %vm20867_vm15  ;;  %vm20879_vm13 = vnez %v20565_v51  ;;  %8807 = vperm.xlu1 %16348, %v8735_v52  }
 0x355   :  { %15476 = vmatmul.mubr.msk.f32.vlgmr.msra.gmra.mrb[18].mxu1 %vm20870_vm7, %v18317_v54  ;;  %15485 = vmatpush1.msk.msra.mxu0 %vm20863_vm1, %v7976_v38  ;;  %vm20871_vm3 = vmmov %vm20863_vm1  ;;  %v7980_v61 = vsel %vm20879_vm13, %v7899_v43, 0.0  ;;  %v7881_v20 = vpop.permute.xlu0 %7880 }
 0x356   :  { %15481 = vmatpush1.msk.msra.mxu1 %vm20871_vm3, %v7158_v40  ;;  %7839 = vmatprep.mubr.f32.mxu1 %v20444_v49  ;;  %vm20872_vm15 = vmmov %vm20863_vm1  ;;  %vm20877_vm3 = vnez %v20876_v47  ;;  %v20949_v47 = vld [vmem:[#allocation69_spill] sm:$0xff] }
 0x357   :  { %8109 = vmatprep.mubr.f32.mxu0 %v20444_v49  ;;  %15487 = vmatprep.subr.msk.mxu1 %vm20872_vm15, %v7979_v50  ;;  %vm20873_vm6 = vmmov %vm20870_vm7  ;;  %vm20874_vm7 = vnez %v20571_v23  ;;  %v7981_v4 = vsel %vm20877_vm3, %v7900_v26, 0.0  ;;  %v8731_v23 = vshra.s32 %v20949_v47, 10 }
 0x358   :  { %15486 = vmatmul.mubr.msk.f32.vlgmr.msra.gmra.mrb[14].mxu0 %vm20873_vm6, %v18410_v14  ;;  %v7978_v1 = vsel %vm20874_vm7, %v7897_v33, 0.0  ;;  %vm20875_vm1 = vmmov %vm20873_vm6  ;;  %vm20878_vm6 = vnez %v20589_v11  ;;  %vm20880_vm7 = vcmask 777216   ;;  %16349 = vset.pattern.permute.xlu1 %v16396_v31  ;;  %v20946_v11 = vld [vmem:[#allocation66_spill] sm:$0xff] }
 0x359   :  { %15482 = vmatmul.mubr.msk.f32.vlgmr.msra.gmra.mrb[20].mxu1 %vm20875_vm1, %v18317_v54  ;;  %8251 = vmatprep.mubr.f32.mxu0 %v20444_v49  ;;  %v7901_v39 = vsel %vm20880_vm7, %v7875_v56, %v7877_v3  ;;  %vm20881_vm1 = vmmov %vm20872_vm15  ;;  %v7879_v54 = vpop.permute.xlu1 %7878  ;;  %v7885_v10 = vpop.permute.xlu0 %7884  ;;  %v8729_v51 = vshra.s32 %v20946_v11, 10 }
 0x35a   :  { %15488 = vmatpush1.msk.msra.mxu1 %vm20872_vm15, %v7978_v1  ;;  %8180 = vmatprep.mubr.f32.mxu1 %v20444_v49  ;;  %vm20882_vm3 = vmmov %vm20880_vm7  ;;  %vm20884_vm15 = vcmask 31744   ;;  %v7982_v42 = vsel %vm17711_vm0, %v7901_v39, 0.0 }
 0x35b   :  { %15490 = vmatprep.subr.msk.mxu0 %vm20881_vm1, %v7981_v4  ;;  %v7902_v59 = vsel %vm20882_vm3, %v7877_v3, %v7879_v54  ;;  %vm20883_vm10 = vmmov %vm20881_vm1  ;;  %8911 = vperm.xlu1 %16349, %v8735_v52  }
 0x35c   :  { %15491 = vmatpush1.msk.msra.mxu0 %vm20883_vm10, %v7980_v61  ;;  %vm20885_vm2 = vmmov %vm20884_vm15 }
 0x35d   :  { %15489 = vmatmul.mubr.msk.f32.vlgmr.msra.gmra.mrb[14].mxu1 %vm20884_vm15, %v18410_v14  ;;  %15492 = vmatmul.mubr.msk.f32.vlgmr.msra.gmra.mrb[16].mxu0 %vm20885_vm2, %v18410_v14  ;;  %vm20886_vm7 = vmand %vm18156_vm14, %vm20878_vm6  ;;  %vm20889_vm2 = vcmask 777216   ;;  %v7883_v22 = vpop.permute.xlu1 %7882  ;;  %v7889_v43 = vpop.permute.xlu0 %7888 }
 0x35e   :  { %v7983_v7 = vsel %vm20886_vm7, %v7902_v59, 0.0  ;;  %vm20887_vm3 = vmmov %vm20881_vm1  ;;  %8322 = vmatprep.mubr.f32.mxu1 %v20444_v49  ;;  %8393 = vmatprep.mubr.f32.mxu0 %v20444_v49  ;;  %v7903_v38 = vsel %vm20889_vm2, %v7879_v54, %v7881_v20 }
 0x35f   :  { %15493 = vmatprep.subr.msk.mxu1 %vm20887_vm3, %v7983_v7  ;;  %vm20888_vm10 = vmmov %vm20881_vm1  ;;  %v7984_v50 = vsel %vm20763_vm5, %v7903_v38, 0.0 }
 0x360   :  { %15494 = vmatpush1.msk.msra.mxu1 %vm20888_vm10, %v7982_v42  ;;  %vm20890_vm1 = vmmov %vm20884_vm15 }
 0x361   :  { %15495 = vmatmul.mubr.msk.f32.vlgmr.msra.gmra.mrb[16].mxu1 %vm20890_vm1, %v18410_v14  ;;  %vm20891_vm15 = vmmov %vm20889_vm2  ;;  %v7887_v33 = vpop.permute.xlu1 %7886  ;;  %v7893_v1 = vpop.permute.xlu0 %7892 }
 0x362   :  { %v7904_v24 = vsel %vm20891_vm15, %v7881_v20, %v7883_v22  ;;  %8464 = vmatprep.mubr.f32.mxu1 %v20444_v49  ;;  %vm20892_vm7 = vmmov %vm20887_vm3  ;;  %v7906_v56 = vsel %vm20889_vm2, %v7885_v10, %v7887_v33 }
 0x363   :  { %v7985_v57 = vsel %vm20762_vm11, %v7904_v24, 0.0  ;;  %vm20893_vm3 = vmmov %vm20889_vm2  ;;  %v7987_v26 = vsel %vm17751_vm4, %v7906_v56, 0.0 }
 0x364   :  { %15496 = vmatprep.subr.msk.mxu0 %vm20892_vm7, %v7985_v57  ;;  %v7905_v40 = vsel %vm20893_vm3, %v7883_v22, %v7885_v10  ;;  %vm20894_vm10 = vmmov %vm20892_vm7 }
 0x365   :  { %15497 = vmatpush1.msk.msra.mxu0 %vm20894_vm10, %v7984_v50  ;;  %v7986_v3 = vsel %vm20769_vm9, %v7905_v40, 0.0  ;;  %vm20895_vm15 = vmmov %vm20892_vm7  ;;  %vm20897_vm10 = vnez %v20616_v41  ;;  %v7891_v48 = vpop.permute.xlu1 %7890 }
 0x366   :  { %15498 = vmatmul.mubr.msk.f32.vlgmr.msra.gmra.mrb[18].mxu0 %vm20890_vm1, %v18410_v14  ;;  %15499 = vmatprep.subr.msk.mxu1 %vm20895_vm15, %v7987_v26  ;;  %vm20896_vm3 = vmmov %vm20890_vm1  ;;  %vm20898_vm1 = vcmask 777216  }
 0x367   :  { %8535 = vmatprep.mubr.f32.mxu0 %v20444_v49  ;;  %15500 = vmatpush1.msk.msra.mxu1 %vm20892_vm7, %v7986_v3  ;;  %vm20325_vm2 = vmand %vm18233_vm12, %vm20897_vm10  ;;  %v7907_v31 = vsel %vm20898_vm1, %v7887_v33, %v7889_v43  ;;  %vm20902_vm7 = vnez %v20781_v60  ;;  %v20917_v60 = vld [vmem:[#allocation53_spill] sm:$0xff] }
 0x368   :  { %15501 = vmatmul.mubr.msk.f32.vlgmr.msra.gmra.mrb[18].mxu1 %vm20896_vm3, %v18410_v14  ;;  %vm20899_vm14 = vmmov %vm20898_vm1  ;;  %vm20903_vm3 = vnez %v20602_v6  ;;  %v8720_v41 = vshra.s32 %v20917_v60, 10 }
 0x369   :  { %8606 = vmatprep.mubr.f32.mxu1 %v20444_v49  ;;  %v7908_v4 = vsel %vm20899_vm14, %v7889_v43, %v7891_v48  ;;  %vm20900_vm9 = vmmov %vm20898_vm1  ;;  %vm20905_vm14 = vcmask 1043456  }
 0x36a   :  { %v7909_v61 = vsel %vm20900_vm9, %v7891_v48, %v7893_v1  ;;  %vm20901_vm15 = vmmov %vm20898_vm1  ;;  %v7989_v59 = vsel %vm20903_vm3, %v7908_v4, 0.0  ;;  %vm20904_vm1 = vnez %v20606_v45  ;;  %v8733_v45 = vshra.s32 %v20786_v19, 10 }
 0x36b   :  { %v7927_v39 = vsel %vm20901_vm15, %v7893_v1, %v18363_v32  ;;  %v7990_v54 = vsel %vm20902_vm7, %v7909_v61, 0.0  ;;  %v7988_v29 = vsel %vm20904_vm1, %v7907_v31, 0.0  ;;  %15502 = vmatprep.subr.msk.mxu0 %vm20905_vm14, %v7989_v59  ;;  %vm20906_vm9 = vmmov %vm20905_vm14  ;;  %vm20909_vm7 = vcmask 31744  }
 0x36c   :  { %v7991_v20 = vsel %vm20325_vm2, %v7927_v39, 0.0  ;;  %vm20907_vm15 = vmmov %vm20906_vm9  ;;  %vm18619_vm14 = vcmp.eq.s32.totalorder %v8733_v45, 0 }
 0x36d   :  { %15505 = vmatprep.subr.msk.mxu1 %vm20906_vm9, %v7991_v20  ;;  %15503 = vmatpush1.msk.msra.mxu0 %vm20907_vm15, %v7988_v29  ;;  %vm20908_vm4 = vmmov %vm20906_vm9  ;;  %vm18623_vm9 = vcmp.eq.s32.totalorder %v8733_v45, 1  ;;  %v20942_v45 = vld [vmem:[#allocation46_spill] sm:$0xff] }
 0x36e   :  { %15506 = vmatpush1.msk.msra.mxu1 %vm20908_vm4, %v7990_v54  ;;  %15504 = vmatmul.mubr.msk.f32.vlgmr.msra.gmra.mrb[20].mxu0 %vm20909_vm7, %v18410_v14  ;;  %vm20910_vm3 = vmmov %vm20909_vm7  ;;  %vm18602_vm4 = vcmp.eq.s32.totalorder %v8720_v41, 0  ;;  %vm18607_vm7 = vcmp.eq.s32.totalorder %v8720_v41, 1  ;;  %v8726_v35 = vshra.s32 %v20942_v45, 10 }
 0x36f   :  { %15507 = vmatmul.mubr.msk.f32.vlgmr.msra.gmra.mrb[20].mxu1 %vm20910_vm3, %v18410_v14  ;;  %9243 = vmatprep.mubr.f32.mxu0 %v20444_v49 }
 0x370   :  { %9314 = vmatprep.mubr.f32.mxu1 %v20444_v49 }
 0x42b   :  { %v18516_v32 = vpop.f32.mrb[14].mxu0 }
 0x42c   :  { %v8648_v7 = vmul.f32 %v18516_v32, %v18516_v32  ;;  %v18520_v42 = vpop.f32.mrb[15].mxu0 }
 0x42d   :  { %v8629_v52 = vadd.f32 %v18520_v42, %v18516_v32  ;;  %v8649_v38 = vmul.f32 %v18520_v42, %v18520_v42 }
 0x42f   :  { %v8664_v22 = vadd.f32 %v8649_v38, %v8648_v7 }
 0x430   :  { %v18526_v24 = vpop.f32.mrb[14].mxu1  ;;  %v18528_v14 = vpop.f32.mrb[16].mxu0 }
 0x431   :  { %v8630_v10 = vadd.f32 %v8629_v52, %v18526_v24  ;;  %v8650_v57 = vmul.f32 %v18526_v24, %v18526_v24  ;;  %v18533_v50 = vpop.f32.mrb[15].mxu1  ;;  %v18535_v40 = vpop.f32.mrb[17].mxu0  ;;  %v8652_v26 = vmul.f32 %v18528_v14, %v18528_v14 }
 0x432   :  { %v8651_v33 = vmul.f32 %v18533_v50, %v18533_v50  ;;  %v8653_v1 = vmul.f32 %v18535_v40, %v18535_v40 }
 0x433   :  { %v8665_v56 = vadd.f32 %v8664_v22, %v8650_v57  ;;  %v8631_v43 = vadd.f32 %v8630_v10, %v18533_v50 }
 0x434   :  { %v18542_v3 = vpop.f32.mrb[16].mxu1 }
 0x435   :  { %20911 = vst [vmem:[#allocation32_spill] sm:$0xff] %v18542_v3  ;;  %v8666_v31 = vadd.f32 %v8665_v56, %v8651_v33  ;;  %v8632_v48 = vadd.f32 %v8631_v43, %v18528_v14  ;;  %v18547_v4 = vpop.f32.mrb[17].mxu1  ;;  %v8654_v54 = vmul.f32 %v18542_v3, %v18542_v3 }
 0x436   :  { %v8655_v29 = vmul.f32 %v18547_v4, %v18547_v4 }
 0x437   :  { %v8667_v61 = vadd.f32 %v8666_v31, %v8652_v26  ;;  %v8633_v39 = vadd.f32 %v8632_v48, %v18535_v40 }
 0x439   :  { %v8668_v59 = vadd.f32 %v8667_v61, %v8653_v1  ;;  %v8634_v20 = vadd.f32 %v8633_v39, %v18542_v3  ;;  %v18555_v7 = vpop.f32.mrb[18].mxu0 }
 0x43a   :  { %20912 = vst [vmem:[#allocation33_spill] sm:$0xff] %v18555_v7  ;;  %v18557_v52 = vpop.f32.mrb[19].mxu0  ;;  %v8656_v10 = vmul.f32 %v18555_v7, %v18555_v7 }
 0x43b   :  { %v8669_v38 = vadd.f32 %v8668_v59, %v8654_v54  ;;  %v8635_v22 = vadd.f32 %v8634_v20, %v18547_v4  ;;  %v8657_v56 = vmul.f32 %v18557_v52, %v18557_v52  ;;  %v18565_v43 = vpop.f32.mrb[18].mxu1 }
 0x43c   :  { %20913 = vst [vmem:[#allocation43_spill] sm:$0xff] %v18565_v43  ;;  %v18567_v26 = vpop.f32.mrb[19].mxu1  ;;  %v8658_v1 = vmul.f32 %v18565_v43, %v18565_v43 }
 0x43d   :  { %v8670_v57 = vadd.f32 %v8669_v38, %v8655_v29  ;;  %v8636_v33 = vadd.f32 %v8635_v22, %v18555_v7  ;;  %v8659_v54 = vmul.f32 %v18567_v26, %v18567_v26 }
 0x43f   :  { %v8671_v31 = vadd.f32 %v8670_v57, %v8656_v10  ;;  %v8637_v48 = vadd.f32 %v8636_v33, %v18557_v52 }
 0x441   :  { %v8672_v61 = vadd.f32 %v8671_v31, %v8657_v56  ;;  %v8638_v39 = vadd.f32 %v8637_v48, %v18565_v43  ;;  %v18576_v29 = vpop.f32.mrb[20].mxu0 }
 0x442   :  { %20914 = vst [vmem:[#allocation44_spill] sm:$0xff] %v18576_v29  ;;  %v18578_v38 = vpop.f32.mrb[20].mxu1  ;;  %v8660_v57 = vmul.f32 %v18576_v29, %v18576_v29  ;;  %v18583_v33 = vpop.f32.mrb[21].mxu0 }
 0x443   :  { %v8673_v59 = vadd.f32 %v8672_v61, %v8658_v1  ;;  %v8639_v20 = vadd.f32 %v8638_v39, %v18567_v26  ;;  %20915 = vst [vmem:[#allocation38_spill] sm:$0xff] %v18578_v38  ;;  %20916 = vst [vmem:[#allocation37_spill] sm:$0xff] %v18583_v33  ;;  %v18585_v56 = vpop.f32.mrb[21].mxu1  ;;  %v8661_v31 = vmul.f32 %v18583_v33, %v18583_v33 }
 0x444   :  { %v8662_v61 = vmul.f32 %v18578_v38, %v18578_v38 }
 0x445   :  { %v8674_v22 = vadd.f32 %v8673_v59, %v8659_v54  ;;  %v8640_v10 = vadd.f32 %v8639_v20, %v18576_v29  ;;  %v8663_v20 = vmul.f32 %v18585_v56, %v18585_v56 }
 0x447   :  { %v8675_v48 = vadd.f32 %v8674_v22, %v8660_v57  ;;  %v8641_v1 = vadd.f32 %v8640_v10, %v18583_v33  ;;  %v18597_v22 = vpop.permute.xlu1 %8875  ;;  %v20918_v10 = vld [vmem:[#allocation56_spill] sm:$0xff] }
 0x448   :  { %v8723_v57 = vshra.s32 %v20918_v10, 10  ;;  %v20928_v10 = vld [vmem:[#allocation51_spill] sm:$0xff]  ;;  %v8893_v45 = vsel %vm18623_vm9, %v18597_v22, 0.0 }
 0x449   :  { %v8676_v39 = vadd.f32 %v8675_v48, %v8661_v31  ;;  %v8642_v54 = vadd.f32 %v8641_v1, %v18578_v38  ;;  %v20919_v31 = vld [vmem:[#allocation41_spill] sm:$0xff]  ;;  %v8721_v19 = vshra.s32 %v20928_v10, 10  ;;  %v8725_v10 = vshra.s32 %v17289_v63, 10 }
 0x44a   :  { %v8718_v48 = vshra.s32 %v20919_v31, 10  ;;  %vm18615_vm3 = vcmp.eq.s32.totalorder %v8723_v57, 0  ;;  %vm18631_vm15 = vcmp.eq.s32.totalorder %v8723_v57, 1  ;;  %v20945_v57 = vld [vmem:[#allocation59_spill] sm:$0xff] }
 0x44b   :  { %v8643_v59 = vadd.f32 %v8642_v54, %v18585_v56  ;;  %v8677_v2 = vadd.f32 %v8676_v39, %v8662_v61  ;;  %v20922_v54 = vld [vmem:[#allocation48_spill] sm:$0xff]  ;;  %v18629_v60 = vpop.permute.xlu1 %8807  ;;  %v8727_v0 = vshra.s32 %v20945_v57, 10  ;;  %vm18662_vm5 = vcmp.eq.s32.totalorder %v8721_v19, 0 }
 0x44c   :  { %v8719_v6 = vshra.s32 %v20922_v54, 10  ;;  %v18627_v54 = vpop.permute.xlu0 %8786  ;;  %20935 = vst [vmem:[#allocation6_spill] sm:$0xff] %v18629_v60  ;;  %vm18636_vm2 = vcmp.eq.s32.totalorder %v8718_v48, 0  ;;  %vm18640_vm12 = vcmp.eq.s32.totalorder %v8718_v48, 1  ;;  %v20951_v9 = vsel %vm18662_vm5, 4294967295, %v20950_v9 }
 0x44d   :  { %8644 = vadd.xlane.f32.xlu1 %v8643_v59  ;;  %v8678_v55 = vadd.f32 %v8677_v2, %v8663_v20  ;;  %v20926_v2 = vld [vmem:[#allocation57_spill] sm:$0xff]  ;;  %v20927_v59 = vld [vmem:[#allocation70_spill] sm:$0xff]  ;;  %v8804_v48 = vsel %vm18619_vm14, %v18627_v54, 0.0  ;;  %v8789_v11 = vsel %vm18636_vm2, %v18627_v54, 0.0  ;;  %v8794_v47 = vsel %vm18615_vm3, %v18627_v54, 0.0 }
 0x44e   :  { %v8722_v39 = vshra.s32 %v20926_v2, 10  ;;  %v20936_v2 = vmov 0  ;;  %vm18645_vm10 = vcmp.eq.s32.totalorder %v8719_v6, 0  ;;  %vm18651_vm1 = vcmp.eq.s32.totalorder %v8719_v6, 1 }
 0x44f   :  { %8679 = vadd.xlane.f32.xlu0 %v8678_v55  ;;  %v20925_v55 = vld [vmem:[#allocation74_spill] sm:$0xff]  ;;  %v20937_v2 = vsel %vm18631_vm15, 4294967295, %v20936_v2  ;;  %v8878_v6 = vsel %vm18640_vm12, %v18597_v22, 0.0  ;;  %v8883_v57 = vsel %vm18631_vm15, %v18597_v22, 0.0  ;;  %vm18678_vm11 = vcmp.eq.s32.totalorder %v8721_v19, 1 }
 0x450   :  { %v20953_v12 = vsel %vm18678_vm11, 4294967295, %v20952_v12  ;;  %vm18683_vm0 = vcmp.eq.s32.totalorder %v8725_v10, 0  ;;  %vm18687_vm6 = vcmp.eq.s32.totalorder %v8725_v10, 1  ;;  %vm18691_vm13 = vcmp.eq.s32.totalorder %v8722_v39, 0  ;;  %v18708_v10 = vpop.permute.xlu1 %8911 }
 0x451   :  { %v20960_v28 = vsel %vm18691_vm13, 4294967295, %v20959_v28  ;;  %vm18695_vm8 = vcmp.eq.s32.totalorder %v8727_v0, 0  ;;  %vm18699_vm5 = vcmp.eq.s32.totalorder %v8727_v0, 1  ;;  %v20963_v19 = vmov 0 }
 0x452   :  { %v20964_v19 = vsel %vm18699_vm5, 4294967295, %v20963_v19  ;;  %vm18704_vm11 = vcmp.eq.s32.totalorder %v8729_v51, 0  ;;  %vm18710_vm15 = vcmp.eq.s32.totalorder %v8722_v39, 1  ;;  %vm18714_vm13 = vcmp.eq.s32.totalorder %v8729_v51, 1 }
 0x453   :  { %v20967_v25 = vsel %vm18704_vm11, 4294967295, %v20966_v25  ;;  %v20971_v58 = vsel %vm18714_vm13, 4294967295, %v20970_v58  ;;  %v18718_v0 = vadd.f32 %v8893_v45, %v8804_v48  ;;  %v18720_v27 = vadd.f32 %v8878_v6, %v8789_v11 }
 0x454   :  { %20972 = vst [vmem:[#allocation5_spill] sm:$0xff] %v20971_v58  ;;  %v18722_v13 = vadd.f32 %v8883_v57, %v8794_v47  ;;  %vm18724_vm5 = vcmp.eq.s32.totalorder %v8731_v23, 0  ;;  %vm18728_vm11 = vcmp.eq.s32.totalorder %v8731_v23, 1  ;;  %v8790_v51 = vsel %vm18645_vm10, %v18627_v54, 0.0 }
 0x455   :  { %v8879_v39 = vsel %vm18651_vm1, %v18597_v22, 0.0  ;;  %v8796_v48 = vsel %vm18683_vm0, %v18627_v54, 0.0  ;;  %v8885_v45 = vsel %vm18687_vm6, %v18597_v22, 0.0  ;;  %v8825_v23 = vsel %vm18619_vm14, %v18629_v60, 0.0 }
 0x456   :  { %v8929_v11 = vsel %vm18623_vm9, %v18708_v10, 0.0  ;;  %v8791_v6 = vsel %vm18602_vm4, %v18627_v54, 0.0  ;;  %v8880_v47 = vsel %vm18607_vm7, %v18597_v22, 0.0  ;;  %v8810_v57 = vsel %vm18636_vm2, %v18629_v60, 0.0 }
 0x457   :  { %v8914_v44 = vsel %vm18640_vm12, %v18708_v10, 0.0  ;;  %v8815_v41 = vsel %vm18615_vm3, %v18629_v60, 0.0  ;;  %vm20977_vm14 = vnez %v20937_v2  ;;  %v8811_v16 = vsel %vm18645_vm10, %v18629_v60, 0.0 }
 0x458   :  { %v8919_v46 = vsel %vm20977_vm14, %v18708_v10, 0.0  ;;  %v18771_v21 = vadd.f32 %v8879_v39, %v8790_v51  ;;  %v8915_v20 = vsel %vm18651_vm1, %v18708_v10, 0.0  ;;  %v18776_v62 = vadd.f32 %v8885_v45, %v8796_v48 }
 0x459   :  { %vm18778_vm12 = vcmp.eq.s32.totalorder %v8724_v5, 0  ;;  %vm18782_vm2 = vcmp.eq.s32.totalorder %v8724_v5, 1  ;;  %v8817_v37 = vsel %vm18683_vm0, %v18629_v60, 0.0  ;;  %v8921_v2 = vsel %vm18687_vm6, %v18708_v10, 0.0 }
 0x45a   :  { %v18792_v63 = vadd.f32 %v8880_v47, %v8791_v6  ;;  %v8798_v51 = vsel %vm18695_vm8, %v18627_v54, 0.0  ;;  %vm18797_vm10 = vcmp.eq.s32.totalorder %v8726_v35, 0  ;;  %vm18801_vm1 = vcmp.eq.s32.totalorder %v8726_v35, 1 }
 0x45b   :  { %v18805_v48 = vadd.f32 %v8929_v11, %v8825_v23  ;;  %v18807_v45 = vadd.f32 %v8914_v44, %v8810_v57  ;;  %v18809_v36 = vadd.f32 %v8919_v46, %v8815_v41  ;;  %vm20986_vm0 = vnez %v20964_v19 }
 0x45c   :  { %v8887_v6 = vsel %vm20986_vm0, %v18597_v22, 0.0  ;;  %v20987_v47 = vshra.s32 %v20925_v55, 10  ;;  %v18828_v46 = vadd.f32 %v8915_v20, %v8811_v16  ;;  %v8812_v11 = vsel %vm18602_vm4, %v18629_v60, 0.0 }
 0x45d   :  { %v8916_v57 = vsel %vm18607_vm7, %v18708_v10, 0.0  ;;  %v20993_v44 = vshra.s32 %v20927_v59, 10  ;;  %v18848_v20 = vadd.f32 %v8921_v2, %v8817_v37  ;;  %v8819_v1 = vsel %vm18695_vm8, %v18629_v60, 0.0 }
 0x45e   :  { %vm18816_vm6 = vcmp.eq.s32.totalorder %v20987_v47, 0  ;;  %v20990_v35 = vmov %v20987_v47  ;;  %v8923_v61 = vsel %vm20986_vm0, %v18708_v10, 0.0  ;;  %vm21000_vm4 = vnez %v20951_v9 }
 0x45f   :  { %vm18822_vm3 = vcmp.eq.s32.totalorder %v20990_v35, 1  ;;  %vm18838_vm9 = vcmp.eq.s32.totalorder %v20993_v44, 0  ;;  %v20996_v41 = vmov %v20993_v44  ;;  %20999 = vst [vmem:[#allocation19_spill] sm:$0xff] %v18848_v20  ;;  %v8792_v47 = vsel %vm21000_vm4, %v18627_v54, 0.0 }
 0x460   :  { %vm18844_vm14 = vcmp.eq.s32.totalorder %v20996_v41, 1  ;;  %vm18859_vm7 = vcmp.eq.s32.totalorder %v8732_v8, 0  ;;  %v21003_v35 = vmov 0  ;;  %v8813_v19 = vsel %vm21000_vm4, %v18629_v60, 0.0 }
 0x461   :  { %vm21005_vm8 = vnez %v20953_v12  ;;  %vm21006_vm0 = vnez %v20967_v25  ;;  %v8889_v41 = vsel %vm18714_vm13, %v18597_v22, 0.0  ;;  %v8882_v12 = vsel %vm18710_vm15, %v18597_v22, 0.0 }
 0x462   :  { %v8881_v2 = vsel %vm21005_vm8, %v18597_v22, 0.0  ;;  %v8917_v44 = vsel %vm21005_vm8, %v18708_v10, 0.0  ;;  %v8918_v29 = vsel %vm18710_vm15, %v18708_v10, 0.0  ;;  %v18896_v43 = vadd.f32 %v8916_v57, %v8812_v11 }
 0x463   :  { %v18898_v58 = vadd.f32 %v8887_v6, %v8798_v51  ;;  %v18906_v7 = vadd.f32 %v8923_v61, %v8819_v1  ;;  %v18908_v3 = vadd.f32 %v8881_v2, %v8792_v47  ;;  %v18910_v33 = vadd.f32 %v8917_v44, %v8813_v19 }
 0x464   :  { %v8823_v57 = vsel %vm18724_vm5, %v18629_v60, 0.0  ;;  %v8927_v61 = vsel %vm18728_vm11, %v18708_v10, 0.0  ;;  %v8795_v47 = vsel %vm18778_vm12, %v18627_v54, 0.0  ;;  %v8920_v17 = vsel %vm18782_vm2, %v18708_v10, 0.0 }
 0x465   :  { %v8797_v53 = vsel %vm18797_vm10, %v18627_v54, 0.0  ;;  %v8818_v19 = vsel %vm18797_vm10, %v18629_v60, 0.0  ;;  %v8886_v18 = vsel %vm18801_vm1, %v18597_v22, 0.0  ;;  %v8922_v2 = vsel %vm18801_vm1, %v18708_v10, 0.0 }
 0x466   :  { %v8799_v31 = vsel %vm18816_vm6, %v18627_v54, 0.0  ;;  %v8820_v44 = vsel %vm18816_vm6, %v18629_v60, 0.0  ;;  %v8888_v39 = vsel %vm18822_vm3, %v18597_v22, 0.0  ;;  %v8801_v5 = vsel %vm18838_vm9, %v18627_v54, 0.0 }
 0x467   :  { %v8803_v38 = vsel %vm18859_vm7, %v18627_v54, 0.0  ;;  %v18999_v59 = vadd.f32 %v8888_v39, %v8799_v31  ;;  %vm20389_vm15 = vcmask 64512  }
 0x4da   :  { %v8645_v30 = vpop.xlane.xlu1 %8644 }
 0x4db   :  { %v18826_v23 = vmul.f32 0.00048828125, %v8645_v30  ;;  %v20997_v30 = vmov 0 }
 0x4dc   :  { %v20998_v30 = vsel %vm18844_vm14, 4294967295, %v20997_v30  ;;  %v8680_v16 = vpop.xlane.xlu0 %8679  ;;  %vm18863_vm14 = vcmp.eq.s32.totalorder %v8732_v8, 1  ;;  %v8800_v8 = vsel %vm21006_vm0, %v18627_v54, 0.0 }
 0x4dd   :  { %v21004_v35 = vsel %vm18863_vm14, 4294967295, %v21003_v35  ;;  %v8681_v37 = vmul.f32 0.00048828125, %v8680_v16  ;;  %v8682_v34 = vmul.f32 %v18826_v23, %v18826_v23  ;;  %vm21007_vm14 = vnez %v20960_v28 }
 0x4de   :  { %v8793_v9 = vsel %vm21007_vm14, %v18627_v54, 0.0  ;;  %v8814_v20 = vsel %vm21007_vm14, %v18629_v60, 0.0  ;;  %v8891_v28 = vsel %vm18728_vm11, %v18597_v22, 0.0  ;;  %v18915_v51 = vadd.f32 %v8889_v41, %v8800_v8 }
 0x4df   :  { %v8683_v16 = vsub.f32 %v8681_v37, %v8682_v34  ;;  %v8802_v37 = vsel %vm18724_vm5, %v18627_v54, 0.0  ;;  %v18917_v6 = vadd.f32 %v8882_v12, %v8793_v9  ;;  %v18919_v11 = vadd.f32 %v8918_v29, %v8814_v20 }
 0x4e0   :  { %v18924_v1 = vadd.f32 %v8891_v28, %v8802_v37  ;;  %v8816_v29 = vsel %vm18778_vm12, %v18629_v60, 0.0  ;;  %v8884_v20 = vsel %vm18782_vm2, %v18597_v22, 0.0  ;;  %v8924_v8 = vsel %vm18822_vm3, %v18708_v10, 0.0 }
 0x4e1   :  { %v8684_v34 = vadd.f32 1e-05, %v8683_v16  ;;  %v8822_v41 = vsel %vm18838_vm9, %v18629_v60, 0.0  ;;  %vm21008_vm11 = vnez %v20998_v30  ;;  %v8824_v16 = vsel %vm18859_vm7, %v18629_v60, 0.0 }
 0x4e2   :  { %v8890_v49 = vsel %vm21008_vm11, %v18597_v22, 0.0  ;;  %v8926_v9 = vsel %vm21008_vm11, %v18708_v10, 0.0  ;;  %vm21009_vm5 = vnez %v21004_v35  ;;  %v18989_v37 = vadd.f32 %v8927_v61, %v8823_v57 }
 0x4e3   :  { %16354 = vrsqrt.f32 %v8684_v34  ;;  %v8892_v55 = vsel %vm21009_vm5, %v18597_v22, 0.0  ;;  %v8928_v12 = vsel %vm21009_vm5, %v18708_v10, 0.0  ;;  %v18991_v30 = vadd.f32 %v8884_v20, %v8795_v47 }
 0x4e4   :  { %v18993_v28 = vadd.f32 %v8920_v17, %v8816_v29  ;;  %v18995_v34 = vadd.f32 %v8886_v18, %v8797_v53  ;;  %v18997_v54 = vadd.f32 %v8922_v2, %v8818_v19  ;;  %v19001_v15 = vadd.f32 %v8924_v8, %v8820_v44 }
 0x4e5   :  { %v19003_v60 = vadd.f32 %v8890_v49, %v8801_v5  ;;  %v8701_v22 = vsub.f32 %v18585_v56, %v18826_v23  ;;  %v19007_v35 = vadd.f32 %v8926_v9, %v8822_v41  ;;  %v19009_v57 = vadd.f32 %v8892_v55, %v8803_v38 }
 0x4e6   :  { %v19011_v61 = vadd.f32 %v8928_v12, %v8824_v16  ;;  %v8686_v47 = vsub.f32 %v18516_v32, %v18826_v23  ;;  %v8691_v29 = vsub.f32 %v18535_v40, %v18826_v23  ;;  %v8687_v20 = vsub.f32 %v18520_v42, %v18826_v23 }
 0x4e7   :  { %v8693_v17 = vsub.f32 %v18547_v4, %v18826_v23  ;;  %v8688_v56 = vsub.f32 %v18526_v24, %v18826_v23  ;;  %v8695_v19 = vsub.f32 %v18557_v52, %v18826_v23  ;;  %v8689_v18 = vsub.f32 %v18533_v50, %v18826_v23 }
 0x4e8   :  { %v8697_v32 = vsub.f32 %v18567_v26, %v18826_v23  ;;  %v8690_v8 = vsub.f32 %v18528_v14, %v18826_v23 }
 0x4ed   :  { %v16355_v53 = vpop.eup %16354 }
 0x4ee   :  { %v8717_v40 = vmul.f32 %v16355_v53, %v8701_v22  ;;  %v8702_v2 = vmul.f32 %v16355_v53, %v8686_v47  ;;  %v8707_v31 = vmul.f32 %v16355_v53, %v8691_v29  ;;  %v8703_v42 = vmul.f32 %v16355_v53, %v8687_v20 }
 0x4ef   :  { %v8709_v44 = vmul.f32 %v16355_v53, %v8693_v17  ;;  %v8704_v39 = vmul.f32 %v16355_v53, %v8688_v56  ;;  %v8711_v4 = vmul.f32 %v16355_v53, %v8695_v19  ;;  %v8705_v9 = vmul.f32 %v16355_v53, %v8689_v18  ;;  %v21016_v17 = vld [vmem:[#allocation38_spill] sm:$0xff] }
 0x4f0   :  { %v8961_v24 = vmul.f32 %v18718_v0, %v8717_v40  ;;  %v8946_v52 = vmul.f32 %v18720_v27, %v8702_v2  ;;  %v8951_v5 = vmul.f32 %v18722_v13, %v8707_v31  ;;  %v8947_v50 = vmul.f32 %v18771_v21, %v8703_v42  ;;  %v21010_v13 = vld [vmem:[#allocation37_spill] sm:$0xff] }
 0x4f1   :  { %v8953_v26 = vmul.f32 %v18776_v62, %v8709_v44  ;;  %v8948_v41 = vmul.f32 %v18792_v63, %v8704_v39  ;;  %v8955_v49 = vmul.f32 %v18898_v58, %v8711_v4  ;;  %v8699_v21 = vsub.f32 %v21010_v13, %v18826_v23  ;;  %v21011_v62 = vld [vmem:[#allocation32_spill] sm:$0xff]  ;;  %v21012_v63 = vld [vmem:[#allocation33_spill] sm:$0xff] }
 0x4f2   :  { %v8977_v38 = vadd.f32 %v8961_v24, %v18805_v48  ;;  %v8962_v16 = vadd.f32 %v8946_v52, %v18807_v45  ;;  %v8967_v14 = vadd.f32 %v8951_v5, %v18809_v36  ;;  %v8963_v0 = vadd.f32 %v8947_v50, %v18828_v46  ;;  %v21013_v45 = vld [vmem:[#allocation43_spill] sm:$0xff]  ;;  %v21014_v46 = vld [vmem:[#allocation44_spill] sm:$0xff] }
 0x4f3   :  { %v8964_v27 = vadd.f32 %v8948_v41, %v18896_v43  ;;  %v8692_v55 = vsub.f32 %v21011_v62, %v18826_v23  ;;  %v8694_v58 = vsub.f32 %v21012_v63, %v18826_v23  ;;  %v8696_v36 = vsub.f32 %v21013_v45, %v18826_v23  ;;  %v21015_v43 = vld [vmem:[#allocation19_spill] sm:$0xff] }
 0x4f4   :  { %v19049_v12 = vmax.f32 %v8977_v38, 0.0  ;;  %v19051_v48 = vmax.f32 %v8962_v16, 0.0  ;;  %v8698_v22 = vsub.f32 %v21014_v46, %v18826_v23  ;;  %v8969_v47 = vadd.f32 %v8953_v26, %v21015_v43 }
 0x4f5   :  { %v8971_v29 = vadd.f32 %v8955_v49, %v18906_v7  ;;  %v8949_v20 = vmul.f32 %v18908_v3, %v8705_v9  ;;  %v8700_v56 = vsub.f32 %v21016_v17, %v18826_v23  ;;  %v19066_v19 = vmax.f32 %v8967_v14, 0.0 }
 0x4f6   :  { %9092 = vrot.lane.b32.xlu0 %v19049_v12, %s16382_s24  ;;  %9095 = vrot.lane.b32.xlu1 %v19051_v48, %s16382_s24  ;;  %v19068_v18 = vmax.f32 %v8963_v0, 0.0  ;;  %v8706_v40 = vmul.f32 %v16355_v53, %v8690_v8  ;;  %v8715_v2 = vmul.f32 %v16355_v53, %v8699_v21  ;;  %v8708_v31 = vmul.f32 %v16355_v53, %v8692_v55  ;;  %v19243_v55 = vld [vmem:[%s20113_s6 + $0x8] sm:$0xff] }
 0x4f7   :  { %v8710_v42 = vmul.f32 %v16355_v53, %v8694_v58  ;;  %v8712_v7 = vmul.f32 %v16355_v53, %v8696_v36  ;;  %v8714_v44 = vmul.f32 %v16355_v53, %v8698_v22  ;;  %v8713_v3 = vmul.f32 %v16355_v53, %v8697_v32  ;;  %v21022_v58 = vld [vmem:[#allocation45_spill] sm:$0xff] }
 0x4f8   :  { %v8950_v39 = vmul.f32 %v18917_v6, %v8706_v40  ;;  %v8959_v23 = vmul.f32 %v18924_v1, %v8715_v2  ;;  %v8716_v4 = vmul.f32 %v16355_v53, %v8700_v56  ;;  %v8952_v24 = vmul.f32 %v18991_v30, %v8708_v31 }
 0x4f9   :  { %v8954_v52 = vmul.f32 %v18995_v34, %v8710_v42  ;;  %v8956_v5 = vmul.f32 %v18999_v59, %v8712_v7  ;;  %v8958_v50 = vmul.f32 %v19003_v60, %v8714_v44  ;;  %v8965_v32 = vadd.f32 %v8949_v20, %v18910_v33 }
 0x4fa   :  { %9105 = vrot.lane.b32.xlu0 %v19066_v19, %s16382_s24  ;;  %9097 = vrot.lane.b32.xlu1 %v19068_v18, %s16382_s24  ;;  %v8925_v1 = vsel %vm18714_vm13, %v18708_v10, 0.0  ;;  %v8966_v30 = vadd.f32 %v8950_v39, %v18919_v11  ;;  %v8975_v34 = vadd.f32 %v8959_v23, %v18989_v37  ;;  %v8968_v59 = vadd.f32 %v8952_v24, %v18993_v28  ;;  %v21018_v11 = vld [vmem:[#allocation6_spill] sm:$0xff] }
 0x4fb   :  { %v8970_v60 = vadd.f32 %v8954_v52, %v18997_v54  ;;  %v8972_v53 = vadd.f32 %v8956_v5, %v19001_v15  ;;  %v8974_v8 = vadd.f32 %v8958_v50, %v19007_v35  ;;  %v19090_v26 = vmax.f32 %v8969_v47, 0.0 }
 0x4fc   :  { %v19092_v41 = vmax.f32 %v8964_v27, 0.0  ;;  %v8957_v33 = vmul.f32 %v18915_v51, %v8713_v3  ;;  %v8960_v10 = vmul.f32 %v19009_v57, %v8716_v4  ;;  %v21019_v15 = vsel %vm21006_vm0, %v21018_v11, 0.0  ;;  %v21033_v4 = vld [vmem:[#allocation50_spill] sm:$0xff]  ;;  %v19331_v11 = vld [vmem:[%s20113_s6] sm:$0xff] }
 0x4fd   :  { %v8941_v37 = vadd.f32 %v8925_v1, %v21019_v15  ;;  %v19105_v54 = vmax.f32 %v8971_v29, 0.0  ;;  %v19107_v35 = vmax.f32 %v8965_v32, 0.0  ;;  %v19115_v49 = vmax.f32 %v8966_v30, 0.0 }
 0x4fe   :  { %9109 = vrot.lane.b32.xlu0 %v19090_v26, %s16382_s24  ;;  %9099 = vrot.lane.b32.xlu1 %v19092_v41, %s16382_s24  ;;  %v8976_v28 = vadd.f32 %v8960_v10, %v19011_v61  ;;  %v19121_v25 = vmax.f32 %v8975_v34, 0.0  ;;  %v19123_v61 = vmax.f32 %v8968_v59, 0.0  ;;  %v19129_v9 = vmax.f32 %v8970_v60, 0.0 }
 0x4ff   :  { %v8973_v51 = vadd.f32 %v8957_v33, %v8941_v37  ;;  %v19135_v38 = vmax.f32 %v8972_v53, 0.0  ;;  %v19141_v16 = vmax.f32 %v8974_v8, 0.0  ;;  %vm21020_vm13 = vcmask 261120   ;;  %v21043_v37 = vld [vmem:[#allocation54_spill] sm:$0xff] }
 0x500   :  { %v19147_v14 = vmax.f32 %v8976_v28, 0.0  ;;  %vm21021_vm12 = vmmov %vm21020_vm13  ;;  %vm21023_vm2 = vnez %v21022_v58  ;;  %v21024_v46 = vmov 0.0   ;;  %vm21034_vm8 = vnez %v21033_v4  ;;  %v21045_v28 = vld [vmem:[#allocation58_spill] sm:$0xff]  ;;  %v21096_v58 = vld [vmem:[#allocation87_spill] sm:$0xff] }
 0x501   :  { %v19113_v57 = vmax.f32 %v8973_v51, 0.0  ;;  %vm21025_vm10 = vmmov %vm21021_vm12  ;;  %v21119_v4 = vld [vmem:[#allocation97_spill] sm:$0xff] }
 0x502   :  { %9113 = vrot.lane.b32.xlu0 %v19105_v54, %s16382_s24  ;;  %9101 = vrot.lane.b32.xlu1 %v19107_v35, %s16382_s24  ;;  %vm21026_vm1 = vmmov %vm21025_vm10 }
 0x503   :  { %vm21027_vm6 = vmmov %vm21026_vm1 }
 0x504   :  { %vm21028_vm3 = vmmov %vm21026_vm1 }
 0x505   :  { %vm21029_vm9 = vmmov %vm21026_vm1 }
 0x506   :  { %9117 = vrot.lane.b32.xlu0 %v19113_v57, %s16382_s24  ;;  %9103 = vrot.lane.b32.xlu1 %v19115_v49, %s16382_s24  ;;  %vm21030_vm14 = vmmov %vm21026_vm1 }
 0x507   :  { %vm21031_vm4 = vmmov %vm21026_vm1 }
 0x508   :  { %vm21032_vm7 = vmmov %vm21026_vm1 }
 0x509   :  { %vm21035_vm0 = vmmov %vm21026_vm1 }
 0x50a   :  { %9121 = vrot.lane.b32.xlu0 %v19121_v25, %s16382_s24  ;;  %9107 = vrot.lane.b32.xlu1 %v19123_v61, %s16382_s24  ;;  %vm21036_vm11 = vmmov %vm21035_vm0 }
 0x50b   :  { %vm21037_vm5 = vmmov %vm21035_vm0 }
 0x50e   :  { %9013 = vrot.lane.b32.xlu0 %v19051_v48, %s16389_s2  ;;  %9111 = vrot.lane.b32.xlu1 %v19129_v9, %s16382_s24 }
 0x512   :  { %9017 = vrot.lane.b32.xlu0 %v19092_v41, %s16389_s2  ;;  %9115 = vrot.lane.b32.xlu1 %v19135_v38, %s16382_s24 }
 0x516   :  { %8995 = vrot.lane.b32.xlu0 %v19049_v12, %s16389_s2  ;;  %9119 = vrot.lane.b32.xlu1 %v19141_v16, %s16382_s24 }
 0x51a   :  { %9023 = vrot.lane.b32.xlu0 %v19066_v19, %s16389_s2  ;;  %9123 = vrot.lane.b32.xlu1 %v19147_v14, %s16382_s24 }
 0x51e   :  { %9027 = vrot.lane.b32.xlu0 %v19090_v26, %s16389_s2  ;;  %9015 = vrot.lane.b32.xlu1 %v19068_v18, %s16389_s2 }
 0x522   :  { %9031 = vrot.lane.b32.xlu0 %v19105_v54, %s16389_s2  ;;  %9019 = vrot.lane.b32.xlu1 %v19107_v35, %s16389_s2 }
 0x526   :  { %9035 = vrot.lane.b32.xlu0 %v19113_v57, %s16389_s2  ;;  %9021 = vrot.lane.b32.xlu1 %v19115_v49, %s16389_s2 }
 0x52a   :  { %9039 = vrot.lane.b32.xlu0 %v19121_v25, %s16389_s2  ;;  %9025 = vrot.lane.b32.xlu1 %v19123_v61, %s16389_s2 }
 0x52e   :  { %10321 = vrot.lane.b32.xlu0 %v19051_v48, %s16390_s7  ;;  %9029 = vrot.lane.b32.xlu1 %v19129_v9, %s16389_s2 }
 0x532   :  { %10325 = vrot.lane.b32.xlu0 %v19092_v41, %s16390_s7  ;;  %9033 = vrot.lane.b32.xlu1 %v19135_v38, %s16389_s2 }
 0x536   :  { %10318 = vrot.lane.b32.xlu0 %v19049_v12, %s16390_s7  ;;  %9037 = vrot.lane.b32.xlu1 %v19141_v16, %s16389_s2 }
 0x53a   :  { %10331 = vrot.lane.b32.xlu0 %v19066_v19, %s16390_s7  ;;  %9041 = vrot.lane.b32.xlu1 %v19147_v14, %s16389_s2 }
 0x53e   :  { %10335 = vrot.lane.b32.xlu0 %v19090_v26, %s16390_s7  ;;  %10323 = vrot.lane.b32.xlu1 %v19068_v18, %s16390_s7 }
 0x542   :  { %10339 = vrot.lane.b32.xlu0 %v19105_v54, %s16390_s7  ;;  %10327 = vrot.lane.b32.xlu1 %v19107_v35, %s16390_s7 }
 0x546   :  { %10343 = vrot.lane.b32.xlu0 %v19113_v57, %s16390_s7  ;;  %10329 = vrot.lane.b32.xlu1 %v19115_v49, %s16390_s7 }
 0x54a   :  { %10347 = vrot.lane.b32.xlu0 %v19121_v25, %s16390_s7  ;;  %10333 = vrot.lane.b32.xlu1 %v19123_v61, %s16390_s7 }
 0x54e   :  { %10991 = vrot.lane.b32.xlu0 %v19051_v48, %s16391_s14  ;;  %10337 = vrot.lane.b32.xlu1 %v19129_v9, %s16390_s7 }
 0x552   :  { %10995 = vrot.lane.b32.xlu0 %v19092_v41, %s16391_s14  ;;  %10341 = vrot.lane.b32.xlu1 %v19135_v38, %s16390_s7 }
 0x556   :  { %10988 = vrot.lane.b32.xlu0 %v19049_v12, %s16391_s14  ;;  %10345 = vrot.lane.b32.xlu1 %v19141_v16, %s16390_s7 }
 0x55a   :  { %11001 = vrot.lane.b32.xlu0 %v19066_v19, %s16391_s14  ;;  %10349 = vrot.lane.b32.xlu1 %v19147_v14, %s16390_s7 }
 0x55e   :  { %11005 = vrot.lane.b32.xlu0 %v19090_v26, %s16391_s14  ;;  %10993 = vrot.lane.b32.xlu1 %v19068_v18, %s16391_s14 }
 0x562   :  { %11009 = vrot.lane.b32.xlu0 %v19105_v54, %s16391_s14  ;;  %10997 = vrot.lane.b32.xlu1 %v19107_v35, %s16391_s14 }
 0x566   :  { %11013 = vrot.lane.b32.xlu0 %v19113_v57, %s16391_s14  ;;  %10999 = vrot.lane.b32.xlu1 %v19115_v49, %s16391_s14 }
 0x568   :  { %v19229_v0 = vpop.permute.xlu0 %9092  ;;  %v9096_v27 = vpop.permute.xlu1 %9095 }
 0x569   :  { %v9156_v63 = vsel %vm21021_vm12, %v19229_v0, %v9096_v27  ;;  %vm21039_vm12 = vmmov %vm21035_vm0 }
 0x56a   :  { %11017 = vrot.lane.b32.xlu0 %v19121_v25, %s16391_s14  ;;  %11003 = vrot.lane.b32.xlu1 %v19123_v61, %s16391_s14 }
 0x56c   :  { %v9106_v13 = vpop.permute.xlu0 %9105  ;;  %v9098_v21 = vpop.permute.xlu1 %9097 }
 0x56d   :  { %v9125_v62 = vsel %vm21020_vm13, %v9096_v27, %v9098_v21  ;;  %vm21038_vm13 = vmmov %vm21035_vm0 }
 0x56e   :  { %12249 = vrot.lane.b32.xlu0 %v19068_v18, %s16392_s15  ;;  %11007 = vrot.lane.b32.xlu1 %v19129_v9, %s16391_s14 }
 0x56f   :  { %9179 = vmatprep.subr.mxu0 %v9125_v62  ;;  %v21052_v62 = vld [vmem:[#allocation62_spill] sm:$0xff] }
 0x570   :  { %15509 = vmatpush1.msk.msra.mxu0 %vm21023_vm2, %v9156_v63  ;;  %v9110_v45 = vpop.permute.xlu0 %9109  ;;  %v9100_v36 = vpop.permute.xlu1 %9099 }
 0x571   :  { %15510 = vmatmul.mubr.msk.f32.vlgmr.msra.gmra.mrb[22].mxu0 %vm20389_vm15, %v19243_v55  ;;  %v9126_v29 = vsel %vm21026_vm1, %v9098_v21, %v9100_v36  ;;  %vm21041_vm1 = vcmask 269312   ;;  %v21050_v21 = vld [vmem:[#allocation60_spill] sm:$0xff] }
 0x572   :  { %12253 = vrot.lane.b32.xlu0 %v19107_v35, %s16392_s15  ;;  %11011 = vrot.lane.b32.xlu1 %v19135_v38, %s16391_s14 }
 0x573   :  { %9385 = vmatprep.mubr.f32.mxu0 %v21024_v46 }
 0x574   :  { %v9114_v22 = vpop.permute.xlu0 %9113  ;;  %v9102_v43 = vpop.permute.xlu1 %9101 }
 0x575   :  { %v9127_v47 = vsel %vm21025_vm10, %v9100_v36, %v9102_v43  ;;  %vm21040_vm10 = vmmov %vm21035_vm0 }
 0x576   :  { %12247 = vrot.lane.b32.xlu0 %v19051_v48, %s16392_s15  ;;  %11015 = vrot.lane.b32.xlu1 %v19141_v16, %s16391_s14 }
 0x577   :  { %9250 = vmatprep.subr.mxu1 %v9127_v47 }
 0x578   :  { %9251 = vmatpush1.msra.mxu1 %v9126_v29  ;;  %v9118_v20 = vpop.permute.xlu0 %9117  ;;  %v9104_v17 = vpop.permute.xlu1 %9103 }
 0x579   :  { %v9129_v56 = vsel %vm21027_vm6, %v9104_v17, %v9106_v13  ;;  %v9128_v40 = vsel %vm21028_vm3, %v9102_v43, %v9104_v17  ;;  %15511 = vmatmul.mubr.msk.f32.vlgmr.msra.gmra.mrb[22].mxu1 %vm20389_vm15, %v19243_v55  ;;  %vm21042_vm6 = vmmov %vm21041_vm1  ;;  %vm21044_vm3 = vnez %v21043_v37  ;;  %v21058_v43 = vld [vmem:[#allocation67_spill] sm:$0xff] }
 0x57a   :  { %12259 = vrot.lane.b32.xlu0 %v19123_v61, %s16392_s15  ;;  %11019 = vrot.lane.b32.xlu1 %v19147_v14, %s16391_s14 }
 0x57b   :  { %9321 = vmatprep.subr.mxu0 %v9129_v56  ;;  %9456 = vmatprep.mubr.f32.mxu1 %v21024_v46  ;;  %v21061_v56 = vld [vmem:[#allocation72_spill] sm:$0xff] }
 0x57c   :  { %9322 = vmatpush1.msra.mxu0 %v9128_v40  ;;  %v9122_v2 = vpop.permute.xlu0 %9121  ;;  %v9108_v31 = vpop.permute.xlu1 %9107  ;;  %v21063_v40 = vld [vmem:[#allocation76_spill] sm:$0xff] }
 0x57d   :  { %v9131_v42 = vsel %vm21029_vm9, %v9108_v31, %v9110_v45  ;;  %v9130_v7 = vsel %vm21030_vm14, %v9106_v13, %v9108_v31  ;;  %15512 = vmatmul.mubr.msk.f32.vlgmr.msra.gmra.mrb[24].mxu0 %vm20389_vm15, %v19243_v55  ;;  %vm21046_vm9 = vnez %v21045_v28 }
 0x57e   :  { %12263 = vrot.lane.b32.xlu0 %v19129_v9, %s16392_s15  ;;  %12251 = vrot.lane.b32.xlu1 %v19092_v41, %s16392_s15  ;;  %vm21047_vm14 = vmand %vm21023_vm2, %vm21046_vm9 }
 0x57f   :  { %9392 = vmatprep.subr.mxu1 %v9131_v42  ;;  %9527 = vmatprep.mubr.f32.mxu0 %v21024_v46 }
 0x580   :  { %9393 = vmatpush1.msra.mxu1 %v9130_v7  ;;  %v9014_v44 = vpop.permute.xlu0 %9013  ;;  %v9112_v3 = vpop.permute.xlu1 %9111 }
 0x581   :  { %v9132_v39 = vsel %vm21031_vm4, %v9110_v45, %v9112_v3  ;;  %v9133_v23 = vsel %vm21032_vm7, %v9112_v3, %v9114_v22  ;;  %15513 = vmatmul.mubr.msk.f32.vlgmr.msra.gmra.mrb[24].mxu1 %vm20389_vm15, %v19243_v55  ;;  %vm21048_vm4 = vmmov %vm21041_vm1  ;;  %v21069_v3 = vld [vmem:[#allocation68_spill] sm:$0xff] }
 0x582   :  { %12267 = vrot.lane.b32.xlu0 %v19135_v38, %s16392_s15  ;;  %12255 = vrot.lane.b32.xlu1 %v19115_v49, %s16392_s15  ;;  %vm21049_vm7 = vmmov %vm21041_vm1 }
 0x583   :  { %9463 = vmatprep.subr.mxu0 %v9133_v23  ;;  %9598 = vmatprep.mubr.f32.mxu1 %v21024_v46 }
 0x584   :  { %15514 = vmatpush1.msk.msra.mxu0 %vm21034_vm8, %v9132_v39  ;;  %v9018_v24 = vpop.permute.xlu0 %9017  ;;  %v9116_v52 = vpop.permute.xlu1 %9115 }
 0x585   :  { %v9135_v5 = vsel %vm21035_vm0, %v9116_v52, %v9118_v20  ;;  %v9134_v50 = vsel %vm21036_vm11, %v9114_v22, %v9116_v52  ;;  %15515 = vmatmul.mubr.msk.f32.vlgmr.msra.gmra.mrb[26].mxu0 %vm20389_vm15, %v19243_v55  ;;  %vm21051_vm0 = vnez %v21050_v21  ;;  %vm21053_vm11 = vnez %v21052_v62  ;;  %v21056_v22 = vld [vmem:[#allocation65_spill] sm:$0xff] }
 0x586   :  { %12271 = vrot.lane.b32.xlu0 %v19141_v16, %s16392_s15  ;;  %12257 = vrot.lane.b32.xlu1 %v19066_v19, %s16392_s15 }
 0x587   :  { %9534 = vmatprep.subr.mxu1 %v9135_v5  ;;  %9669 = vmatprep.mubr.f32.mxu0 %v21024_v46  ;;  %v21073_v5 = vld [vmem:[#allocation80_spill] sm:$0xff] }
 0x588   :  { %9535 = vmatpush1.msra.mxu1 %v9134_v50  ;;  %v19300_v32 = vpop.permute.xlu0 %8995  ;;  %v9120_v6 = vpop.permute.xlu1 %9119  ;;  %v21075_v50 = vld [vmem:[#allocation84_spill] sm:$0xff] }
 0x589   :  { %v9137_v1 = vsel %vm21037_vm5, %v9120_v6, %v9122_v2  ;;  %v9136_v30 = vsel %vm21038_vm13, %v9118_v20, %v9120_v6  ;;  %15516 = vmatmul.mubr.msk.f32.vlgmr.msra.gmra.mrb[26].mxu1 %vm20389_vm15, %v19243_v55  ;;  %v9074_v15 = vsel %vm21042_vm6, %v19300_v32, %v9014_v44  ;;  %vm21054_vm5 = vmmov %vm21041_vm1 }
 0x58a   :  { %12275 = vrot.lane.b32.xlu0 %v19147_v14, %s16392_s15  ;;  %12261 = vrot.lane.b32.xlu1 %v19090_v26, %s16392_s15  ;;  %vm21055_vm13 = vmmov %vm21041_vm1 }
 0x58b   :  { %9605 = vmatprep.subr.mxu0 %v9137_v1  ;;  %9740 = vmatprep.mubr.f32.mxu1 %v21024_v46  ;;  %vm21060_vm6 = vmmov %vm21041_vm1 }
 0x58c   :  { %9606 = vmatpush1.msra.mxu0 %v9136_v30  ;;  %v9024_v34 = vpop.permute.xlu0 %9023  ;;  %v9124_v59 = vpop.permute.xlu1 %9123 }
 0x58d   :  { %v9139_v60 = vsel %vm21039_vm12, %v9124_v59, %v19229_v0  ;;  %v9138_v53 = vsel %vm21040_vm10, %v9122_v2, %v9124_v59  ;;  %15517 = vmatmul.mubr.msk.f32.vlgmr.msra.gmra.mrb[28].mxu0 %vm20389_vm15, %v19243_v55  ;;  %vm21057_vm12 = vnez %v21056_v22  ;;  %vm21059_vm10 = vnez %v21058_v43  ;;  %v21078_v59 = vld [vmem:[#allocation79_spill] sm:$0xff] }
 0x58e   :  { %12919 = vrot.lane.b32.xlu0 %v19068_v18, %s16393_s16  ;;  %12265 = vrot.lane.b32.xlu1 %v19105_v54, %s16392_s15 }
 0x58f   :  { %9676 = vmatprep.subr.mxu1 %v9139_v60  ;;  %9814 = vmatprep.mubr.f32.mxu0 %v21024_v46  ;;  %v21080_v60 = vld [vmem:[#allocation81_spill] sm:$0xff] }
 0x590   :  { %9677 = vmatpush1.msra.mxu1 %v9138_v53  ;;  %v9028_v8 = vpop.permute.xlu0 %9027  ;;  %v9016_v33 = vpop.permute.xlu1 %9015 }
 0x591   :  { %v9043_v10 = vsel %vm21041_vm1, %v9014_v44, %v9016_v33  ;;  %15518 = vmatmul.mubr.msk.f32.vlgmr.msra.gmra.mrb[28].mxu1 %vm20389_vm15, %v19243_v55  ;;  %v9044_v13 = vsel %vm21049_vm7, %v9016_v33, %v9018_v24  ;;  %vm21065_vm7 = vmmov %vm21041_vm1  ;;  %v21067_v44 = vld [vmem:[#allocation71_spill] sm:$0xff] }
 0x592   :  { %12923 = vrot.lane.b32.xlu0 %v19107_v35, %s16393_s16  ;;  %12269 = vrot.lane.b32.xlu1 %v19113_v57, %s16392_s15 }
 0x593   :  { %15519 = vmatprep.subr.msk.mxu0 %vm21044_vm3, %v9043_v10  ;;  %9885 = vmatprep.mubr.f32.mxu1 %v21024_v46 }
 0x594   :  { %15520 = vmatpush1.msk.msra.mxu0 %vm21047_vm14, %v9074_v15  ;;  %v9032_v51 = vpop.permute.xlu0 %9031  ;;  %v9020_v0 = vpop.permute.xlu1 %9019  ;;  %vm21062_vm14 = vnez %v21061_v56  ;;  %v21083_v15 = vld [vmem:[#allocation83_spill] sm:$0xff] }
 0x595   :  { %v9045_v27 = vsel %vm21048_vm4, %v9018_v24, %v9020_v0  ;;  %15521 = vmatmul.mubr.msk.f32.vlgmr.msra.gmra.mrb[22].mxu0 %vm20389_vm15, %v19331_v11  ;;  %vm21064_vm4 = vnez %v21063_v40 }
 0x596   :  { %12917 = vrot.lane.b32.xlu0 %v19051_v48, %s16393_s16  ;;  %12273 = vrot.lane.b32.xlu1 %v19121_v25, %s16392_s15 }
 0x597   :  { %15522 = vmatprep.subr.msk.mxu1 %vm21051_vm0, %v9045_v27  ;;  %9956 = vmatprep.mubr.f32.mxu0 %v21024_v46 }
 0x598   :  { %15523 = vmatpush1.msk.msra.mxu1 %vm21053_vm11, %v9044_v13  ;;  %v9036_v55 = vpop.permute.xlu0 %9035  ;;  %v9022_v63 = vpop.permute.xlu1 %9021  ;;  %v19450_v13 = vld [vmem:[%s20113_s6 + $0x10] sm:$0xff] }
 0x599   :  { %v9046_v45 = vsel %vm21054_vm5, %v9020_v0, %v9022_v63  ;;  %v9047_v36 = vsel %vm21055_vm13, %v9022_v63, %v9024_v34  ;;  %15524 = vmatmul.mubr.msk.f32.vlgmr.msra.gmra.mrb[22].mxu1 %vm20389_vm15, %v19331_v11  ;;  %vm21066_vm5 = vmmov %vm21041_vm1  ;;  %vm21068_vm13 = vnez %v21067_v44  ;;  %v21089_v63 = vld [vmem:[#allocation82_spill] sm:$0xff] }
 0x59a   :  { %12929 = vrot.lane.b32.xlu0 %v19123_v61, %s16393_s16  ;;  %12277 = vrot.lane.b32.xlu1 %v19049_v12, %s16392_s15 }
 0x59b   :  { %15525 = vmatprep.subr.msk.mxu0 %vm21057_vm12, %v9047_v36  ;;  %10027 = vmatprep.mubr.f32.mxu1 %v21024_v46 }
 0x59c   :  { %15526 = vmatpush1.msk.msra.mxu0 %vm21059_vm10, %v9046_v45  ;;  %v9040_v47 = vpop.permute.xlu0 %9039  ;;  %v9026_v29 = vpop.permute.xlu1 %9025 }
 0x59d   :  { %v9048_v20 = vsel %vm21041_vm1, %v9024_v34, %v9026_v29  ;;  %v9049_v17 = vsel %vm21060_vm6, %v9026_v29, %v9028_v8  ;;  %15527 = vmatmul.mubr.msk.f32.vlgmr.msra.gmra.mrb[24].mxu0 %vm20389_vm15, %v19331_v11  ;;  %vm21070_vm1 = vnez %v21069_v3 }
 0x59e   :  { %12933 = vrot.lane.b32.xlu0 %v19129_v9, %s16393_s16  ;;  %12921 = vrot.lane.b32.xlu1 %v19092_v41, %s16393_s16  ;;  %vm21071_vm6 = vmand %vm21034_vm8, %vm21070_vm1  ;;  %vm21095_vm1 = vcmask 64512  }
 0x59f   :  { %15528 = vmatprep.subr.msk.mxu1 %vm21062_vm14, %v9049_v17  ;;  %10098 = vmatprep.mubr.f32.mxu0 %v21024_v46 }
 0x5a0   :  { %15529 = vmatpush1.msk.msra.mxu1 %vm21064_vm4, %v9048_v20  ;;  %v10322_v2 = vpop.permute.xlu0 %10321  ;;  %v9030_v31 = vpop.permute.xlu1 %9029  ;;  %v21098_v20 = vld [vmem:[#allocation90_spill] sm:$0xff] }
 0x5a1   :  { %v9050_v42 = vsel %vm21065_vm7, %v9028_v8, %v9030_v31  ;;  %v9051_v7 = vsel %vm21066_vm5, %v9030_v31, %v9032_v51  ;;  %15530 = vmatmul.mubr.msk.f32.vlgmr.msra.gmra.mrb[24].mxu1 %vm20389_vm15, %v19331_v11  ;;  %vm21072_vm7 = vmmov %vm21066_vm5 }
 0x5a2   :  { %12937 = vrot.lane.b32.xlu0 %v19135_v38, %s16393_s16  ;;  %12925 = vrot.lane.b32.xlu1 %v19115_v49, %s16393_s16 }
 0x5a3   :  { %15531 = vmatprep.subr.msk.mxu0 %vm21068_vm13, %v9051_v7  ;;  %10169 = vmatprep.mubr.f32.mxu1 %v21024_v46  ;;  %vm21074_vm13 = vnez %v21073_v5  ;;  %v21102_v7 = vld [vmem:[#allocation88_spill] sm:$0xff] }
 0x5a4   :  { %15532 = vmatpush1.msk.msra.mxu0 %vm21071_vm6, %v9050_v42  ;;  %v10326_v39 = vpop.permute.xlu0 %10325  ;;  %v9034_v23 = vpop.permute.xlu1 %9033  ;;  %vm21076_vm6 = vnez %v21075_v50 }
 0x5a5   :  { %v9052_v24 = vsel %vm21072_vm7, %v9032_v51, %v9034_v23  ;;  %v9053_v52 = vsel %vm21066_vm5, %v9034_v23, %v9036_v55  ;;  %15533 = vmatmul.mubr.msk.f32.vlgmr.msra.gmra.mrb[26].mxu0 %vm20389_vm15, %v19331_v11  ;;  %vm21077_vm7 = vmmov %vm21066_vm5  ;;  %v21085_v51 = vld [vmem:[#allocation86_spill] sm:$0xff] }
 0x5a6   :  { %12941 = vrot.lane.b32.xlu0 %v19141_v16, %s16393_s16  ;;  %12927 = vrot.lane.b32.xlu1 %v19066_v19, %s16393_s16 }
 0x5a7   :  { %15534 = vmatprep.subr.msk.mxu1 %vm21074_vm13, %v9053_v52  ;;  %10240 = vmatprep.mubr.f32.mxu0 %v21024_v46  ;;  %vm21079_vm13 = vnez %v21078_v59 }
 0x5a8   :  { %15535 = vmatpush1.msk.msra.mxu1 %vm21076_vm6, %v9052_v24  ;;  %v19411_v6 = vpop.permute.xlu0 %10318  ;;  %v9038_v1 = vpop.permute.xlu1 %9037  ;;  %vm21081_vm6 = vnez %v21080_v60 }
 0x5a9   :  { %v9054_v30 = vsel %vm21077_vm7, %v9036_v55, %v9038_v1  ;;  %v9055_v34 = vsel %vm21066_vm5, %v9038_v1, %v9040_v47  ;;  %15536 = vmatmul.mubr.msk.f32.vlgmr.msra.gmra.mrb[26].mxu1 %vm20389_vm15, %v19331_v11  ;;  %vm21082_vm7 = vmmov %vm21066_vm5 }
 0x5aa   :  { %12945 = vrot.lane.b32.xlu0 %v19147_v14, %s16393_s16  ;;  %12931 = vrot.lane.b32.xlu1 %v19090_v26, %s16393_s16 }
 0x5ab   :  { %15537 = vmatprep.subr.msk.mxu0 %vm21079_vm13, %v9055_v34  ;;  %10311 = vmatprep.mubr.f32.mxu1 %v21024_v46  ;;  %vm21084_vm13 = vnez %v21083_v15  ;;  %v21109_v34 = vld [vmem:[#allocation94_spill] sm:$0xff] }
 0x5ac   :  { %15538 = vmatpush1.msk.msra.mxu0 %vm21081_vm6, %v9054_v30  ;;  %v10332_v53 = vpop.permute.xlu0 %10331  ;;  %v9042_v8 = vpop.permute.xlu1 %9041  ;;  %vm21086_vm6 = vnez %v21085_v51  ;;  %v21107_v30 = vld [vmem:[#allocation93_spill] sm:$0xff] }
 0x5ad   :  { %v9056_v33 = vsel %vm21082_vm7, %v9040_v47, %v9042_v8  ;;  %v9057_v10 = vsel %vm21066_vm5, %v9042_v8, %v19300_v32  ;;  %15539 = vmatmul.mubr.msk.f32.vlgmr.msra.gmra.mrb[28].mxu0 %vm20389_vm15, %v19331_v11  ;;  %vm21087_vm7 = vcmask 252928  }
 0x5ae   :  { %13589 = vrot.lane.b32.xlu0 %v19068_v18, %s16394_s19  ;;  %12935 = vrot.lane.b32.xlu1 %v19105_v54, %s16393_s16  ;;  %vm21088_vm5 = vmmov %vm21087_vm7 }
 0x5af   :  { %15540 = vmatprep.subr.msk.mxu1 %vm21084_vm13, %v9057_v10  ;;  %10468 = vmatprep.mubr.f32.mxu0 %v21024_v46  ;;  %v10382_v55 = vsel %vm21088_vm5, %v19411_v6, %v10322_v2  ;;  %vm21094_vm13 = vmmov %vm21088_vm5 }
 0x5b0   :  { %15541 = vmatpush1.msk.msra.mxu1 %vm21086_vm6, %v9056_v33  ;;  %v10336_v0 = vpop.permute.xlu0 %10335  ;;  %v10324_v27 = vpop.permute.xlu1 %10323  ;;  %vm21090_vm6 = vnez %v21089_v63 }
 0x5b1   :  { %v10351_v32 = vsel %vm21087_vm7, %v10322_v2, %v10324_v27  ;;  %15542 = vmatmul.mubr.msk.f32.vlgmr.msra.gmra.mrb[28].mxu1 %vm20389_vm15, %v19331_v11  ;;  %v21091_v11 = vld [vmem:[#allocation85_spill] sm:$0xff]  ;;  %v10352_v29 = vsel %vm21088_vm5, %v10324_v27, %v10326_v39  ;;  %v21112_v27 = vld [vmem:[#allocation91_spill] sm:$0xff] }
 0x5b2   :  { %13593 = vrot.lane.b32.xlu0 %v19107_v35, %s16394_s19  ;;  %12939 = vrot.lane.b32.xlu1 %v19113_v57, %s16393_s16  ;;  %vm21092_vm7 = vnez %v21091_v11 }
 0x5b3   :  { %15544 = vmatprep.subr.msk.mxu0 %vm21090_vm6, %v10351_v32  ;;  %10539 = vmatprep.mubr.f32.mxu1 %v21024_v46  ;;  %vm21093_vm15 = vmand %vm21023_vm2, %vm21092_vm7  ;;  %vm21097_vm6 = vnez %v21096_v58  ;;  %v21114_v32 = vld [vmem:[#allocation92_spill] sm:$0xff] }
 0x5b4   :  { %15545 = vmatpush1.msk.msra.mxu0 %vm21093_vm15, %v10382_v55  ;;  %v10340_v45 = vpop.permute.xlu0 %10339  ;;  %v10328_v36 = vpop.permute.xlu1 %10327  ;;  %vm21099_vm15 = vnez %v21098_v20  ;;  %vm21100_vm2 = vmmov %vm21088_vm5  ;;  %vm21103_vm5 = vnez %v21102_v7 }
 0x5b5   :  { %v10353_v47 = vsel %vm21094_vm13, %v10326_v39, %v10328_v36  ;;  %15546 = vmatmul.mubr.msk.f32.vlgmr.msra.gmra.mrb[22].mxu0 %vm21095_vm1, %v19450_v13  ;;  %vm21101_vm13 = vmmov %vm21100_vm2  ;;  %v21104_v39 = vld [vmem:[#allocation89_spill] sm:$0xff] }
 0x5b6   :  { %13587 = vrot.lane.b32.xlu0 %v19051_v48, %s16394_s19  ;;  %12943 = vrot.lane.b32.xlu1 %v19121_v25, %s16393_s16 }
 0x5b7   :  { %15547 = vmatprep.subr.msk.mxu1 %vm21097_vm6, %v10353_v47  ;;  %10610 = vmatprep.mubr.f32.mxu0 %v21024_v46  ;;  %vm21118_vm6 = vcmask 64512  }
 0x5b8   :  { %15548 = vmatpush1.msk.msra.mxu1 %vm21099_vm15, %v10352_v29  ;;  %v10344_v17 = vpop.permute.xlu0 %10343  ;;  %v10330_v2 = vpop.permute.xlu1 %10329  ;;  %vm21105_vm15 = vnez %v21104_v39  ;;  %v21121_v29 = vld [vmem:[#allocation31_spill] sm:$0xff] }
 0x5b9   :  { %v10354_v31 = vsel %vm21100_vm2, %v10328_v36, %v10330_v2  ;;  %v10355_v42 = vsel %vm21101_vm13, %v10330_v2, %v10332_v53  ;;  %15549 = vmatmul.mubr.msk.f32.vlgmr.msra.gmra.mrb[22].mxu1 %vm21095_vm1, %v19450_v13  ;;  %vm21106_vm13 = vmmov %vm21100_vm2 }
 0x5ba   :  { %13599 = vrot.lane.b32.xlu0 %v19123_v61, %s16394_s19  ;;  %12947 = vrot.lane.b32.xlu1 %v19049_v12, %s16393_s16 }
 0x5bb   :  { %15550 = vmatprep.subr.msk.mxu0 %vm21103_vm5, %v10355_v42  ;;  %10681 = vmatprep.mubr.f32.mxu1 %v21024_v46  ;;  %vm21108_vm5 = vnez %v21107_v30 }
 0x5bc   :  { %15551 = vmatpush1.msk.msra.mxu0 %vm21105_vm15, %v10354_v31  ;;  %v10348_v23 = vpop.permute.xlu0 %10347  ;;  %v10334_v24 = vpop.permute.xlu1 %10333  ;;  %vm21110_vm15 = vnez %v21109_v34 }
 0x5bd   :  { %v10356_v52 = vsel %vm21100_vm2, %v10332_v53, %v10334_v24  ;;  %v10357_v1 = vsel %vm21106_vm13, %v10334_v24, %v10336_v0  ;;  %15552 = vmatmul.mubr.msk.f32.vlgmr.msra.gmra.mrb[24].mxu0 %vm21095_vm1, %v19450_v13  ;;  %vm21111_vm13 = vmmov %vm21100_vm2  ;;  %v21126_v24 = vld [vmem:[#allocation95_spill] sm:$0xff] }
 0x5be   :  { %13603 = vrot.lane.b32.xlu0 %v19129_v9, %s16394_s19  ;;  %13591 = vrot.lane.b32.xlu1 %v19092_v41, %s16394_s19 }
 0x5bf   :  { %15553 = vmatprep.subr.msk.mxu1 %vm21108_vm5, %v10357_v1  ;;  %10752 = vmatprep.mubr.f32.mxu0 %v21024_v46  ;;  %vm21113_vm5 = vnez %v21112_v27 }
 0x5c0   :  { %15554 = vmatpush1.msk.msra.mxu1 %vm21110_vm15, %v10356_v52  ;;  %v10992_v53 = vpop.permute.xlu0 %10991  ;;  %v10338_v8 = vpop.permute.xlu1 %10337  ;;  %v21128_v52 = vld [vmem:[#allocation96_spill] sm:$0xff] }
 0x5c1   :  { %v10358_v33 = vsel %vm21100_vm2, %v10336_v0, %v10338_v8  ;;  %v10359_v10 = vsel %vm21111_vm13, %v10338_v8, %v10340_v45  ;;  %15555 = vmatmul.mubr.msk.f32.vlgmr.msra.gmra.mrb[24].mxu1 %vm21095_vm1, %v19450_v13  ;;  %vm21115_vm2 = vnez %v21114_v32  ;;  %vm21117_vm1 = vmmov %vm21111_vm13 }
 0x5c2   :  { %13607 = vrot.lane.b32.xlu0 %v19135_v38, %s16394_s19  ;;  %13595 = vrot.lane.b32.xlu1 %v19115_v49, %s16394_s19  ;;  %vm21116_vm15 = vmand %vm21034_vm8, %vm21115_vm2  ;;  %vm21122_vm8 = vnez %v21121_v29 }
 0x5c3   :  { %15556 = vmatprep.subr.msk.mxu0 %vm21113_vm5, %v10359_v10  ;;  %10823 = vmatprep.mubr.f32.mxu1 %v21024_v46  ;;  %vm21120_vm5 = vnez %v21119_v4  ;;  %v21131_v10 = vld [vmem:[#allocation98_spill] sm:$0xff] }
 0x5c4   :  { %15557 = vmatpush1.msk.msra.mxu0 %vm21116_vm15, %v10358_v33  ;;  %v10996_v0 = vpop.permute.xlu0 %10995  ;;  %v10342_v55 = vpop.permute.xlu1 %10341  ;;  %vm21123_vm15 = vmmov %vm21117_vm1 }
 0x5c5   :  { %v10360_v36 = vsel %vm21111_vm13, %v10340_v45, %v10342_v55  ;;  %v10361_v47 = vsel %vm21117_vm1, %v10342_v55, %v10344_v17  ;;  %15558 = vmatmul.mubr.msk.f32.vlgmr.msra.gmra.mrb[26].mxu0 %vm21118_vm6, %v19450_v13  ;;  %vm21124_vm6 = vmmov %vm21117_vm1  ;;  %vm21125_vm13 = vcmask 64512   ;;  %vm21127_vm1 = vnez %v21126_v24  ;;  %v21133_v55 = vld [vmem:[#allocation30_spill] sm:$0xff] }
 0x5c6   :  { %13611 = vrot.lane.b32.xlu0 %v19141_v16, %s16394_s19  ;;  %13597 = vrot.lane.b32.xlu1 %v19066_v19, %s16394_s19 }
 0x5c7   :  { %15559 = vmatprep.subr.msk.mxu1 %vm21120_vm5, %v10361_v47  ;;  %10894 = vmatprep.mubr.f32.mxu0 %v21024_v46  ;;  %v19569_v47 = vld [vmem:[%s20113_s6 + $0x18] sm:$0xff] }
 0x5c8   :  { %15560 = vmatpush1.msk.msra.mxu1 %vm21122_vm8, %v10360_v36  ;;  %v19530_v45 = vpop.permute.xlu0 %10988  ;;  %v10346_v2 = vpop.permute.xlu1 %10345  ;;  %vm21129_vm8 = vnez %v21128_v52 }
 0x5c9   :  { %v10362_v31 = vsel %vm21123_vm15, %v10344_v17, %v10346_v2  ;;  %v10363_v42 = vsel %vm21124_vm6, %v10346_v2, %v10348_v23  ;;  %15561 = vmatmul.mubr.msk.f32.vlgmr.msra.gmra.mrb[26].mxu1 %vm21125_vm13, %v19450_v13  ;;  %vm21130_vm15 = vmmov %vm21124_vm6 }
 0x5ca   :  { %13615 = vrot.lane.b32.xlu0 %v19147_v14, %s16394_s19  ;;  %13601 = vrot.lane.b32.xlu1 %v19090_v26, %s16394_s19 }
 0x5cb   :  { %15562 = vmatprep.subr.msk.mxu0 %vm21127_vm1, %v10363_v42  ;;  %10965 = vmatprep.mubr.f32.mxu1 %v21024_v46  ;;  %vm21132_vm1 = vnez %v21131_v10 }
 0x5cc   :  { %15563 = vmatpush1.msk.msra.mxu0 %vm21129_vm8, %v10362_v31  ;;  %v11002_v17 = vpop.permute.xlu0 %11001  ;;  %v10350_v1 = vpop.permute.xlu1 %10349  ;;  %vm21134_vm8 = vnez %v21133_v55 }
 0x5cd   :  { %v10364_v8 = vsel %vm21130_vm15, %v10348_v23, %v10350_v1  ;;  %v10365_v33 = vsel %vm21124_vm6, %v10350_v1, %v19411_v6  ;;  %15564 = vmatmul.mubr.msk.f32.vlgmr.msra.gmra.mrb[28].mxu0 %vm21125_vm13, %v19450_v13  ;;  %vm21135_vm15 = vcmask 7168   ;;  %vm21136_vm6 = vmmov %vm21125_vm13 }
 0x5ce   :  { %14259 = vrot.lane.b32.xlu0 %v19068_v18, %s16395_s20  ;;  %13605 = vrot.lane.b32.xlu1 %v19105_v54, %s16394_s19  ;;  %vm21137_vm13 = vmmov %vm21135_vm15 }
 0x5cf   :  { %15565 = vmatprep.subr.msk.mxu1 %vm21132_vm1, %v10365_v33  ;;  %11138 = vmatprep.mubr.f32.mxu0 %v21024_v46  ;;  %v11052_v2 = vsel %vm21137_vm13, %v19530_v45, %v10992_v53 }
 0x5d0   :  { %15566 = vmatpush1.msk.msra.mxu1 %vm21134_vm8, %v10364_v8  ;;  %v11006_v23 = vpop.permute.xlu0 %11005  ;;  %v10994_v36 = vpop.permute.xlu1 %10993 }
 0x5d1   :  { %v11021_v6 = vsel %vm21135_vm15, %v10992_v53, %v10994_v36  ;;  %15567 = vmatmul.mubr.msk.f32.vlgmr.msra.gmra.mrb[28].mxu1 %vm21136_vm6, %v19450_v13  ;;  %vm21138_vm15 = vmmov %vm21137_vm13  ;;  %v11022_v53 = vsel %vm21137_vm13, %v10994_v36, %v10996_v0 }
 0x5d2   :  { %14263 = vrot.lane.b32.xlu0 %v19107_v35, %s16395_s20  ;;  %13609 = vrot.lane.b32.xlu1 %v19113_v57, %s16394_s19 }
 0x5d3   :  { %15569 = vmatprep.subr.msk.mxu0 %vm21044_vm3, %v11021_v6  ;;  %11209 = vmatprep.mubr.f32.mxu1 %v21024_v46 }
 0x5d4   :  { %15570 = vmatpush1.msk.msra.mxu0 %vm21046_vm9, %v11052_v2  ;;  %v11010_v13 = vpop.permute.xlu0 %11009  ;;  %v10998_v31 = vpop.permute.xlu1 %10997  ;;  %vm21141_vm9 = vcmask 64512  }
 0x5d5   :  { %v11023_v42 = vsel %vm21138_vm15, %v10996_v0, %v10998_v31  ;;  %15571 = vmatmul.mubr.msk.f32.vlgmr.msra.gmra.mrb[22].mxu0 %vm21136_vm6, %v19569_v47  ;;  %vm21139_vm15 = vmmov %vm21137_vm13 }
 0x5d6   :  { %14257 = vrot.lane.b32.xlu0 %v19051_v48, %s16395_s20  ;;  %13613 = vrot.lane.b32.xlu1 %v19121_v25, %s16394_s19  ;;  %vm21140_vm6 = vmmov %vm21137_vm13 }
 0x5d7   :  { %15572 = vmatprep.subr.msk.mxu1 %vm21051_vm0, %v11023_v42  ;;  %11280 = vmatprep.mubr.f32.mxu0 %v21024_v46  ;;  %vm21142_vm13 = vmmov %vm21140_vm6 }
 0x5d8   :  { %15573 = vmatpush1.msk.msra.mxu1 %vm21053_vm11, %v11022_v53  ;;  %v11014_v1 = vpop.permute.xlu0 %11013  ;;  %v11000_v8 = vpop.permute.xlu1 %10999 }
 0x5d9   :  { %v11024_v33 = vsel %vm21139_vm15, %v10998_v31, %v11000_v8  ;;  %v11025_v6 = vsel %vm21140_vm6, %v11000_v8, %v11002_v17  ;;  %15574 = vmatmul.mubr.msk.f32.vlgmr.msra.gmra.mrb[22].mxu1 %vm21141_vm9, %v19569_v47  ;;  %vm21143_vm15 = vmmov %vm21140_vm6 }
 0x5da   :  { %14269 = vrot.lane.b32.xlu0 %v19123_v61, %s16395_s20  ;;  %13617 = vrot.lane.b32.xlu1 %v19049_v12, %s16394_s19 }
 0x5db   :  { %15575 = vmatprep.subr.msk.mxu0 %vm21057_vm12, %v11025_v6  ;;  %11351 = vmatprep.mubr.f32.mxu1 %v21024_v46 }
 0x5dc   :  { %15576 = vmatpush1.msk.msra.mxu0 %vm21059_vm10, %v11024_v33  ;;  %v11018_v0 = vpop.permute.xlu0 %11017  ;;  %v11004_v36 = vpop.permute.xlu1 %11003 }
 0x5dd   :  { %v11026_v2 = vsel %vm21142_vm13, %v11002_v17, %v11004_v36  ;;  %v11027_v31 = vsel %vm21143_vm15, %v11004_v36, %v11006_v23  ;;  %15577 = vmatmul.mubr.msk.f32.vlgmr.msra.gmra.mrb[24].mxu0 %vm21141_vm9, %v19569_v47  ;;  %vm21144_vm13 = vmmov %vm21140_vm6 }
 0x5de   :  { %14273 = vrot.lane.b32.xlu0 %v19129_v9, %s16395_s20  ;;  %14261 = vrot.lane.b32.xlu1 %v19092_v41, %s16395_s20  ;;  %vm21145_vm15 = vmmov %vm21141_vm9  ;;  %vm21146_vm9 = vnez %v21067_v44 }
 0x5df   :  { %15578 = vmatprep.subr.msk.mxu1 %vm21062_vm14, %v11027_v31  ;;  %11422 = vmatprep.mubr.f32.mxu0 %v21024_v46 }
 0x5e0   :  { %15579 = vmatpush1.msk.msra.mxu1 %vm21064_vm4, %v11026_v2  ;;  %v19617_v17 = vpop.permute.xlu0 %12249  ;;  %v11008_v42 = vpop.permute.xlu1 %11007  ;;  %vm21147_vm4 = vnez %v21069_v3 }
 0x5e1   :  { %v11028_v53 = vsel %vm21140_vm6, %v11006_v23, %v11008_v42  ;;  %v11029_v8 = vsel %vm21144_vm13, %v11008_v42, %v11010_v13  ;;  %15580 = vmatmul.mubr.msk.f32.vlgmr.msra.gmra.mrb[24].mxu1 %vm21145_vm15, %v19569_v47  ;;  %vm21148_vm13 = vmmov %vm21140_vm6 }
 0x5e2   :  { %14277 = vrot.lane.b32.xlu0 %v19135_v38, %s16395_s20  ;;  %14265 = vrot.lane.b32.xlu1 %v19115_v49, %s16395_s20 }
 0x5e3   :  { %15581 = vmatprep.subr.msk.mxu0 %vm21146_vm9, %v11029_v8  ;;  %11493 = vmatprep.mubr.f32.mxu1 %v21024_v46  ;;  %vm21149_vm9 = vnez %v21073_v5 }
 0x5e4   :  { %15582 = vmatpush1.msk.msra.mxu0 %vm21147_vm4, %v11028_v53  ;;  %v19632_v23 = vpop.permute.xlu0 %12253  ;;  %v11012_v33 = vpop.permute.xlu1 %11011  ;;  %vm21150_vm4 = vnez %v21075_v50  ;;  %v15231_v53 = vld [vmem:[%s20115_s8] sm:$0xff] }
 0x5e5   :  { %v11030_v6 = vsel %vm21140_vm6, %v11010_v13, %v11012_v33  ;;  %v11031_v36 = vsel %vm21148_vm13, %v11012_v33, %v11014_v1  ;;  %15583 = vmatmul.mubr.msk.f32.vlgmr.msra.gmra.mrb[26].mxu0 %vm21145_vm15, %v19569_v47  ;;  %vm21151_vm13 = vmmov %vm21140_vm6 }
 0x5e6   :  { %14281 = vrot.lane.b32.xlu0 %v19141_v16, %s16395_s20  ;;  %14267 = vrot.lane.b32.xlu1 %v19066_v19, %s16395_s20 }
 0x5e7   :  { %15584 = vmatprep.subr.msk.mxu1 %vm21149_vm9, %v11031_v36  ;;  %11564 = vmatprep.mubr.f32.mxu0 %v21024_v46  ;;  %vm21152_vm9 = vnez %v21078_v59  ;;  %v15593_v36 = vld [vmem:[%s20113_s6 + $0x20] sm:$0xff] }
 0x5e8   :  { %15585 = vmatpush1.msk.msra.mxu1 %vm21150_vm4, %v11030_v6  ;;  %v19647_v13 = vpop.permute.xlu0 %12247  ;;  %v11016_v2 = vpop.permute.xlu1 %11015 }
 0x5e9   :  { %v11032_v31 = vsel %vm21140_vm6, %v11014_v1, %v11016_v2  ;;  %v11033_v42 = vsel %vm21151_vm13, %v11016_v2, %v11018_v0  ;;  %15586 = vmatmul.mubr.msk.f32.vlgmr.msra.gmra.mrb[26].mxu1 %vm21145_vm15, %v19569_v47  ;;  %vm21153_vm6 = vnez %v21080_v60  ;;  %vm21154_vm13 = vmmov %vm21145_vm15  ;;  %vm21155_vm15 = vcmask 7168  }
 0x5ea   :  { %14285 = vrot.lane.b32.xlu0 %v19147_v14, %s16395_s20  ;;  %14271 = vrot.lane.b32.xlu1 %v19090_v26, %s16395_s20 }
 0x5eb   :  { %15587 = vmatprep.subr.msk.mxu0 %vm21152_vm9, %v11033_v42  ;;  %11635 = vmatprep.mubr.f32.mxu1 %v21024_v46  ;;  %vm21156_vm9 = vmmov %vm21155_vm15 }
 0x5ec   :  { %15588 = vmatpush1.msk.msra.mxu0 %vm21153_vm6, %v11032_v31  ;;  %v19665_v1 = vpop.permute.xlu0 %12259  ;;  %v11020_v8 = vpop.permute.xlu1 %11019  ;;  %vm21157_vm6 = vnez %v21083_v15 }
 0x5ed   :  { %15589 = vmatmul.mubr.msk.f32.vlgmr.msra.gmra.mrb[28].mxu0 %vm21154_vm13, %v19569_v47  ;;  %11663 = vmatprep.subr.mxu0 %v19068_v18  ;;  %v11034_v33 = vsel %vm21155_vm15, %v11018_v0, %v11020_v8  ;;  %v11035_v6 = vsel %vm21156_vm9, %v11020_v8, %v19530_v45  ;;  %vm21158_vm13 = vnez %v21085_v51  ;;  %vm21159_vm9 = vcmask 64512  }
 0x5ee   :  { %11664 = vmatpush1.msra.mxu0 %v19051_v48  ;;  %15234 = vperm.xlu0 %16346, %v15231_v53   ;;  %vm21160_vm15 = vmmov %vm21159_vm9 }
 0x5ef   :  { %14275 = vrot.lane.b32.xlu1 %v19105_v54, %s16395_s20  ;;  %15590 = vmatprep.subr.msk.mxu1 %vm21157_vm6, %v11035_v6  ;;  %vm21164_vm6 = vnez %v21089_v63  ;;  %vm21166_vm4 = vmmov %vm21159_vm9 }
 0x5f0   :  { %11805 = vmatprep.subr.mxu0 %v19066_v19  ;;  %15591 = vmatpush1.msk.msra.mxu1 %vm21158_vm13, %v11034_v33  ;;  %v19684_v18 = vpop.permute.xlu0 %12263  ;;  %v12252_v45 = vpop.permute.xlu1 %12251  ;;  %vm21163_vm13 = vcmask 1039360  }
 0x5f1   :  { %11727 = vmatprep.mubr.f32.mxu0 %v21024_v46  ;;  %15592 = vmatmul.mubr.msk.f32.vlgmr.msra.gmra.mrb[28].mxu1 %vm21159_vm9, %v19569_v47 }
 0x5f2   :  { %15594 = vmatmul.mubr.msk.f32.vlgmr.msra.gmra.mrb[22].mxu0 %vm21160_vm15, %v15593_v36  ;;  %11734 = vmatprep.subr.mxu1 %v19107_v35  ;;  %vm21161_vm15 = vmmov %vm21159_vm9 }
 0x5f3   :  { %11806 = vmatpush1.msra.mxu0 %v19115_v49  ;;  %11735 = vmatpush1.msra.mxu1 %v19092_v41  ;;  %v12279_v49 = vsel %vm21163_vm13, %v19647_v13, %v19617_v17 }
 0x5f4   :  { %11947 = vmatprep.subr.mxu0 %v19105_v54  ;;  %14279 = vrot.lane.b32.xlu1 %v19113_v57, %s16395_s20  ;;  %v19696_v48 = vpop.permute.xlu0 %12267  ;;  %v12256_v19 = vpop.permute.xlu1 %12255 }
 0x5f5   :  { %11876 = vmatprep.subr.mxu1 %v19090_v26  ;;  %11798 = vmatprep.mubr.f32.mxu1 %v21024_v46  ;;  %v12280_v26 = vsel %vm21163_vm13, %v19617_v17, %v12252_v45 }
 0x5f6   :  { %11869 = vmatprep.mubr.f32.mxu0 %v21024_v46  ;;  %15595 = vmatmul.mubr.msk.f32.vlgmr.msra.gmra.mrb[22].mxu1 %vm21159_vm9, %v15593_v36 }
 0x5f7   :  { %15596 = vmatmul.mubr.msk.f32.vlgmr.msra.gmra.mrb[24].mxu0 %vm21161_vm15, %v15593_v36  ;;  %11877 = vmatpush1.msra.mxu1 %v19123_v61  ;;  %vm21162_vm15 = vmmov %vm21159_vm9 }
 0x5f8   :  { %11948 = vmatpush1.msra.mxu0 %v19129_v9  ;;  %12018 = vmatprep.subr.mxu1 %v19113_v57  ;;  %v12272_v41 = vpop.permute.xlu0 %12271  ;;  %v12258_v54 = vpop.permute.xlu1 %12257 }
 0x5f9   :  { %12089 = vmatprep.subr.mxu0 %v19121_v25  ;;  %14283 = vrot.lane.b32.xlu1 %v19121_v25, %s16395_s20 }
 0x5fa   :  { %11940 = vmatprep.mubr.f32.mxu1 %v21024_v46  ;;  %12011 = vmatprep.mubr.f32.mxu0 %v21024_v46 }
 0x5fb   :  { %15597 = vmatmul.mubr.msk.f32.vlgmr.msra.gmra.mrb[24].mxu1 %vm21159_vm9, %v15593_v36  ;;  %15598 = vmatmul.mubr.msk.f32.vlgmr.msra.gmra.mrb[26].mxu0 %vm21162_vm15, %v15593_v36  ;;  %vm21165_vm15 = vmmov %vm21163_vm13 }
 0x5fc   :  { %12019 = vmatpush1.msra.mxu1 %v19135_v38  ;;  %12090 = vmatpush1.msra.mxu0 %v19141_v16  ;;  %v12276_v35 = vpop.permute.xlu0 %12275  ;;  %v12262_v57 = vpop.permute.xlu1 %12261  ;;  %v12282_v25 = vsel %vm21165_vm15, %v19632_v23, %v12256_v19  ;;  %v15602_v38 = vld [vmem:[%s20113_s6 + $0x28] sm:$0xff] }
 0x5fd   :  { %12160 = vmatprep.subr.mxu1 %v19049_v12  ;;  %15603 = vmatprep.subr.msk.mxu0 %vm21164_vm6, %v12280_v26  ;;  %vm21167_vm6 = vmmov %vm21163_vm13  ;;  %vm21169_vm13 = vnez %v21102_v7 }
 0x5fe   :  { %14287 = vrot.lane.b32.xlu1 %v19049_v12, %s16395_s20  ;;  %12082 = vmatprep.mubr.f32.mxu1 %v21024_v46  ;;  %v12284_v12 = vsel %vm21167_vm6, %v12258_v54, %v19665_v1 }
 0x5ff   :  { %12153 = vmatprep.mubr.f32.mxu0 %v21024_v46  ;;  %15599 = vmatmul.mubr.msk.f32.vlgmr.msra.gmra.mrb[26].mxu1 %vm21159_vm9, %v15593_v36  ;;  %vm21168_vm9 = vnez %v21096_v58 }
 0x600   :  { %15600 = vmatmul.mubr.msk.f32.vlgmr.msra.gmra.mrb[28].mxu0 %vm21166_vm4, %v15593_v36  ;;  %12161 = vmatpush1.msra.mxu1 %v19147_v14  ;;  %v12920_v61 = vpop.permute.xlu0 %12919  ;;  %v12266_v9 = vpop.permute.xlu1 %12265  ;;  %vm21170_vm4 = vmmov %vm21167_vm6  ;;  %vm21171_vm6 = vcmask 64512  }
 0x601   :  { %15604 = vmatpush1.msk.msra.mxu0 %vm21092_vm7, %v12279_v49  ;;  %15606 = vmatprep.subr.msk.mxu1 %vm21168_vm9, %v12282_v25  ;;  %v12281_v16 = vsel %vm21170_vm4, %v12252_v45, %v19632_v23  ;;  %vm21172_vm15 = vmmov %vm21170_vm4 }
 0x602   :  { %15609 = vmatprep.subr.msk.mxu0 %vm21169_vm13, %v12284_v12  ;;  %12224 = vmatprep.mubr.f32.mxu1 %v21024_v46  ;;  %v12288_v14 = vsel %vm21172_vm15, %v12266_v9, %v19696_v48  ;;  %vm21173_vm9 = vmmov %vm21170_vm4  ;;  %vm21176_vm13 = vnez %v21098_v20  ;;  %vm21179_vm15 = vnez %v21112_v27 }
 0x603   :  { %12397 = vmatprep.mubr.f32.mxu0 %v21024_v46  ;;  %15601 = vmatmul.mubr.msk.f32.vlgmr.msra.gmra.mrb[28].mxu1 %vm21171_vm6, %v15593_v36  ;;  %v12283_v47 = vsel %vm21173_vm9, %v12256_v19, %v12258_v54  ;;  %vm21174_vm7 = vmmov %vm21170_vm4  ;;  %vm21177_vm4 = vnez %v21104_v39 }
 0x604   :  { %v12286_v0 = vsel %vm21174_vm7, %v12262_v57, %v19684_v18  ;;  %vm21175_vm14 = vmmov %vm21171_vm6  ;;  %15607 = vmatpush1.msk.msra.mxu1 %vm21176_vm13, %v12281_v16  ;;  %v12924_v17 = vpop.permute.xlu0 %12923  ;;  %v12270_v2 = vpop.permute.xlu1 %12269  ;;  %vm21178_vm6 = vnez %v21107_v30  ;;  %12468 = vmatprep.mubr.f32.mxu1 %v21024_v46  ;;  %v21207_v16 = vld [vmem:[#allocation40_spill] sm:$0xff] }
 0x605   :  { %15605 = vmatmul.mubr.msk.f32.vlgmr.msra.gmra.mrb[22].mxu0 %vm21175_vm14, %v15602_v38  ;;  %15612 = vmatprep.subr.msk.mxu1 %vm21178_vm6, %v12286_v0  ;;  %vm21180_vm9 = vmmov %vm21174_vm7  ;;  %vm21185_vm6 = vnez %v21109_v34 }
 0x606   :  { %15610 = vmatpush1.msk.msra.mxu0 %vm21177_vm4, %v12283_v47  ;;  %v12290_v23 = vsel %vm21180_vm9, %v12270_v2, %v12272_v41  ;;  %vm21181_vm14 = vmmov %vm21174_vm7  ;;  %12539 = vmatprep.mubr.f32.mxu0 %v21024_v46  ;;  %vm21182_vm7 = vcmask 64512  }
 0x607   :  { %15615 = vmatprep.subr.msk.mxu0 %vm21179_vm15, %v12288_v14  ;;  %v12285_v31 = vsel %vm21181_vm14, %v19665_v1, %v12262_v57  ;;  %15608 = vmatmul.mubr.msk.f32.vlgmr.msra.gmra.mrb[22].mxu1 %vm21182_vm7, %v15602_v38  ;;  %vm21183_vm13 = vmmov %vm21180_vm9 }
 0x608   :  { %v12287_v42 = vsel %vm21183_vm13, %v19684_v18, %v12266_v9  ;;  %vm21184_vm4 = vmmov %vm21182_vm7  ;;  %15613 = vmatpush1.msk.msra.mxu1 %vm21185_vm6, %v12285_v31  ;;  %v19773_v53 = vpop.permute.xlu0 %12917  ;;  %v12274_v8 = vpop.permute.xlu1 %12273  ;;  %12610 = vmatprep.mubr.f32.mxu1 %v21024_v46  ;;  %vm21188_vm7 = vnez %v21126_v24  ;;  %v21294_v24 = vld [vmem:[#allocation8_spill] sm:$0xff] }
 0x609   :  { %15611 = vmatmul.mubr.msk.f32.vlgmr.msra.gmra.mrb[24].mxu0 %vm21184_vm4, %v15602_v38  ;;  %15618 = vmatprep.subr.msk.mxu1 %vm21120_vm5, %v12290_v23  ;;  %v12292_v1 = vsel %vm21180_vm9, %v12274_v8, %v12276_v35  ;;  %vm21186_vm14 = vmmov %vm21180_vm9 }
 0x60a   :  { %15616 = vmatpush1.msk.msra.mxu0 %vm21115_vm2, %v12287_v42  ;;  %v12291_v33 = vsel %vm21186_vm14, %v12272_v41, %v12274_v8  ;;  %12681 = vmatprep.mubr.f32.mxu0 %v21024_v46  ;;  %vm21187_vm13 = vmmov %vm21180_vm9  ;;  %vm21189_vm2 = vnez %v21121_v29  ;;  %vm21191_vm9 = vnez %v21128_v52  ;;  %v21230_v8 = vld [vmem:[#allocation42_spill] sm:$0xff]  ;;  %v21295_v52 = vld [vmem:[#allocation11_spill] sm:$0xff] }
 0x60b   :  { %v12289_v6 = vsel %vm21187_vm13, %v19696_v48, %v12270_v2  ;;  %15614 = vmatmul.mubr.msk.f32.vlgmr.msra.gmra.mrb[24].mxu1 %vm21184_vm4, %v15602_v38  ;;  %15621 = vmatprep.subr.msk.mxu0 %vm21188_vm7, %v12292_v1  ;;  %vm21190_vm5 = vmmov %vm21184_vm4  ;;  %v21300_v55 = vcombine.high %v21294_v24, %v21295_v52 }
 0x60c   :  { %15619 = vmatpush1.msk.msra.mxu1 %vm21189_vm2, %v12289_v6  ;;  %v12930_v36 = vpop.permute.xlu0 %12929  ;;  %v12278_v18 = vpop.permute.xlu1 %12277  ;;  %vm21192_vm14 = vmmov %vm21187_vm13  ;;  %12752 = vmatprep.mubr.f32.mxu1 %v21024_v46 }
 0x60d   :  { %15617 = vmatmul.mubr.msk.f32.vlgmr.msra.gmra.mrb[26].mxu0 %vm21190_vm5, %v15602_v38  ;;  %v12293_v45 = vsel %vm21192_vm14, %v12276_v35, %v12278_v18  ;;  %vm21193_vm15 = vmmov %vm21187_vm13  ;;  %vm21198_vm14 = vnez %v21045_v28 }
 0x60e   :  { %15622 = vmatpush1.msk.msra.mxu0 %vm21191_vm9, %v12291_v33  ;;  %v12311_v48 = vsel %vm21193_vm15, %v12278_v18, %v19647_v13  ;;  %12823 = vmatprep.mubr.f32.mxu0 %v21024_v46  ;;  %vm21194_vm13 = vmmov %vm21184_vm4  ;;  %v19810_v13 = vld [vmem:[%s20113_s6 + $0x30] sm:$0xff] }
 0x60f   :  { %15624 = vmatprep.subr.msk.mxu1 %vm21132_vm1, %v12311_v48  ;;  %15620 = vmatmul.mubr.msk.f32.vlgmr.msra.gmra.mrb[26].mxu1 %vm21194_vm13, %v15602_v38  ;;  %vm21195_vm5 = vmmov %vm21184_vm4  ;;  %vm21196_vm4 = vcmask 793600  }
 0x610   :  { %15625 = vmatpush1.msk.msra.mxu1 %vm21134_vm8, %v12293_v45  ;;  %v12934_v19 = vpop.permute.xlu0 %12933  ;;  %v12922_v41 = vpop.permute.xlu1 %12921  ;;  %12894 = vmatprep.mubr.f32.mxu1 %v21024_v46  ;;  %vm21197_vm15 = vmmov %vm21196_vm4 }
 0x611   :  { %15623 = vmatmul.mubr.msk.f32.vlgmr.msra.gmra.mrb[28].mxu0 %vm21195_vm5, %v15602_v38  ;;  %v12950_v54 = vsel %vm21196_vm4, %v12920_v61, %v12922_v41  ;;  %v12949_v26 = vsel %vm21197_vm15, %v19773_v53, %v12920_v61  ;;  %vm21199_vm13 = vmmov %vm21195_vm5 }
 0x612   :  { %13067 = vmatprep.mubr.f32.mxu0 %v21024_v46  ;;  %15628 = vmatprep.subr.msk.mxu0 %vm21044_vm3, %v12950_v54  ;;  %vm21200_vm15 = vmmov %vm21196_vm4 }
 0x613   :  { %15629 = vmatpush1.msk.msra.mxu0 %vm21198_vm14, %v12949_v26  ;;  %15626 = vmatmul.mubr.msk.f32.vlgmr.msra.gmra.mrb[28].mxu1 %vm21199_vm13, %v15602_v38  ;;  %v12951_v25 = vsel %vm21200_vm15, %v12922_v41, %v12924_v17  ;;  %vm21201_vm3 = vmmov %vm21195_vm5  ;;  %vm21209_vm15 = vnez %v21061_v56 }
 0x614   :  { %v12938_v35 = vpop.permute.xlu0 %12937  ;;  %v12926_v57 = vpop.permute.xlu1 %12925  ;;  %13138 = vmatprep.mubr.f32.mxu1 %v21024_v46  ;;  %vm21202_vm14 = vmmov %vm21196_vm4 }
 0x615   :  { %15630 = vmatmul.mubr.msk.f32.vlgmr.msra.gmra.mrb[22].mxu0 %vm21195_vm5, %v19810_v13  ;;  %v12952_v49 = vsel %vm21196_vm4, %v12924_v17, %v12926_v57  ;;  %vm21203_vm13 = vmmov %vm21196_vm4 }
 0x616   :  { %13209 = vmatprep.mubr.f32.mxu0 %v21024_v46  ;;  %15631 = vmatprep.subr.msk.mxu1 %vm21051_vm0, %v12952_v49  ;;  %vm21204_vm0 = vmmov %vm21201_vm3 }
 0x617   :  { %15632 = vmatpush1.msk.msra.mxu1 %vm21053_vm11, %v12951_v25  ;;  %vm21205_vm11 = vmmov %vm21196_vm4 }
 0x618   :  { %v12942_v37 = vpop.permute.xlu0 %12941  ;;  %v12928_v28 = vpop.permute.xlu1 %12927  ;;  %15633 = vmatmul.mubr.msk.f32.vlgmr.msra.gmra.mrb[22].mxu1 %vm21201_vm3, %v19810_v13  ;;  %vm21206_vm5 = vmmov %vm21196_vm4  ;;  %vm21208_vm4 = vnez %v21207_v16 }
 0x619   :  { %v12953_v61 = vsel %vm21202_vm14, %v12926_v57, %v12928_v28  ;;  %v12954_v9 = vsel %vm21203_vm13, %v12928_v28, %v12930_v36  ;;  %13280 = vmatprep.mubr.f32.mxu1 %v21024_v46  ;;  %vm21210_vm3 = vmand %vm21208_vm4, %vm21209_vm15 }
 0x61a   :  { %15634 = vmatprep.subr.msk.mxu0 %vm21057_vm12, %v12954_v9  ;;  %vm21211_vm12 = vnez %v21063_v40  ;;  %vm21213_vm14 = vmmov %vm21206_vm5 }
 0x61b   :  { %15635 = vmatpush1.msk.msra.mxu0 %vm21059_vm10, %v12953_v61  ;;  %vm21212_vm10 = vmmov %vm21204_vm0 }
 0x61c   :  { %v12946_v21 = vpop.permute.xlu0 %12945  ;;  %v12932_v62 = vpop.permute.xlu1 %12931  ;;  %15636 = vmatmul.mubr.msk.f32.vlgmr.msra.gmra.mrb[24].mxu0 %vm21204_vm0, %v19810_v13  ;;  %vm21214_vm13 = vmmov %vm21206_vm5  ;;  %vm21215_vm0 = vnez %v21067_v44 }
 0x61d   :  { %v12955_v12 = vsel %vm21205_vm11, %v12930_v36, %v12932_v62  ;;  %v12956_v38 = vsel %vm21206_vm5, %v12932_v62, %v12934_v19  ;;  %13351 = vmatprep.mubr.f32.mxu0 %v21024_v46  ;;  %vm21216_vm11 = vnez %v21069_v3  ;;  %vm21217_vm5 = vmmov %vm21212_vm10 }
 0x61e   :  { %15637 = vmatprep.subr.msk.mxu1 %vm21210_vm3, %v12956_v38  ;;  %vm21218_vm15 = vmmov %vm21214_vm13 }
 0x61f   :  { %15638 = vmatpush1.msk.msra.mxu1 %vm21211_vm12, %v12955_v12  ;;  %vm21219_vm3 = vmmov %vm21214_vm13  ;;  %vm21220_vm12 = vnez %v21073_v5 }
 0x620   :  { %v13590_v22 = vpop.permute.xlu0 %13589  ;;  %v12936_v43 = vpop.permute.xlu1 %12935  ;;  %15639 = vmatmul.mubr.msk.f32.vlgmr.msra.gmra.mrb[24].mxu1 %vm21212_vm10, %v19810_v13  ;;  %vm21221_vm10 = vnez %v21075_v50 }
 0x621   :  { %v12957_v14 = vsel %vm21213_vm14, %v12934_v19, %v12936_v43  ;;  %v12958_v47 = vsel %vm21214_vm13, %v12936_v43, %v12938_v35  ;;  %13422 = vmatprep.mubr.f32.mxu1 %v21024_v46  ;;  %vm21222_vm14 = vmmov %vm21217_vm5 }
 0x622   :  { %15640 = vmatprep.subr.msk.mxu0 %vm21215_vm0, %v12958_v47  ;;  %vm21223_vm13 = vmmov %vm21219_vm3 }
 0x623   :  { %15641 = vmatpush1.msk.msra.mxu0 %vm21216_vm11, %v12957_v14  ;;  %vm21224_vm0 = vmmov %vm21219_vm3  ;;  %vm21225_vm11 = vnez %v21078_v59 }
 0x624   :  { %v13594_v56 = vpop.permute.xlu0 %13593  ;;  %v12940_v40 = vpop.permute.xlu1 %12939  ;;  %15642 = vmatmul.mubr.msk.f32.vlgmr.msra.gmra.mrb[26].mxu0 %vm21217_vm5, %v19810_v13  ;;  %vm21226_vm5 = vnez %v21080_v60 }
 0x625   :  { %v12959_v0 = vsel %vm21218_vm15, %v12938_v35, %v12940_v40  ;;  %v12960_v17 = vsel %vm21219_vm3, %v12940_v40, %v12942_v37  ;;  %13493 = vmatprep.mubr.f32.mxu0 %v21024_v46  ;;  %vm21227_vm15 = vmmov %vm21222_vm14  ;;  %v15663_v40 = vld [vmem:[%s20113_s6 + $0x40] sm:$0xff] }
 0x626   :  { %15643 = vmatprep.subr.msk.mxu1 %vm21220_vm12, %v12960_v17  ;;  %vm21228_vm3 = vmmov %vm21224_vm0 }
 0x627   :  { %15644 = vmatpush1.msk.msra.mxu1 %vm21221_vm10, %v12959_v0  ;;  %vm21229_vm12 = vmmov %vm21224_vm0  ;;  %vm21231_vm10 = vnez %v21230_v8 }
 0x628   :  { %v19868_v44 = vpop.permute.xlu0 %13587  ;;  %v12944_v3 = vpop.permute.xlu1 %12943  ;;  %15645 = vmatmul.mubr.msk.f32.vlgmr.msra.gmra.mrb[26].mxu1 %vm21222_vm14, %v19810_v13  ;;  %vm21232_vm14 = vnez %v21083_v15 }
 0x629   :  { %v12961_v2 = vsel %vm21223_vm13, %v12942_v37, %v12944_v3  ;;  %v12962_v23 = vsel %vm21224_vm0, %v12944_v3, %v12946_v21  ;;  %13564 = vmatprep.mubr.f32.mxu1 %v21024_v46  ;;  %vm21233_vm13 = vmand %vm21231_vm10, %vm21232_vm14  ;;  %vm21234_vm0 = vnez %v21085_v51 }
 0x62a   :  { %15646 = vmatprep.subr.msk.mxu0 %vm21225_vm11, %v12962_v23  ;;  %vm21235_vm11 = vmmov %vm21227_vm15 }
 0x62b   :  { %15647 = vmatpush1.msk.msra.mxu0 %vm21226_vm5, %v12961_v2  ;;  %vm21236_vm5 = vcmask 785408  }
 0x62c   :  { %v13600_v5 = vpop.permute.xlu0 %13599  ;;  %v12948_v50 = vpop.permute.xlu1 %12947  ;;  %15648 = vmatmul.mubr.msk.f32.vlgmr.msra.gmra.mrb[28].mxu0 %vm21227_vm15, %v19810_v13  ;;  %vm21237_vm15 = vmmov %vm21236_vm5 }
 0x62d   :  { %v12963_v31 = vsel %vm21228_vm3, %v12946_v21, %v12948_v50  ;;  %v12981_v42 = vsel %vm21229_vm12, %v12948_v50, %v19773_v53  ;;  %13737 = vmatprep.mubr.f32.mxu0 %v21024_v46  ;;  %v15652_v53 = vld [vmem:[%s20113_s6 + $0x38] sm:$0xff]  ;;  %v13619_v15 = vsel %vm21237_vm15, %v19868_v44, %v13590_v22  ;;  %vm21238_vm3 = vmmov %vm21235_vm11 }
 0x62e   :  { %15649 = vmatprep.subr.msk.mxu1 %vm21233_vm13, %v12981_v42  ;;  %vm21239_vm12 = vmmov %vm21236_vm5 }
 0x62f   :  { %15650 = vmatpush1.msk.msra.mxu1 %vm21234_vm0, %v12963_v31  ;;  %vm21240_vm14 = vmmov %vm21236_vm5 }
 0x630   :  { %v13604_v59 = vpop.permute.xlu0 %13603  ;;  %v13592_v60 = vpop.permute.xlu1 %13591  ;;  %15651 = vmatmul.mubr.msk.f32.vlgmr.msra.gmra.mrb[28].mxu1 %vm21235_vm11, %v19810_v13  ;;  %vm21241_vm13 = vmmov %vm21238_vm3 }
 0x631   :  { %v13620_v1 = vsel %vm21236_vm5, %v13590_v22, %v13592_v60  ;;  %13808 = vmatprep.mubr.f32.mxu1 %v21024_v46  ;;  %v13621_v36 = vsel %vm21240_vm14, %v13592_v60, %v13594_v56  ;;  %vm21242_vm0 = vmmov %vm21236_vm5 }
 0x632   :  { %13673 = vmatprep.subr.mxu0 %v13620_v1  ;;  %vm21243_vm11 = vmmov %vm21242_vm0 }
 0x633   :  { %13674 = vmatpush1.msra.mxu0 %v13619_v15  ;;  %vm21244_vm5 = vmmov %vm21238_vm3  ;;  %v21296_v15 = vcombine.low %v21294_v24, %v21295_v52 }
 0x634   :  { %v13608_v51 = vpop.permute.xlu0 %13607  ;;  %v13596_v33 = vpop.permute.xlu1 %13595  ;;  %15653 = vmatmul.mubr.msk.f32.vlgmr.msra.gmra.mrb[22].mxu0 %vm21238_vm3, %v15652_v53  ;;  %vm21245_vm15 = vmmov %vm21242_vm0 }
 0x635   :  { %v13622_v6 = vsel %vm21239_vm12, %v13594_v56, %v13596_v33  ;;  %13879 = vmatprep.mubr.f32.mxu0 %v21024_v46  ;;  %vm21246_vm3 = vmmov %vm21242_vm0 }
 0x636   :  { %13744 = vmatprep.subr.mxu1 %v13622_v6  ;;  %vm21247_vm12 = vmmov %vm21244_vm5 }
 0x637   :  { %13745 = vmatpush1.msra.mxu1 %v13621_v36  ;;  %vm21248_vm14 = vmmov %vm21242_vm0  ;;  %v21297_v36 = vld [vmem:[#allocation9_spill] sm:$0xff] }
 0x638   :  { %v13612_v18 = vpop.permute.xlu0 %13611  ;;  %v13598_v45 = vpop.permute.xlu1 %13597  ;;  %15654 = vmatmul.mubr.msk.f32.vlgmr.msra.gmra.mrb[22].mxu1 %vm21241_vm13, %v15652_v53  ;;  %vm21249_vm13 = vmmov %vm21242_vm0 }
 0x639   :  { %v13623_v48 = vsel %vm21242_vm0, %v13596_v33, %v13598_v45  ;;  %v13624_v19 = vsel %vm21243_vm11, %v13598_v45, %v13600_v5  ;;  %13950 = vmatprep.mubr.f32.mxu1 %v21024_v46  ;;  %vm21250_vm0 = vmmov %vm21244_vm5 }
 0x63a   :  { %13815 = vmatprep.subr.mxu0 %v13624_v19  ;;  %vm21251_vm11 = vmmov %vm21246_vm3 }
 0x63b   :  { %13816 = vmatpush1.msra.mxu0 %v13623_v48 }
 0x63c   :  { %v13616_v41 = vpop.permute.xlu0 %13615  ;;  %v13602_v54 = vpop.permute.xlu1 %13601  ;;  %15655 = vmatmul.mubr.msk.f32.vlgmr.msra.gmra.mrb[24].mxu0 %vm21244_vm5, %v15652_v53  ;;  %vm21252_vm5 = vmmov %vm21246_vm3 }
 0x63d   :  { %v13625_v13 = vsel %vm21245_vm15, %v13600_v5, %v13602_v54  ;;  %v13626_v26 = vsel %vm21246_vm3, %v13602_v54, %v13604_v59  ;;  %14021 = vmatprep.mubr.f32.mxu0 %v21024_v46  ;;  %vm21253_vm15 = vmmov %vm21250_vm0 }
 0x63e   :  { %15656 = vmatprep.subr.msk.mxu1 %vm21208_vm4, %v13626_v26 }
 0x63f   :  { %13887 = vmatpush1.msra.mxu1 %v13625_v13 }
 0x640   :  { %v13606_v35 = vpop.permute.xlu1 %13605  ;;  %15657 = vmatmul.mubr.msk.f32.vlgmr.msra.gmra.mrb[24].mxu1 %vm21247_vm12, %v15652_v53  ;;  %v14260_v57 = vpop.permute.xlu0 %14259  ;;  %vm21254_vm12 = vmmov %vm21246_vm3 }
 0x641   :  { %v13627_v49 = vsel %vm21248_vm14, %v13604_v59, %v13606_v35  ;;  %v13628_v25 = vsel %vm21249_vm13, %v13606_v35, %v13608_v51  ;;  %14092 = vmatprep.mubr.f32.mxu1 %v21024_v46  ;;  %vm21255_vm14 = vmmov %vm21250_vm0 }
 0x642   :  { %13957 = vmatprep.subr.mxu0 %v13628_v25  ;;  %vm21256_vm13 = vmmov %vm21246_vm3  ;;  %v21302_v25 = vld [vmem:[#allocation20_spill] sm:$0xff] }
 0x643   :  { %13958 = vmatpush1.msra.mxu0 %v13627_v49 }
 0x644   :  { %v13610_v37 = vpop.permute.xlu1 %13609  ;;  %15658 = vmatmul.mubr.msk.f32.vlgmr.msra.gmra.mrb[26].mxu0 %vm21250_vm0, %v15652_v53  ;;  %v14264_v9 = vpop.permute.xlu0 %14263  ;;  %vm21257_vm0 = vmmov %vm21246_vm3 }
 0x645   :  { %v13629_v28 = vsel %vm21251_vm11, %v13608_v51, %v13610_v37  ;;  %v13630_v61 = vsel %vm21252_vm5, %v13610_v37, %v13612_v18  ;;  %14163 = vmatprep.mubr.f32.mxu0 %v21024_v46  ;;  %vm21258_vm11 = vmmov %vm21255_vm14  ;;  %vm21259_vm5 = vcmask 777216   ;;  %v21303_v37 = vld [vmem:[#allocation21_spill] sm:$0xff] }
 0x646   :  { %14028 = vmatprep.subr.mxu1 %v13630_v61 }
 0x647   :  { %14029 = vmatpush1.msra.mxu1 %v13629_v28  ;;  %v21304_v28 = vcombine.low %v21302_v25, %v21303_v37 }
 0x648   :  { %v13614_v21 = vpop.permute.xlu1 %13613  ;;  %15659 = vmatmul.mubr.msk.f32.vlgmr.msra.gmra.mrb[26].mxu1 %vm21253_vm15, %v15652_v53  ;;  %v19928_v22 = vpop.permute.xlu0 %14257  ;;  %vm21260_vm15 = vmmov %vm21259_vm5 }
 0x649   :  { %v13631_v62 = vsel %vm21246_vm3, %v13612_v18, %v13614_v21  ;;  %v13632_v12 = vsel %vm21254_vm12, %v13614_v21, %v13616_v41  ;;  %14234 = vmatprep.mubr.f32.mxu1 %v21024_v46  ;;  %v14289_v0 = vsel %vm21260_vm15, %v19928_v22, %v14260_v57  ;;  %vm21261_vm3 = vnez %v21089_v63  ;;  %v21298_v18 = vld [vmem:[#allocation12_spill] sm:$0xff]  ;;  %v21305_v21 = vld [vmem:[#allocation22_spill] sm:$0xff] }
 0x64a   :  { %14099 = vmatprep.subr.mxu0 %v13632_v12  ;;  %vm21262_vm12 = vnez %v21091_v11  ;;  %v21299_v45 = vcombine.low %v21297_v36, %v21298_v18  ;;  %v21301_v13 = vcombine.high %v21297_v36, %v21298_v18 }
 0x64b   :  { %14100 = vmatpush1.msra.mxu0 %v13631_v62  ;;  %v21306_v62 = vld [vmem:[#allocation23_spill] sm:$0xff] }
 0x64c   :  { %v13618_v38 = vpop.permute.xlu1 %13617  ;;  %15660 = vmatmul.mubr.msk.f32.vlgmr.msra.gmra.mrb[28].mxu0 %vm21255_vm14, %v15652_v53  ;;  %v14270_v17 = vpop.permute.xlu0 %14269  ;;  %vm21263_vm14 = vmmov %vm21258_vm11  ;;  %v21307_v12 = vcombine.low %v21305_v21, %v21306_v62 }
 0x64d   :  { %v13633_v43 = vsel %vm21256_vm13, %v13616_v41, %v13618_v38  ;;  %v13651_v14 = vsel %vm21257_vm0, %v13618_v38, %v19868_v44  ;;  %14407 = vmatprep.mubr.f32.mxu0 %v21024_v46  ;;  %vm21264_vm13 = vmmov %vm21259_vm5 }
 0x64e   :  { %15661 = vmatprep.subr.msk.mxu1 %vm21231_vm10, %v13651_v14  ;;  %vm21265_vm0 = vmmov %vm21259_vm5 }
 0x64f   :  { %14171 = vmatpush1.msra.mxu1 %v13633_v43  ;;  %vm21268_vm15 = vmmov %vm21263_vm14 }
 0x650   :  { %v14262_v47 = vpop.permute.xlu1 %14261  ;;  %15662 = vmatmul.mubr.msk.f32.vlgmr.msra.gmra.mrb[28].mxu1 %vm21258_vm11, %v15652_v53  ;;  %vm21266_vm11 = vnez %v21096_v58  ;;  %v14274_v11 = vpop.permute.xlu0 %14273 }
 0x651   :  { %v14290_v56 = vsel %vm21259_vm5, %v14260_v57, %v14262_v47  ;;  %14478 = vmatprep.mubr.f32.mxu1 %v21024_v46  ;;  %v14291_v2 = vsel %vm21265_vm0, %v14262_v47, %v14264_v9  ;;  %vm21267_vm5 = vnez %v21098_v20  ;;  %v21308_v47 = vcombine.high %v21302_v25, %v21303_v37 }
 0x652   :  { %15664 = vmatprep.subr.msk.mxu0 %vm21261_vm3, %v14290_v56  ;;  %vm21269_vm3 = vmmov %vm21265_vm0 }
 0x653   :  { %15665 = vmatpush1.msk.msra.mxu0 %vm21262_vm12, %v14289_v0  ;;  %vm21270_vm12 = vmmov %vm21265_vm0  ;;  %v21309_v0 = vcombine.high %v21305_v21, %v21306_v62 }
 0x654   :  { %15666 = vmatmul.mubr.msk.f32.vlgmr.msra.gmra.mrb[22].mxu0 %vm21263_vm14, %v15663_v40  ;;  %v14266_v44 = vpop.permute.xlu1 %14265  ;;  %vm21271_vm14 = vnez %v21102_v7  ;;  %vm21273_vm0 = vmmov %vm21268_vm15  ;;  %v14278_v7 = vpop.permute.xlu0 %14277 }
 0x655   :  { %v14292_v3 = vsel %vm21264_vm13, %v14264_v9, %v14266_v44  ;;  %14549 = vmatprep.mubr.f32.mxu0 %v21024_v46  ;;  %vm21272_vm13 = vnez %v21104_v39 }
 0x656   :  { %15667 = vmatprep.subr.msk.mxu1 %vm21266_vm11, %v14292_v3  ;;  %vm21274_vm11 = vmmov %vm21269_vm3 }
 0x657   :  { %15668 = vmatpush1.msk.msra.mxu1 %vm21267_vm5, %v14291_v2  ;;  %vm21275_vm5 = vmmov %vm21269_vm3 }
 0x658   :  { %15669 = vmatmul.mubr.msk.f32.vlgmr.msra.gmra.mrb[22].mxu1 %vm21268_vm15, %v15663_v40  ;;  %v14268_v63 = vpop.permute.xlu1 %14267  ;;  %vm21276_vm15 = vnez %v21107_v30  ;;  %v14282_v30 = vpop.permute.xlu0 %14281 }
 0x659   :  { %v14293_v23 = vsel %vm21269_vm3, %v14266_v44, %v14268_v63  ;;  %v14294_v5 = vsel %vm21270_vm12, %v14268_v63, %v14270_v17  ;;  %14620 = vmatprep.mubr.f32.mxu1 %v21024_v46  ;;  %vm21277_vm3 = vmand %vm21208_vm4, %vm21276_vm15  ;;  %vm21285_vm15 = vnez %v21119_v4  ;;  %v21310_v63 = vld [vmem:[#allocation10_spill] sm:$0xff] }
 0x65a   :  { %15670 = vmatprep.subr.msk.mxu0 %vm21271_vm14, %v14294_v5  ;;  %vm21278_vm12 = vmmov %vm21273_vm0 }
 0x65b   :  { %15671 = vmatpush1.msk.msra.mxu0 %vm21272_vm13, %v14293_v23  ;;  %vm21279_vm14 = vmmov %vm21275_vm5 }
 0x65c   :  { %15672 = vmatmul.mubr.msk.f32.vlgmr.msra.gmra.mrb[24].mxu0 %vm21273_vm0, %v15663_v40  ;;  %v14272_v58 = vpop.permute.xlu1 %14271  ;;  %vm21280_vm13 = vmmov %vm21275_vm5  ;;  %vm21281_vm0 = vnez %v21112_v27  ;;  %v14286_v27 = vpop.permute.xlu0 %14285 }
 0x65d   :  { %v14295_v20 = vsel %vm21274_vm11, %v14270_v17, %v14272_v58  ;;  %v14296_v50 = vsel %vm21275_vm5, %v14272_v58, %v14274_v11  ;;  %14691 = vmatprep.mubr.f32.mxu0 %v21024_v46  ;;  %vm21282_vm11 = vnez %v21114_v32  ;;  %vm21283_vm4 = vmmov %vm21278_vm12 }
 0x65e   :  { %15673 = vmatprep.subr.msk.mxu1 %vm21277_vm3, %v14296_v50  ;;  %vm21286_vm3 = vmmov %vm21283_vm4  ;;  %v21314_v50 = vld [vmem:[#allocation15_spill] sm:$0xff] }
 0x65f   :  { %15674 = vmatpush1.msk.msra.mxu1 %vm21185_vm6, %v14295_v20  ;;  %vm21284_vm6 = vmmov %vm21275_vm5  ;;  %v21313_v20 = vld [vmem:[#allocation13_spill] sm:$0xff] }
 0x660   :  { %15675 = vmatmul.mubr.msk.f32.vlgmr.msra.gmra.mrb[24].mxu1 %vm21278_vm12, %v15663_v40  ;;  %vm21287_vm12 = vmmov %vm21275_vm5 }
 0x661   :  { %v14276_v39 = vpop.permute.xlu1 %14275  ;;  %14762 = vmatprep.mubr.f32.mxu1 %v21024_v46 }
 0x662   :  { %v14297_v31 = vsel %vm21279_vm14, %v14274_v11, %v14276_v39  ;;  %v14298_v42 = vsel %vm21280_vm13, %v14276_v39, %v14278_v7  ;;  %vm21288_vm14 = vmmov %vm21275_vm5  ;;  %v21311_v11 = vld [vmem:[#allocation14_spill] sm:$0xff] }
 0x663   :  { %15676 = vmatprep.subr.msk.mxu0 %vm21281_vm0, %v14298_v42  ;;  %vm21289_vm13 = vmmov %vm21286_vm3  ;;  %v21312_v23 = vcombine.low %v21310_v63, %v21311_v11 }
 0x664   :  { %15677 = vmatpush1.msk.msra.mxu0 %vm21282_vm11, %v14297_v31  ;;  %vm21292_vm11 = vmand %vm21231_vm10, %vm21132_vm1 }
 0x665   :  { %15678 = vmatmul.mubr.msk.f32.vlgmr.msra.gmra.mrb[26].mxu0 %vm21283_vm4, %v15663_v40 }
 0x666   :  { %v14280_v34 = vpop.permute.xlu1 %14279  ;;  %14833 = vmatprep.mubr.f32.mxu0 %v21024_v46 }
 0x667   :  { %v14299_v16 = vsel %vm21284_vm6, %v14278_v7, %v14280_v34  ;;  %v14300_v59 = vsel %vm21275_vm5, %v14280_v34, %v14282_v30  ;;  %v21315_v7 = vcombine.low %v21313_v20, %v21314_v50  ;;  %v21316_v34 = vcombine.high %v21310_v63, %v21311_v11 }
 0x668   :  { %15679 = vmatprep.subr.msk.mxu1 %vm21285_vm15, %v14300_v59 }
 0x669   :  { %15680 = vmatpush1.msk.msra.mxu1 %vm21189_vm2, %v14299_v16  ;;  %vm21290_vm2 = vmmov %vm21275_vm5 }
 0x66a   :  { %15681 = vmatmul.mubr.msk.f32.vlgmr.msra.gmra.mrb[26].mxu1 %vm21286_vm3, %v15663_v40  ;;  %vm21291_vm0 = vmmov %vm21290_vm2 }
 0x66b   :  { %v14284_v32 = vpop.permute.xlu1 %14283  ;;  %14904 = vmatprep.mubr.f32.mxu1 %v21024_v46 }
 0x66c   :  { %v14301_v60 = vsel %vm21287_vm12, %v14282_v30, %v14284_v32  ;;  %v14302_v1 = vsel %vm21288_vm14, %v14284_v32, %v14286_v27 }
 0x66d   :  { %15682 = vmatprep.subr.msk.mxu0 %vm21188_vm7, %v14302_v1  ;;  %vm21293_vm7 = vmmov %vm21286_vm3  ;;  %v15235_v6 = vpop.permute.xlu0 %15234 }
 0x66e   :  { %15683 = vmatpush1.msk.msra.mxu0 %vm21191_vm9, %v14301_v60 }
 0x66f   :  { %15684 = vmatmul.mubr.msk.f32.vlgmr.msra.gmra.mrb[28].mxu0 %vm21289_vm13, %v15663_v40 }
 0x670   :  { %v14288_v4 = vpop.permute.xlu1 %14287 }
 0x671   :  { %v14303_v29 = vsel %vm21290_vm2, %v14286_v27, %v14288_v4  ;;  %v14321_v53 = vsel %vm21291_vm0, %v14288_v4, %v19928_v22  ;;  %v21317_v27 = vcombine.high %v21313_v20, %v21314_v50 }
 0x672   :  { %15685 = vmatprep.subr.msk.mxu1 %vm21292_vm11, %v14321_v53  ;;  %v21319_v53 = vld [vmem:[#allocation25_spill] sm:$0xff] }
 0x673   :  { %15686 = vmatpush1.msk.msra.mxu1 %vm21134_vm8, %v14303_v29  ;;  %v21318_v29 = vld [vmem:[#allocation24_spill] sm:$0xff] }
 0x674   :  { %15687 = vmatmul.mubr.msk.f32.vlgmr.msra.gmra.mrb[28].mxu1 %vm21293_vm7, %v15663_v40 }
 0x727   :  { %v14409_v46 = vpop.f32.mrb[22].mxu0 }
 0x728   :  { %v15215_v51 = vadd.f32 %v21296_v15, %v14409_v46  ;;  %v14411_v33 = vpop.f32.mrb[23].mxu0  ;;  %v21320_v46 = vcombine.low %v21318_v29, %v21319_v53  ;;  %v21321_v15 = vld [vmem:[#allocation26_spill] sm:$0xff] }
 0x729   :  { %v15216_v8 = vadd.f32 %v21299_v45, %v14411_v33 }
 0x72a   :  { %v15237_v48 = vadd.f32 %v15235_v6, %v15215_v51  ;;  %v21322_v51 = vld [vmem:[#allocation27_spill] sm:$0xff] }
 0x72b   :  { %v15238_v10 = vadd.f32 %v15235_v6, %v15216_v8  ;;  %v14480_v19 = vpop.f32.mrb[22].mxu1  ;;  %v21323_v33 = vcombine.low %v21321_v15, %v21322_v51 }
 0x72c   :  { %15253 = vst [vmem:[%s20117_s10] sm:$0xff] %v15237_v48  ;;  %v15217_v41 = vadd.f32 %v21300_v55, %v14480_v19  ;;  %v14482_v54 = vpop.f32.mrb[23].mxu1  ;;  %v21324_v48 = vcombine.high %v21318_v29, %v21319_v53  ;;  %v21325_v55 = vcombine.high %v21321_v15, %v21322_v51 }
 0x72d   :  { %15254 = vst [vmem:[%s20117_s10 + $0x8] sm:$0xff] %v15238_v10  ;;  %v15218_v26 = vadd.f32 %v21301_v13, %v14482_v54 }
 0x72e   :  { %v15239_v35 = vadd.f32 %v15235_v6, %v15217_v41 }
 0x72f   :  { %v15240_v57 = vadd.f32 %v15235_v6, %v15218_v26  ;;  %v14551_v49 = vpop.f32.mrb[24].mxu0 }
 0x730   :  { %15255 = vst [vmem:[%s20117_s10 + $0x10] sm:$0xff] %v15239_v35  ;;  %v15219_v61 = vadd.f32 %v21304_v28, %v14551_v49  ;;  %v14553_v9 = vpop.f32.mrb[25].mxu0 }
 0x731   :  { %15256 = vst [vmem:[%s20117_s10 + $0x18] sm:$0xff] %v15240_v57  ;;  %v15220_v38 = vadd.f32 %v21307_v12, %v14553_v9 }
 0x732   :  { %v15241_v22 = vadd.f32 %v15235_v6, %v15219_v61 }
 0x733   :  { %v15242_v43 = vadd.f32 %v15235_v6, %v15220_v38  ;;  %v14622_v14 = vpop.f32.mrb[24].mxu1 }
 0x734   :  { %15257 = vst [vmem:[%s20117_s10 + $0x20] sm:$0xff] %v15241_v22  ;;  %v15221_v56 = vadd.f32 %v21308_v47, %v14622_v14  ;;  %v14624_v40 = vpop.f32.mrb[25].mxu1 }
 0x735   :  { %15258 = vst [vmem:[%s20117_s10 + $0x28] sm:$0xff] %v15242_v43  ;;  %v15222_v17 = vadd.f32 %v21309_v0, %v14624_v40 }
 0x736   :  { %v15243_v44 = vadd.f32 %v15235_v6, %v15221_v56 }
 0x737   :  { %v15244_v3 = vadd.f32 %v15235_v6, %v15222_v17 }
 0x738   :  { %15259 = vst [vmem:[%s20117_s10 + $0x30] sm:$0xff] %v15243_v44  ;;  %v14693_v2 = vpop.f32.mrb[26].mxu0 }
 0x739   :  { %15260 = vst [vmem:[%s20117_s10 + $0x38] sm:$0xff] %v15244_v3  ;;  %v15223_v5 = vadd.f32 %v21312_v23, %v14693_v2  ;;  %v14695_v58 = vpop.f32.mrb[27].mxu0 }
 0x73a   :  { %v15224_v39 = vadd.f32 %v21315_v7, %v14695_v58 }
 0x73b   :  { %v15245_v31 = vadd.f32 %v15235_v6, %v15223_v5 }
 0x73c   :  { %v15246_v42 = vadd.f32 %v15235_v6, %v15224_v39 }
 0x73d   :  { %15261 = vst [vmem:[%s20117_s10 + $0x40] sm:$0xff] %v15245_v31  ;;  %v14764_v30 = vpop.f32.mrb[26].mxu1 }
 0x73e   :  { %15262 = vst [vmem:[%s20117_s10 + $0x48] sm:$0xff] %v15246_v42  ;;  %v15225_v16 = vadd.f32 %v21316_v34, %v14764_v30  ;;  %v14766_v59 = vpop.f32.mrb[27].mxu1 }
 0x73f   :  { %v15226_v32 = vadd.f32 %v21317_v27, %v14766_v59 }
 0x740   :  { %v15247_v60 = vadd.f32 %v15235_v6, %v15225_v16 }
 0x741   :  { %v15248_v1 = vadd.f32 %v15235_v6, %v15226_v32 }
 0x742   :  { %15263 = vst [vmem:[%s20117_s10 + $0x50] sm:$0xff] %v15247_v60  ;;  %v14835_v4 = vpop.f32.mrb[28].mxu0 }
 0x743   :  { %15264 = vst [vmem:[%s20117_s10 + $0x58] sm:$0xff] %v15248_v1  ;;  %v15227_v24 = vadd.f32 %v21320_v46, %v14835_v4  ;;  %v14837_v52 = vpop.f32.mrb[29].mxu0 }
 0x744   :  { %v15228_v36 = vadd.f32 %v21323_v33, %v14837_v52 }
 0x745   :  { %v15249_v18 = vadd.f32 %v15235_v6, %v15227_v24 }
 0x746   :  { %v15250_v45 = vadd.f32 %v15235_v6, %v15228_v36 }
 0x747   :  { %15265 = vst [vmem:[%s20117_s10 + $0x60] sm:$0xff] %v15249_v18  ;;  %v14906_v8 = vpop.f32.mrb[28].mxu1 }
 0x748   :  { %15266 = vst [vmem:[%s20117_s10 + $0x68] sm:$0xff] %v15250_v45  ;;  %v15229_v10 = vadd.f32 %v21324_v48, %v14906_v8  ;;  %v14908_v19 = vpop.f32.mrb[29].mxu1 }
 0x749   :  { %v15230_v41 = vadd.f32 %v21325_v55, %v14908_v19 }
 0x74a   :  { %v15251_v54 = vadd.f32 %v15235_v6, %v15229_v10 }
 0x74b   :  { %v15252_v13 = vadd.f32 %v15235_v6, %v15230_v41 }
 0x74c   :  { %15267 = vst [vmem:[%s20117_s10 + $0x70] sm:$0xff] %v15251_v54 }
 0x74d   :  { %15268 = vst [vmem:[%s20117_s10 + $0x78] sm:$0xff] %v15252_v13 }
 0x74e   :  { %15273 = vsyncpa [#allocation3], 1 }

</bundles_post_ra>
